<compile_context>
chip_gen: v5e
topology: v5e:2x2
jax: 0.10.0
libtpu: 0.0.40
codegen_flags: <defaults>
</compile_context>

<pallas_src>
import functools
import math

import jax
import jax.numpy as jnp
from jax.experimental import pallas as pl
from jax.experimental.pallas import tpu as pltpu

# ----------------------------- config ---------------------------------------
PAD = 0
MASK_TOK = 4

VOCAB = 50
HIDDEN = 32
N_HEADS = 4
HEAD_DIM = HIDDEN // N_HEADS
FFN = 64
N_LAYERS = 2
MAX_POS = 16
LN_EPS = 1e-12
NEG_INF = -1e9


# ----------------------------- kernel helpers --------------------------------
def _layer_norm(v, params):
    # params: (2, H) -> row 0 = gamma, row 1 = beta   (f32 math)
    g = params[0:1, :]
    b = params[1:2, :]
    mu = jnp.mean(v, axis=-1, keepdims=True)
    var = jnp.mean((v - mu) ** 2, axis=-1, keepdims=True)
    return (v - mu) * jax.lax.rsqrt(var + LN_EPS) * g + b


# ----------------------------- fused Pallas kernel ---------------------------
def fused_decoder_kernel(emb_ref, enc_ref, bias_ref, npm_ref, emb_ln_ref,
                         sqkv_ref, so_ref, sb_ref, ln1_ref,
                         cqkv_ref, co_ref, cb_ref, ln2_ref,
                         w1_ref, b1_ref, w2_ref, b2_ref, ln3_ref,
                         out_ref, *, s_q, s_kv, nh, hd, n_layers):
    f32 = jnp.float32
    hidden = nh * hd
    scale = 1.0 / math.sqrt(hd)

    # hoisted: non-pad row mask broadcast (reused 6x), additive key-pad bias, enc rows
    npm = jnp.broadcast_to(npm_ref[...], (s_q, hidden))      # (Sq, H)  f32
    attn_bias = bias_ref[...]                                 # (Sq, Sk) f32 additive
    enc = enc_ref[...]                                        # (Se, H)  f32

    def mha(q_in, kv_in, rows_kv, qkv_ref, o_ref, b_ref, layer, bias):
        # q_in: (Sq, H); kv_in: (rows_kv, H)
        w3 = qkv_ref[layer]            # (3, H, H)  [Wq, Wk, Wv]
        wo = o_ref[layer]              # (H, H)
        bv = b_ref[layer]              # (4, H)     [bq, bk, bv, bo]
        q = jnp.dot(q_in, w3[0], preferred_element_type=f32) + bv[0:1, :]
        k = jnp.dot(kv_in, w3[1], preferred_element_type=f32) + bv[1:2, :]
        v = jnp.dot(kv_in, w3[2], preferred_element_type=f32) + bv[2:3, :]
        qh = q.reshape(s_q, nh, hd)
        kh = k.reshape(rows_kv, nh, hd)
        vh = v.reshape(rows_kv, nh, hd)
        # all heads in one batched contraction
        sc = jnp.einsum('qhd,khd->hqk', qh, kh,
                        preferred_element_type=f32) * scale   # (nh, Sq, Sk)
        if bias is not None:
            sc = sc + bias[None, :, :]
        # online softmax; approximate reciprocal -> EUP slot
        m = jnp.max(sc, axis=-1, keepdims=True)
        e = jnp.exp(sc - m)
        denom = jnp.sum(e, axis=-1, keepdims=True)
        p = e * pl.reciprocal(denom, approx=True)
        ctx = jnp.einsum('hqk,khd->qhd', p, vh,
                         preferred_element_type=f32)          # (Sq, nh, hd)
        ctx = ctx.reshape(s_q, hidden)
        # single output projection against unsplit Wo
        return jnp.dot(ctx, wo, preferred_element_type=f32) + bv[3:4, :]

    # BertEmbeddings LayerNorm (word + position embeddings summed in wrapper).
    x = _layer_norm(emb_ref[...], emb_ln_ref[...])

    for l in range(n_layers):                                  # static, unrolled
        # --- self attention (additive key-pad bias from tgt_seq) ---
        sa = mha(x, x, s_q, sqkv_ref, so_ref, sb_ref, l, attn_bias)
        x = _layer_norm(x + sa, ln1_ref[l]) * npm
        # --- cross attention to enc_output (src all-ones -> no key mask) ---
        ca = mha(x, enc, s_kv, cqkv_ref, co_ref, cb_ref, l, None)
        x = _layer_norm(x + ca, ln2_ref[l]) * npm
        # --- feed forward (GELU) ---
        h1 = jax.nn.gelu(
            jnp.dot(x, w1_ref[l], preferred_element_type=f32) + b1_ref[l])
        ff = jnp.dot(h1, w2_ref[l], preferred_element_type=f32) + b2_ref[l]
        x = _layer_norm(x + ff, ln3_ref[l]) * npm

    out_ref[...] = x.astype(out_ref.dtype)


# ----------------------------- parameters ------------------------------------
def init_params(key):
    def nrm(k, shape, scale=0.02):
        return scale * jax.random.normal(k, shape, dtype=jnp.float32)

    keys = jax.random.split(key, 8)
    ln_pair = jnp.stack([jnp.ones((HIDDEN,), jnp.float32),
                         jnp.zeros((HIDDEN,), jnp.float32)])      # (2, H)
    ln_stack = jnp.broadcast_to(ln_pair, (N_LAYERS, 2, HIDDEN))   # (L, 2, H)
    return {
        "word_emb": nrm(keys[0], (VOCAB, HIDDEN)),
        "pos_emb": nrm(keys[1], (MAX_POS, HIDDEN)),
        "emb_ln": ln_pair,
        "self_qkv_w": nrm(keys[2], (N_LAYERS, 3, HIDDEN, HIDDEN)),
        "self_o_w": nrm(keys[3], (N_LAYERS, HIDDEN, HIDDEN)),
        "self_b": jnp.zeros((N_LAYERS, 4, HIDDEN), jnp.float32),
        "ln1": ln_stack,
        "cross_qkv_w": nrm(keys[4], (N_LAYERS, 3, HIDDEN, HIDDEN)),
        "cross_o_w": nrm(keys[5], (N_LAYERS, HIDDEN, HIDDEN)),
        "cross_b": jnp.zeros((N_LAYERS, 4, HIDDEN), jnp.float32),
        "ln2": ln_stack,
        "ffn_w1": nrm(keys[6], (N_LAYERS, HIDDEN, FFN)),
        "ffn_b1": jnp.zeros((N_LAYERS, 1, FFN), jnp.float32),
        "ffn_w2": nrm(keys[7], (N_LAYERS, FFN, HIDDEN)),
        "ffn_b2": jnp.zeros((N_LAYERS, 1, HIDDEN), jnp.float32),
        "ln3": ln_stack,
    }


# ----------------------------- forward wrapper --------------------------------
@jax.jit
def bert_decoder_disentangled_forward(params, tgt_seq, enc_output):
    """Mirrors BertDecoderDisentangled.forward for mlm_tgt_tokens=None, non-list
    tgt_seq, verb=False, NARFormer / enhance_input=0.  Returns (seq_probs, embs)."""
    B, S = tgt_seq.shape
    Se = enc_output.shape[1]
    H = HIDDEN

    # self-attention key-pad mask as additive bias (NARFormer path); npm per row
    key_pad = (tgt_seq == PAD)                                        # (B, S)
    bias = jnp.where(key_pad, NEG_INF, 0.0).astype(jnp.float32)       # (B, S)
    bias_rows = jnp.broadcast_to(bias[:, None, :],
                                 (B, S, S)).reshape(B * S, S)         # (B*Sq, Sk)
    npm = (tgt_seq != PAD).astype(jnp.float32).reshape(B * S, 1)      # (B*S, 1)

    # BertEmbeddings: word + position embedding (LayerNorm done inside kernel)
    we = params["word_emb"][tgt_seq]                                  # (B, S, H)
    pe = params["pos_emb"][jnp.arange(S)][None, :, :]
    emb = (we + pe).reshape(B * S, H)                                 # f32 rows

    enc_flat = enc_output.reshape(B * Se, H).astype(jnp.float32)

    inputs = (emb, enc_flat, bias_rows, npm, params["emb_ln"],
              params["self_qkv_w"], params["self_o_w"], params["self_b"], params["ln1"],
              params["cross_qkv_w"], params["cross_o_w"], params["cross_b"], params["ln2"],
              params["ffn_w1"], params["ffn_b1"],
              params["ffn_w2"], params["ffn_b2"], params["ln3"])

    kernel = functools.partial(
        fused_decoder_kernel, s_q=S, s_kv=Se,
        nh=N_HEADS, hd=HEAD_DIM, n_layers=N_LAYERS)

    def const_spec(shape):
        # weight slab: same block every grid step -> DMA'd once, stays resident
        n = len(shape)
        return pl.BlockSpec(shape, lambda b, n=n: (0,) * n)

    in_specs = [
        pl.BlockSpec((S, H), lambda b: (b, 0)),    # emb rows of batch b
        pl.BlockSpec((Se, H), lambda b: (b, 0)),   # enc rows of batch b
        pl.BlockSpec((S, S), lambda b: (b, 0)),    # additive self-attn bias
        pl.BlockSpec((S, 1), lambda b: (b, 0)),    # non-pad row mask
    ] + [const_spec(a.shape) for a in inputs[4:]]

    out = pl.pallas_call(
        kernel,
        out_shape=jax.ShapeDtypeStruct((B * S, H), jnp.float32),
        grid=(B,),
        in_specs=in_specs,
        out_specs=pl.BlockSpec((S, H), lambda b: (b, 0)),
        compiler_params=pltpu.CompilerParams(
            dimension_semantics=("parallel",)),
    )(*inputs)

    seq_probs = out.reshape(B, S, H)   # res[-1]
    embs = we                          # TODO(synk): BertLayer "embs" undefined in source
    return seq_probs, embs


# ----------------------------- main ------------------------------------------
if __name__ == "__main__":
    B, S, Se = 2, 8, 8
    key = jax.random.PRNGKey(0)
    k_param, k_seq, k_enc = jax.random.split(key, 3)

    params = init_params(k_param)

    # tgt_seq: integer tokens with trailing PADs (PAD=0), one MASK token (4)
    tgt_seq = jax.random.randint(k_seq, (B, S), 1, VOCAB, dtype=jnp.int32)
    tgt_seq = tgt_seq.at[:, -2:].set(PAD)
    tgt_seq = tgt_seq.at[:, 2].set(MASK_TOK)

    enc_output = jax.random.normal(k_enc, (B, Se, HIDDEN), dtype=jnp.float32)

    seq_probs, embs = bert_decoder_disentangled_forward(params, tgt_seq, enc_output)
    jax.block_until_ready(seq_probs)
    jax.block_until_ready(embs)

    assert seq_probs.shape == (B, S, HIDDEN)
    assert embs.shape == (B, S, HIDDEN)
    assert bool(jnp.all(jnp.isfinite(seq_probs)))
    print("KERNEL_OK")
</pallas_src>

<mosaic_0001>
module attributes {stable_mosaic.version = 11 : i64} {
  func.func @fused_decoder_kernel(%arg0: i32, %arg1: memref<8x32xf32, #tpu.memory_space<vmem>>, %arg2: memref<8x32xf32, #tpu.memory_space<vmem>>, %arg3: memref<8x8xf32, #tpu.memory_space<vmem>>, %arg4: memref<8x1xf32, #tpu.memory_space<vmem>>, %arg5: memref<2x32xf32, #tpu.memory_space<vmem>>, %arg6: memref<2x3x32x32xf32, #tpu.memory_space<vmem>>, %arg7: memref<2x32x32xf32, #tpu.memory_space<vmem>>, %arg8: memref<2x4x32xf32, #tpu.memory_space<vmem>>, %arg9: memref<2x2x32xf32, #tpu.memory_space<vmem>>, %arg10: memref<2x3x32x32xf32, #tpu.memory_space<vmem>>, %arg11: memref<2x32x32xf32, #tpu.memory_space<vmem>>, %arg12: memref<2x4x32xf32, #tpu.memory_space<vmem>>, %arg13: memref<2x2x32xf32, #tpu.memory_space<vmem>>, %arg14: memref<2x32x64xf32, #tpu.memory_space<vmem>>, %arg15: memref<2x1x64xf32, #tpu.memory_space<vmem>>, %arg16: memref<2x64x32xf32, #tpu.memory_space<vmem>>, %arg17: memref<2x1x32xf32, #tpu.memory_space<vmem>>, %arg18: memref<2x2x32xf32, #tpu.memory_space<vmem>>, %arg19: memref<8x32xf32, #tpu.memory_space<vmem>>) attributes {dimension_semantics = [#tpu.dimension_semantics<parallel>], iteration_bounds = array<i64: 2>, scalar_prefetch = 0 : i64, scratch_operands = 0 : i64, tpu.core_type = #tpu.core_type<tc>, window_params = [{transform_indices = @transform_0, window_bounds = array<i64: 8, 32>}, {transform_indices = @transform_1, window_bounds = array<i64: 8, 32>}, {transform_indices = @transform_2, window_bounds = array<i64: 8, 8>}, {transform_indices = @transform_3, window_bounds = array<i64: 8, 1>}, {pipeline_mode = #tpu.pipeline_mode<synchronous>, transform_indices = @transform_4, window_bounds = array<i64: 2, 32>}, {pipeline_mode = #tpu.pipeline_mode<synchronous>, transform_indices = @transform_5, window_bounds = array<i64: 2, 3, 32, 32>}, {pipeline_mode = #tpu.pipeline_mode<synchronous>, transform_indices = @transform_6, window_bounds = array<i64: 2, 32, 32>}, {pipeline_mode = #tpu.pipeline_mode<synchronous>, transform_indices = @transform_7, window_bounds = array<i64: 2, 4, 32>}, {pipeline_mode = #tpu.pipeline_mode<synchronous>, transform_indices = @transform_8, window_bounds = array<i64: 2, 2, 32>}, {pipeline_mode = #tpu.pipeline_mode<synchronous>, transform_indices = @transform_9, window_bounds = array<i64: 2, 3, 32, 32>}, {pipeline_mode = #tpu.pipeline_mode<synchronous>, transform_indices = @transform_10, window_bounds = array<i64: 2, 32, 32>}, {pipeline_mode = #tpu.pipeline_mode<synchronous>, transform_indices = @transform_11, window_bounds = array<i64: 2, 4, 32>}, {pipeline_mode = #tpu.pipeline_mode<synchronous>, transform_indices = @transform_12, window_bounds = array<i64: 2, 2, 32>}, {pipeline_mode = #tpu.pipeline_mode<synchronous>, transform_indices = @transform_13, window_bounds = array<i64: 2, 32, 64>}, {pipeline_mode = #tpu.pipeline_mode<synchronous>, transform_indices = @transform_14, window_bounds = array<i64: 2, 1, 64>}, {pipeline_mode = #tpu.pipeline_mode<synchronous>, transform_indices = @transform_15, window_bounds = array<i64: 2, 64, 32>}, {pipeline_mode = #tpu.pipeline_mode<synchronous>, transform_indices = @transform_16, window_bounds = array<i64: 2, 1, 32>}, {pipeline_mode = #tpu.pipeline_mode<synchronous>, transform_indices = @transform_17, window_bounds = array<i64: 2, 2, 32>}, {transform_indices = @transform_18, window_bounds = array<i64: 8, 32>}]} {
    %c0 = arith.constant 0 : index
    %c0_0 = arith.constant 0 : index
    %0 = vector.load %arg4[%c0, %c0_0] : memref<8x1xf32, #tpu.memory_space<vmem>>, vector<8x1xf32>
    %1 = vector.shape_cast %0 : vector<8x1xf32> to vector<8x1xf32>
    %2 = vector.broadcast %1 : vector<8x1xf32> to vector<8x32xf32>
    %c0_1 = arith.constant 0 : index
    %c0_2 = arith.constant 0 : index
    %3 = vector.load %arg3[%c0_1, %c0_2] : memref<8x8xf32, #tpu.memory_space<vmem>>, vector<8x8xf32>
    %c0_3 = arith.constant 0 : index
    %c0_4 = arith.constant 0 : index
    %4 = vector.load %arg2[%c0_3, %c0_4] : memref<8x32xf32, #tpu.memory_space<vmem>>, vector<8x32xf32>
    %c0_5 = arith.constant 0 : index
    %c0_6 = arith.constant 0 : index
    %5 = vector.load %arg1[%c0_5, %c0_6] : memref<8x32xf32, #tpu.memory_space<vmem>>, vector<8x32xf32>
    %c0_7 = arith.constant 0 : index
    %c0_8 = arith.constant 0 : index
    %6 = vector.load %arg5[%c0_7, %c0_8] : memref<2x32xf32, #tpu.memory_space<vmem>>, vector<2x32xf32>
    %7 = vector.extract_strided_slice %6 {offsets = [0, 0], sizes = [1, 32], strides = [1, 1]} : vector<2x32xf32> to vector<1x32xf32>
    %8 = vector.extract_strided_slice %6 {offsets = [1, 0], sizes = [1, 32], strides = [1, 1]} : vector<2x32xf32> to vector<1x32xf32>
    %cst = arith.constant dense<0.000000e+00> : vector<8xf32>
    %9 = vector.multi_reduction <add>, %5, %cst [1] : vector<8x32xf32> to vector<8xf32>
    %10 = vector.shape_cast %9 : vector<8xf32> to vector<8x1xf32>
    %cst_9 = arith.constant 3.200000e+01 : f32
    %11 = vector.broadcast %cst_9 : f32 to vector<8x1xf32>
    %12 = arith.divf %10, %11 : vector<8x1xf32>
    %13 = vector.broadcast %12 : vector<8x1xf32> to vector<8x32xf32>
    %14 = arith.subf %5, %13 : vector<8x32xf32>
    %15 = arith.mulf %14, %14 : vector<8x32xf32>
    %cst_10 = arith.constant dense<0.000000e+00> : vector<8xf32>
    %16 = vector.multi_reduction <add>, %15, %cst_10 [1] : vector<8x32xf32> to vector<8xf32>
    %17 = vector.shape_cast %16 : vector<8xf32> to vector<8x1xf32>
    %cst_11 = arith.constant 3.200000e+01 : f32
    %18 = vector.broadcast %cst_11 : f32 to vector<8x1xf32>
    %19 = arith.divf %17, %18 : vector<8x1xf32>
    %20 = vector.broadcast %12 : vector<8x1xf32> to vector<8x32xf32>
    %21 = arith.subf %5, %20 : vector<8x32xf32>
    %cst_12 = arith.constant 9.99999996E-13 : f32
    %22 = vector.broadcast %cst_12 : f32 to vector<8x1xf32>
    %23 = arith.addf %19, %22 : vector<8x1xf32>
    %24 = math.rsqrt %23 : vector<8x1xf32>
    %25 = vector.broadcast %24 : vector<8x1xf32> to vector<8x32xf32>
    %26 = arith.mulf %21, %25 : vector<8x32xf32>
    %27 = vector.broadcast %7 : vector<1x32xf32> to vector<8x32xf32>
    %28 = arith.mulf %26, %27 : vector<8x32xf32>
    %29 = vector.broadcast %8 : vector<1x32xf32> to vector<8x32xf32>
    %30 = arith.addf %28, %29 : vector<8x32xf32>
    %c0_13 = arith.constant 0 : index
    %c0_14 = arith.constant 0 : index
    %c0_15 = arith.constant 0 : index
    %c0_16 = arith.constant 0 : index
    %31 = vector.load %arg6[%c0_13, %c0_14, %c0_15, %c0_16] : memref<2x3x32x32xf32, #tpu.memory_space<vmem>>, vector<1x3x32x32xf32>
    %32 = vector.shape_cast %31 : vector<1x3x32x32xf32> to vector<3x32x32xf32>
    %c0_17 = arith.constant 0 : index
    %c0_18 = arith.constant 0 : index
    %c0_19 = arith.constant 0 : index
    %33 = vector.load %arg7[%c0_17, %c0_18, %c0_19] : memref<2x32x32xf32, #tpu.memory_space<vmem>>, vector<1x32x32xf32>
    %34 = vector.shape_cast %33 : vector<1x32x32xf32> to vector<32x32xf32>
    %c0_20 = arith.constant 0 : index
    %c0_21 = arith.constant 0 : index
    %c0_22 = arith.constant 0 : index
    %35 = vector.load %arg8[%c0_20, %c0_21, %c0_22] : memref<2x4x32xf32, #tpu.memory_space<vmem>>, vector<1x4x32xf32>
    %36 = vector.shape_cast %35 : vector<1x4x32xf32> to vector<4x32xf32>
    %37 = vector.extract_strided_slice %32 {offsets = [0, 0, 0], sizes = [1, 32, 32], strides = [1, 1, 1]} : vector<3x32x32xf32> to vector<1x32x32xf32>
    %38 = vector.shape_cast %37 : vector<1x32x32xf32> to vector<32x32xf32>
    %cst_23 = arith.constant dense<0.000000e+00> : vector<8x32xf32>
    %39 = tpu.matmul %30, %38, %cst_23 {dimension_numbers = #tpu.dot_dimension_numbers<[1], [0], [0], [1], [0, 0, 1, 1], [], []>} : vector<8x32xf32>, vector<32x32xf32>, vector<8x32xf32> -> vector<8x32xf32>
    %40 = vector.extract_strided_slice %36 {offsets = [0, 0], sizes = [1, 32], strides = [1, 1]} : vector<4x32xf32> to vector<1x32xf32>
    %41 = vector.broadcast %40 : vector<1x32xf32> to vector<8x32xf32>
    %42 = arith.addf %39, %41 : vector<8x32xf32>
    %43 = vector.extract_strided_slice %32 {offsets = [1, 0, 0], sizes = [1, 32, 32], strides = [1, 1, 1]} : vector<3x32x32xf32> to vector<1x32x32xf32>
    %44 = vector.shape_cast %43 : vector<1x32x32xf32> to vector<32x32xf32>
    %cst_24 = arith.constant dense<0.000000e+00> : vector<8x32xf32>
    %45 = tpu.matmul %30, %44, %cst_24 {dimension_numbers = #tpu.dot_dimension_numbers<[1], [0], [0], [1], [0, 0, 1, 1], [], []>} : vector<8x32xf32>, vector<32x32xf32>, vector<8x32xf32> -> vector<8x32xf32>
    %46 = vector.extract_strided_slice %36 {offsets = [1, 0], sizes = [1, 32], strides = [1, 1]} : vector<4x32xf32> to vector<1x32xf32>
    %47 = vector.broadcast %46 : vector<1x32xf32> to vector<8x32xf32>
    %48 = arith.addf %45, %47 : vector<8x32xf32>
    %49 = vector.extract_strided_slice %32 {offsets = [2, 0, 0], sizes = [1, 32, 32], strides = [1, 1, 1]} : vector<3x32x32xf32> to vector<1x32x32xf32>
    %50 = vector.shape_cast %49 : vector<1x32x32xf32> to vector<32x32xf32>
    %cst_25 = arith.constant dense<0.000000e+00> : vector<8x32xf32>
    %51 = tpu.matmul %30, %50, %cst_25 {dimension_numbers = #tpu.dot_dimension_numbers<[1], [0], [0], [1], [0, 0, 1, 1], [], []>} : vector<8x32xf32>, vector<32x32xf32>, vector<8x32xf32> -> vector<8x32xf32>
    %52 = vector.extract_strided_slice %36 {offsets = [2, 0], sizes = [1, 32], strides = [1, 1]} : vector<4x32xf32> to vector<1x32xf32>
    %53 = vector.broadcast %52 : vector<1x32xf32> to vector<8x32xf32>
    %54 = arith.addf %51, %53 : vector<8x32xf32>
    %55 = vector.shape_cast %42 : vector<8x32xf32> to vector<8x4x8xf32>
    %56 = vector.shape_cast %48 : vector<8x32xf32> to vector<8x4x8xf32>
    %57 = vector.shape_cast %54 : vector<8x32xf32> to vector<8x4x8xf32>
    "tpu.trace_start"() <{level = 10 : i32, message = "qhd,khd->hqk"}> : () -> ()
    %cst_26 = arith.constant dense<0.000000e+00> : vector<4x8x8xf32>
    %58 = tpu.matmul %55, %56, %cst_26 {dimension_numbers = #tpu.dot_dimension_numbers<[2], [2], [0], [0], [0, 1, 0, 0, 1, 0], [1], [1]>} : vector<8x4x8xf32>, vector<8x4x8xf32>, vector<4x8x8xf32> -> vector<4x8x8xf32>
    "tpu.trace_stop"() : () -> ()
    %cst_27 = arith.constant 0.353553385 : f32
    %59 = vector.broadcast %cst_27 : f32 to vector<4x8x8xf32>
    %60 = arith.mulf %58, %59 : vector<4x8x8xf32>
    %61 = vector.shape_cast %3 : vector<8x8xf32> to vector<1x8x8xf32>
    %62 = vector.broadcast %61 : vector<1x8x8xf32> to vector<4x8x8xf32>
    %63 = arith.addf %60, %62 : vector<4x8x8xf32>
    %cst_28 = arith.constant dense<0xFF800000> : vector<4x8xf32>
    %64 = vector.multi_reduction <maximumf>, %63, %cst_28 [2] : vector<4x8x8xf32> to vector<4x8xf32>
    %65 = vector.shape_cast %64 : vector<4x8xf32> to vector<4x8x1xf32>
    %66 = vector.broadcast %65 : vector<4x8x1xf32> to vector<4x8x8xf32>
    %67 = arith.subf %63, %66 : vector<4x8x8xf32>
    %68 = math.exp %67 : vector<4x8x8xf32>
    %cst_29 = arith.constant dense<0.000000e+00> : vector<4x8xf32>
    %69 = vector.multi_reduction <add>, %68, %cst_29 [2] : vector<4x8x8xf32> to vector<4x8xf32>
    %70 = vector.shape_cast %69 : vector<4x8xf32> to vector<4x8x1xf32>
    %71 = tpu.reciprocal %70 {approx = true} : vector<4x8x1xf32> -> vector<4x8x1xf32>
    %72 = vector.broadcast %71 : vector<4x8x1xf32> to vector<4x8x8xf32>
    %73 = arith.mulf %68, %72 : vector<4x8x8xf32>
    "tpu.trace_start"() <{level = 10 : i32, message = "hqk,khd->qhd"}> : () -> ()
    %cst_30 = arith.constant dense<0.000000e+00> : vector<4x8x8xf32>
    %74 = tpu.matmul %57, %73, %cst_30 {dimension_numbers = #tpu.dot_dimension_numbers<[0], [2], [2], [1], [0, 1, 0, 2, 1, 1], [1], [0]>} : vector<8x4x8xf32>, vector<4x8x8xf32>, vector<4x8x8xf32> -> vector<4x8x8xf32>
    %75 = tpu.transpose %74, [2, 0, 1] : vector<4x8x8xf32> -> vector<8x4x8xf32>
    "tpu.trace_stop"() : () -> ()
    %76 = vector.shape_cast %75 : vector<8x4x8xf32> to vector<8x32xf32>
    %cst_31 = arith.constant dense<0.000000e+00> : vector<8x32xf32>
    %77 = tpu.matmul %76, %34, %cst_31 {dimension_numbers = #tpu.dot_dimension_numbers<[1], [0], [0], [1], [0, 0, 1, 1], [], []>} : vector<8x32xf32>, vector<32x32xf32>, vector<8x32xf32> -> vector<8x32xf32>
    %78 = vector.extract_strided_slice %36 {offsets = [3, 0], sizes = [1, 32], strides = [1, 1]} : vector<4x32xf32> to vector<1x32xf32>
    %79 = vector.broadcast %78 : vector<1x32xf32> to vector<8x32xf32>
    %80 = arith.addf %77, %79 : vector<8x32xf32>
    %81 = arith.addf %30, %80 : vector<8x32xf32>
    %c0_32 = arith.constant 0 : index
    %c0_33 = arith.constant 0 : index
    %c0_34 = arith.constant 0 : index
    %82 = vector.load %arg9[%c0_32, %c0_33, %c0_34] : memref<2x2x32xf32, #tpu.memory_space<vmem>>, vector<1x2x32xf32>
    %83 = vector.shape_cast %82 : vector<1x2x32xf32> to vector<2x32xf32>
    %84 = vector.extract_strided_slice %83 {offsets = [0, 0], sizes = [1, 32], strides = [1, 1]} : vector<2x32xf32> to vector<1x32xf32>
    %85 = vector.extract_strided_slice %83 {offsets = [1, 0], sizes = [1, 32], strides = [1, 1]} : vector<2x32xf32> to vector<1x32xf32>
    %cst_35 = arith.constant dense<0.000000e+00> : vector<8xf32>
    %86 = vector.multi_reduction <add>, %81, %cst_35 [1] : vector<8x32xf32> to vector<8xf32>
    %87 = vector.shape_cast %86 : vector<8xf32> to vector<8x1xf32>
    %cst_36 = arith.constant 3.200000e+01 : f32
    %88 = vector.broadcast %cst_36 : f32 to vector<8x1xf32>
    %89 = arith.divf %87, %88 : vector<8x1xf32>
    %90 = vector.broadcast %89 : vector<8x1xf32> to vector<8x32xf32>
    %91 = arith.subf %81, %90 : vector<8x32xf32>
    %92 = arith.mulf %91, %91 : vector<8x32xf32>
    %cst_37 = arith.constant dense<0.000000e+00> : vector<8xf32>
    %93 = vector.multi_reduction <add>, %92, %cst_37 [1] : vector<8x32xf32> to vector<8xf32>
    %94 = vector.shape_cast %93 : vector<8xf32> to vector<8x1xf32>
    %cst_38 = arith.constant 3.200000e+01 : f32
    %95 = vector.broadcast %cst_38 : f32 to vector<8x1xf32>
    %96 = arith.divf %94, %95 : vector<8x1xf32>
    %97 = vector.broadcast %89 : vector<8x1xf32> to vector<8x32xf32>
    %98 = arith.subf %81, %97 : vector<8x32xf32>
    %cst_39 = arith.constant 9.99999996E-13 : f32
    %99 = vector.broadcast %cst_39 : f32 to vector<8x1xf32>
    %100 = arith.addf %96, %99 : vector<8x1xf32>
    %101 = math.rsqrt %100 : vector<8x1xf32>
    %102 = vector.broadcast %101 : vector<8x1xf32> to vector<8x32xf32>
    %103 = arith.mulf %98, %102 : vector<8x32xf32>
    %104 = vector.broadcast %84 : vector<1x32xf32> to vector<8x32xf32>
    %105 = arith.mulf %103, %104 : vector<8x32xf32>
    %106 = vector.broadcast %85 : vector<1x32xf32> to vector<8x32xf32>
    %107 = arith.addf %105, %106 : vector<8x32xf32>
    %108 = arith.mulf %107, %2 : vector<8x32xf32>
    %c0_40 = arith.constant 0 : index
    %c0_41 = arith.constant 0 : index
    %c0_42 = arith.constant 0 : index
    %c0_43 = arith.constant 0 : index
    %109 = vector.load %arg10[%c0_40, %c0_41, %c0_42, %c0_43] : memref<2x3x32x32xf32, #tpu.memory_space<vmem>>, vector<1x3x32x32xf32>
    %110 = vector.shape_cast %109 : vector<1x3x32x32xf32> to vector<3x32x32xf32>
    %c0_44 = arith.constant 0 : index
    %c0_45 = arith.constant 0 : index
    %c0_46 = arith.constant 0 : index
    %111 = vector.load %arg11[%c0_44, %c0_45, %c0_46] : memref<2x32x32xf32, #tpu.memory_space<vmem>>, vector<1x32x32xf32>
    %112 = vector.shape_cast %111 : vector<1x32x32xf32> to vector<32x32xf32>
    %c0_47 = arith.constant 0 : index
    %c0_48 = arith.constant 0 : index
    %c0_49 = arith.constant 0 : index
    %113 = vector.load %arg12[%c0_47, %c0_48, %c0_49] : memref<2x4x32xf32, #tpu.memory_space<vmem>>, vector<1x4x32xf32>
    %114 = vector.shape_cast %113 : vector<1x4x32xf32> to vector<4x32xf32>
    %115 = vector.extract_strided_slice %110 {offsets = [0, 0, 0], sizes = [1, 32, 32], strides = [1, 1, 1]} : vector<3x32x32xf32> to vector<1x32x32xf32>
    %116 = vector.shape_cast %115 : vector<1x32x32xf32> to vector<32x32xf32>
    %cst_50 = arith.constant dense<0.000000e+00> : vector<8x32xf32>
    %117 = tpu.matmul %108, %116, %cst_50 {dimension_numbers = #tpu.dot_dimension_numbers<[1], [0], [0], [1], [0, 0, 1, 1], [], []>} : vector<8x32xf32>, vector<32x32xf32>, vector<8x32xf32> -> vector<8x32xf32>
    %118 = vector.extract_strided_slice %114 {offsets = [0, 0], sizes = [1, 32], strides = [1, 1]} : vector<4x32xf32> to vector<1x32xf32>
    %119 = vector.broadcast %118 : vector<1x32xf32> to vector<8x32xf32>
    %120 = arith.addf %117, %119 : vector<8x32xf32>
    %121 = vector.extract_strided_slice %110 {offsets = [1, 0, 0], sizes = [1, 32, 32], strides = [1, 1, 1]} : vector<3x32x32xf32> to vector<1x32x32xf32>
    %122 = vector.shape_cast %121 : vector<1x32x32xf32> to vector<32x32xf32>
    %cst_51 = arith.constant dense<0.000000e+00> : vector<8x32xf32>
    %123 = tpu.matmul %4, %122, %cst_51 {dimension_numbers = #tpu.dot_dimension_numbers<[1], [0], [0], [1], [0, 0, 1, 1], [], []>} : vector<8x32xf32>, vector<32x32xf32>, vector<8x32xf32> -> vector<8x32xf32>
    %124 = vector.extract_strided_slice %114 {offsets = [1, 0], sizes = [1, 32], strides = [1, 1]} : vector<4x32xf32> to vector<1x32xf32>
    %125 = vector.broadcast %124 : vector<1x32xf32> to vector<8x32xf32>
    %126 = arith.addf %123, %125 : vector<8x32xf32>
    %127 = vector.extract_strided_slice %110 {offsets = [2, 0, 0], sizes = [1, 32, 32], strides = [1, 1, 1]} : vector<3x32x32xf32> to vector<1x32x32xf32>
    %128 = vector.shape_cast %127 : vector<1x32x32xf32> to vector<32x32xf32>
    %cst_52 = arith.constant dense<0.000000e+00> : vector<8x32xf32>
    %129 = tpu.matmul %4, %128, %cst_52 {dimension_numbers = #tpu.dot_dimension_numbers<[1], [0], [0], [1], [0, 0, 1, 1], [], []>} : vector<8x32xf32>, vector<32x32xf32>, vector<8x32xf32> -> vector<8x32xf32>
    %130 = vector.extract_strided_slice %114 {offsets = [2, 0], sizes = [1, 32], strides = [1, 1]} : vector<4x32xf32> to vector<1x32xf32>
    %131 = vector.broadcast %130 : vector<1x32xf32> to vector<8x32xf32>
    %132 = arith.addf %129, %131 : vector<8x32xf32>
    %133 = vector.shape_cast %120 : vector<8x32xf32> to vector<8x4x8xf32>
    %134 = vector.shape_cast %126 : vector<8x32xf32> to vector<8x4x8xf32>
    %135 = vector.shape_cast %132 : vector<8x32xf32> to vector<8x4x8xf32>
    "tpu.trace_start"() <{level = 10 : i32, message = "qhd,khd->hqk"}> : () -> ()
    %cst_53 = arith.constant dense<0.000000e+00> : vector<4x8x8xf32>
    %136 = tpu.matmul %133, %134, %cst_53 {dimension_numbers = #tpu.dot_dimension_numbers<[2], [2], [0], [0], [0, 1, 0, 0, 1, 0], [1], [1]>} : vector<8x4x8xf32>, vector<8x4x8xf32>, vector<4x8x8xf32> -> vector<4x8x8xf32>
    "tpu.trace_stop"() : () -> ()
    %cst_54 = arith.constant 0.353553385 : f32
    %137 = vector.broadcast %cst_54 : f32 to vector<4x8x8xf32>
    %138 = arith.mulf %136, %137 : vector<4x8x8xf32>
    %cst_55 = arith.constant dense<0xFF800000> : vector<4x8xf32>
    %139 = vector.multi_reduction <maximumf>, %138, %cst_55 [2] : vector<4x8x8xf32> to vector<4x8xf32>
    %140 = vector.shape_cast %139 : vector<4x8xf32> to vector<4x8x1xf32>
    %141 = vector.broadcast %140 : vector<4x8x1xf32> to vector<4x8x8xf32>
    %142 = arith.subf %138, %141 : vector<4x8x8xf32>
    %143 = math.exp %142 : vector<4x8x8xf32>
    %cst_56 = arith.constant dense<0.000000e+00> : vector<4x8xf32>
    %144 = vector.multi_reduction <add>, %143, %cst_56 [2] : vector<4x8x8xf32> to vector<4x8xf32>
    %145 = vector.shape_cast %144 : vector<4x8xf32> to vector<4x8x1xf32>
    %146 = tpu.reciprocal %145 {approx = true} : vector<4x8x1xf32> -> vector<4x8x1xf32>
    %147 = vector.broadcast %146 : vector<4x8x1xf32> to vector<4x8x8xf32>
    %148 = arith.mulf %143, %147 : vector<4x8x8xf32>
    "tpu.trace_start"() <{level = 10 : i32, message = "hqk,khd->qhd"}> : () -> ()
    %cst_57 = arith.constant dense<0.000000e+00> : vector<4x8x8xf32>
    %149 = tpu.matmul %135, %148, %cst_57 {dimension_numbers = #tpu.dot_dimension_numbers<[0], [2], [2], [1], [0, 1, 0, 2, 1, 1], [1], [0]>} : vector<8x4x8xf32>, vector<4x8x8xf32>, vector<4x8x8xf32> -> vector<4x8x8xf32>
    %150 = tpu.transpose %149, [2, 0, 1] : vector<4x8x8xf32> -> vector<8x4x8xf32>
    "tpu.trace_stop"() : () -> ()
    %151 = vector.shape_cast %150 : vector<8x4x8xf32> to vector<8x32xf32>
    %cst_58 = arith.constant dense<0.000000e+00> : vector<8x32xf32>
    %152 = tpu.matmul %151, %112, %cst_58 {dimension_numbers = #tpu.dot_dimension_numbers<[1], [0], [0], [1], [0, 0, 1, 1], [], []>} : vector<8x32xf32>, vector<32x32xf32>, vector<8x32xf32> -> vector<8x32xf32>
    %153 = vector.extract_strided_slice %114 {offsets = [3, 0], sizes = [1, 32], strides = [1, 1]} : vector<4x32xf32> to vector<1x32xf32>
    %154 = vector.broadcast %153 : vector<1x32xf32> to vector<8x32xf32>
    %155 = arith.addf %152, %154 : vector<8x32xf32>
    %156 = arith.addf %108, %155 : vector<8x32xf32>
    %c0_59 = arith.constant 0 : index
    %c0_60 = arith.constant 0 : index
    %c0_61 = arith.constant 0 : index
    %157 = vector.load %arg13[%c0_59, %c0_60, %c0_61] : memref<2x2x32xf32, #tpu.memory_space<vmem>>, vector<1x2x32xf32>
    %158 = vector.shape_cast %157 : vector<1x2x32xf32> to vector<2x32xf32>
    %159 = vector.extract_strided_slice %158 {offsets = [0, 0], sizes = [1, 32], strides = [1, 1]} : vector<2x32xf32> to vector<1x32xf32>
    %160 = vector.extract_strided_slice %158 {offsets = [1, 0], sizes = [1, 32], strides = [1, 1]} : vector<2x32xf32> to vector<1x32xf32>
    %cst_62 = arith.constant dense<0.000000e+00> : vector<8xf32>
    %161 = vector.multi_reduction <add>, %156, %cst_62 [1] : vector<8x32xf32> to vector<8xf32>
    %162 = vector.shape_cast %161 : vector<8xf32> to vector<8x1xf32>
    %cst_63 = arith.constant 3.200000e+01 : f32
    %163 = vector.broadcast %cst_63 : f32 to vector<8x1xf32>
    %164 = arith.divf %162, %163 : vector<8x1xf32>
    %165 = vector.broadcast %164 : vector<8x1xf32> to vector<8x32xf32>
    %166 = arith.subf %156, %165 : vector<8x32xf32>
    %167 = arith.mulf %166, %166 : vector<8x32xf32>
    %cst_64 = arith.constant dense<0.000000e+00> : vector<8xf32>
    %168 = vector.multi_reduction <add>, %167, %cst_64 [1] : vector<8x32xf32> to vector<8xf32>
    %169 = vector.shape_cast %168 : vector<8xf32> to vector<8x1xf32>
    %cst_65 = arith.constant 3.200000e+01 : f32
    %170 = vector.broadcast %cst_65 : f32 to vector<8x1xf32>
    %171 = arith.divf %169, %170 : vector<8x1xf32>
    %172 = vector.broadcast %164 : vector<8x1xf32> to vector<8x32xf32>
    %173 = arith.subf %156, %172 : vector<8x32xf32>
    %cst_66 = arith.constant 9.99999996E-13 : f32
    %174 = vector.broadcast %cst_66 : f32 to vector<8x1xf32>
    %175 = arith.addf %171, %174 : vector<8x1xf32>
    %176 = math.rsqrt %175 : vector<8x1xf32>
    %177 = vector.broadcast %176 : vector<8x1xf32> to vector<8x32xf32>
    %178 = arith.mulf %173, %177 : vector<8x32xf32>
    %179 = vector.broadcast %159 : vector<1x32xf32> to vector<8x32xf32>
    %180 = arith.mulf %178, %179 : vector<8x32xf32>
    %181 = vector.broadcast %160 : vector<1x32xf32> to vector<8x32xf32>
    %182 = arith.addf %180, %181 : vector<8x32xf32>
    %183 = arith.mulf %182, %2 : vector<8x32xf32>
    %c0_67 = arith.constant 0 : index
    %c0_68 = arith.constant 0 : index
    %c0_69 = arith.constant 0 : index
    %184 = vector.load %arg14[%c0_67, %c0_68, %c0_69] : memref<2x32x64xf32, #tpu.memory_space<vmem>>, vector<1x32x64xf32>
    %185 = vector.shape_cast %184 : vector<1x32x64xf32> to vector<32x64xf32>
    %cst_70 = arith.constant dense<0.000000e+00> : vector<8x64xf32>
    %186 = tpu.matmul %183, %185, %cst_70 {dimension_numbers = #tpu.dot_dimension_numbers<[1], [0], [0], [1], [0, 0, 1, 1], [], []>} : vector<8x32xf32>, vector<32x64xf32>, vector<8x64xf32> -> vector<8x64xf32>
    %c0_71 = arith.constant 0 : index
    %c0_72 = arith.constant 0 : index
    %c0_73 = arith.constant 0 : index
    %187 = vector.load %arg15[%c0_71, %c0_72, %c0_73] : memref<2x1x64xf32, #tpu.memory_space<vmem>>, vector<1x1x64xf32>
    %188 = vector.shape_cast %187 : vector<1x1x64xf32> to vector<1x64xf32>
    %189 = vector.broadcast %188 : vector<1x64xf32> to vector<8x64xf32>
    %190 = arith.addf %186, %189 : vector<8x64xf32>
    %191 = arith.mulf %190, %190 : vector<8x64xf32>
    %192 = arith.mulf %190, %191 : vector<8x64xf32>
    %cst_74 = arith.constant 4.471500e-02 : f32
    %193 = vector.broadcast %cst_74 : f32 to vector<8x64xf32>
    %194 = arith.mulf %193, %192 : vector<8x64xf32>
    %195 = arith.addf %190, %194 : vector<8x64xf32>
    %cst_75 = arith.constant 0.797884583 : f32
    %196 = vector.broadcast %cst_75 : f32 to vector<8x64xf32>
    %197 = arith.mulf %196, %195 : vector<8x64xf32>
    %198 = math.tanh %197 : vector<8x64xf32>
    %cst_76 = arith.constant 1.000000e+00 : f32
    %199 = vector.broadcast %cst_76 : f32 to vector<8x64xf32>
    %200 = arith.addf %199, %198 : vector<8x64xf32>
    %cst_77 = arith.constant 5.000000e-01 : f32
    %201 = vector.broadcast %cst_77 : f32 to vector<8x64xf32>
    %202 = arith.mulf %201, %200 : vector<8x64xf32>
    %203 = arith.mulf %190, %202 : vector<8x64xf32>
    %c0_78 = arith.constant 0 : index
    %c0_79 = arith.constant 0 : index
    %c0_80 = arith.constant 0 : index
    %204 = vector.load %arg16[%c0_78, %c0_79, %c0_80] : memref<2x64x32xf32, #tpu.memory_space<vmem>>, vector<1x64x32xf32>
    %205 = vector.shape_cast %204 : vector<1x64x32xf32> to vector<64x32xf32>
    %cst_81 = arith.constant dense<0.000000e+00> : vector<8x32xf32>
    %206 = tpu.matmul %203, %205, %cst_81 {dimension_numbers = #tpu.dot_dimension_numbers<[1], [0], [0], [1], [0, 0, 1, 1], [], []>} : vector<8x64xf32>, vector<64x32xf32>, vector<8x32xf32> -> vector<8x32xf32>
    %c0_82 = arith.constant 0 : index
    %c0_83 = arith.constant 0 : index
    %c0_84 = arith.constant 0 : index
    %207 = vector.load %arg17[%c0_82, %c0_83, %c0_84] : memref<2x1x32xf32, #tpu.memory_space<vmem>>, vector<1x1x32xf32>
    %208 = vector.shape_cast %207 : vector<1x1x32xf32> to vector<1x32xf32>
    %209 = vector.broadcast %208 : vector<1x32xf32> to vector<8x32xf32>
    %210 = arith.addf %206, %209 : vector<8x32xf32>
    %211 = arith.addf %183, %210 : vector<8x32xf32>
    %c0_85 = arith.constant 0 : index
    %c0_86 = arith.constant 0 : index
    %c0_87 = arith.constant 0 : index
    %212 = vector.load %arg18[%c0_85, %c0_86, %c0_87] : memref<2x2x32xf32, #tpu.memory_space<vmem>>, vector<1x2x32xf32>
    %213 = vector.shape_cast %212 : vector<1x2x32xf32> to vector<2x32xf32>
    %214 = vector.extract_strided_slice %213 {offsets = [0, 0], sizes = [1, 32], strides = [1, 1]} : vector<2x32xf32> to vector<1x32xf32>
    %215 = vector.extract_strided_slice %213 {offsets = [1, 0], sizes = [1, 32], strides = [1, 1]} : vector<2x32xf32> to vector<1x32xf32>
    %cst_88 = arith.constant dense<0.000000e+00> : vector<8xf32>
    %216 = vector.multi_reduction <add>, %211, %cst_88 [1] : vector<8x32xf32> to vector<8xf32>
    %217 = vector.shape_cast %216 : vector<8xf32> to vector<8x1xf32>
    %cst_89 = arith.constant 3.200000e+01 : f32
    %218 = vector.broadcast %cst_89 : f32 to vector<8x1xf32>
    %219 = arith.divf %217, %218 : vector<8x1xf32>
    %220 = vector.broadcast %219 : vector<8x1xf32> to vector<8x32xf32>
    %221 = arith.subf %211, %220 : vector<8x32xf32>
    %222 = arith.mulf %221, %221 : vector<8x32xf32>
    %cst_90 = arith.constant dense<0.000000e+00> : vector<8xf32>
    %223 = vector.multi_reduction <add>, %222, %cst_90 [1] : vector<8x32xf32> to vector<8xf32>
    %224 = vector.shape_cast %223 : vector<8xf32> to vector<8x1xf32>
    %cst_91 = arith.constant 3.200000e+01 : f32
    %225 = vector.broadcast %cst_91 : f32 to vector<8x1xf32>
    %226 = arith.divf %224, %225 : vector<8x1xf32>
    %227 = vector.broadcast %219 : vector<8x1xf32> to vector<8x32xf32>
    %228 = arith.subf %211, %227 : vector<8x32xf32>
    %cst_92 = arith.constant 9.99999996E-13 : f32
    %229 = vector.broadcast %cst_92 : f32 to vector<8x1xf32>
    %230 = arith.addf %226, %229 : vector<8x1xf32>
    %231 = math.rsqrt %230 : vector<8x1xf32>
    %232 = vector.broadcast %231 : vector<8x1xf32> to vector<8x32xf32>
    %233 = arith.mulf %228, %232 : vector<8x32xf32>
    %234 = vector.broadcast %214 : vector<1x32xf32> to vector<8x32xf32>
    %235 = arith.mulf %233, %234 : vector<8x32xf32>
    %236 = vector.broadcast %215 : vector<1x32xf32> to vector<8x32xf32>
    %237 = arith.addf %235, %236 : vector<8x32xf32>
    %238 = arith.mulf %237, %2 : vector<8x32xf32>
    %c1 = arith.constant 1 : index
    %c0_93 = arith.constant 0 : index
    %c0_94 = arith.constant 0 : index
    %c0_95 = arith.constant 0 : index
    %239 = vector.load %arg6[%c1, %c0_93, %c0_94, %c0_95] : memref<2x3x32x32xf32, #tpu.memory_space<vmem>>, vector<1x3x32x32xf32>
    %240 = vector.shape_cast %239 : vector<1x3x32x32xf32> to vector<3x32x32xf32>
    %c1_96 = arith.constant 1 : index
    %c0_97 = arith.constant 0 : index
    %c0_98 = arith.constant 0 : index
    %241 = vector.load %arg7[%c1_96, %c0_97, %c0_98] : memref<2x32x32xf32, #tpu.memory_space<vmem>>, vector<1x32x32xf32>
    %242 = vector.shape_cast %241 : vector<1x32x32xf32> to vector<32x32xf32>
    %c1_99 = arith.constant 1 : index
    %c0_100 = arith.constant 0 : index
    %c0_101 = arith.constant 0 : index
    %243 = vector.load %arg8[%c1_99, %c0_100, %c0_101] : memref<2x4x32xf32, #tpu.memory_space<vmem>>, vector<1x4x32xf32>
    %244 = vector.shape_cast %243 : vector<1x4x32xf32> to vector<4x32xf32>
    %245 = vector.extract_strided_slice %240 {offsets = [0, 0, 0], sizes = [1, 32, 32], strides = [1, 1, 1]} : vector<3x32x32xf32> to vector<1x32x32xf32>
    %246 = vector.shape_cast %245 : vector<1x32x32xf32> to vector<32x32xf32>
    %cst_102 = arith.constant dense<0.000000e+00> : vector<8x32xf32>
    %247 = tpu.matmul %238, %246, %cst_102 {dimension_numbers = #tpu.dot_dimension_numbers<[1], [0], [0], [1], [0, 0, 1, 1], [], []>} : vector<8x32xf32>, vector<32x32xf32>, vector<8x32xf32> -> vector<8x32xf32>
    %248 = vector.extract_strided_slice %244 {offsets = [0, 0], sizes = [1, 32], strides = [1, 1]} : vector<4x32xf32> to vector<1x32xf32>
    %249 = vector.broadcast %248 : vector<1x32xf32> to vector<8x32xf32>
    %250 = arith.addf %247, %249 : vector<8x32xf32>
    %251 = vector.extract_strided_slice %240 {offsets = [1, 0, 0], sizes = [1, 32, 32], strides = [1, 1, 1]} : vector<3x32x32xf32> to vector<1x32x32xf32>
    %252 = vector.shape_cast %251 : vector<1x32x32xf32> to vector<32x32xf32>
    %cst_103 = arith.constant dense<0.000000e+00> : vector<8x32xf32>
    %253 = tpu.matmul %238, %252, %cst_103 {dimension_numbers = #tpu.dot_dimension_numbers<[1], [0], [0], [1], [0, 0, 1, 1], [], []>} : vector<8x32xf32>, vector<32x32xf32>, vector<8x32xf32> -> vector<8x32xf32>
    %254 = vector.extract_strided_slice %244 {offsets = [1, 0], sizes = [1, 32], strides = [1, 1]} : vector<4x32xf32> to vector<1x32xf32>
    %255 = vector.broadcast %254 : vector<1x32xf32> to vector<8x32xf32>
    %256 = arith.addf %253, %255 : vector<8x32xf32>
    %257 = vector.extract_strided_slice %240 {offsets = [2, 0, 0], sizes = [1, 32, 32], strides = [1, 1, 1]} : vector<3x32x32xf32> to vector<1x32x32xf32>
    %258 = vector.shape_cast %257 : vector<1x32x32xf32> to vector<32x32xf32>
    %cst_104 = arith.constant dense<0.000000e+00> : vector<8x32xf32>
    %259 = tpu.matmul %238, %258, %cst_104 {dimension_numbers = #tpu.dot_dimension_numbers<[1], [0], [0], [1], [0, 0, 1, 1], [], []>} : vector<8x32xf32>, vector<32x32xf32>, vector<8x32xf32> -> vector<8x32xf32>
    %260 = vector.extract_strided_slice %244 {offsets = [2, 0], sizes = [1, 32], strides = [1, 1]} : vector<4x32xf32> to vector<1x32xf32>
    %261 = vector.broadcast %260 : vector<1x32xf32> to vector<8x32xf32>
    %262 = arith.addf %259, %261 : vector<8x32xf32>
    %263 = vector.shape_cast %250 : vector<8x32xf32> to vector<8x4x8xf32>
    %264 = vector.shape_cast %256 : vector<8x32xf32> to vector<8x4x8xf32>
    %265 = vector.shape_cast %262 : vector<8x32xf32> to vector<8x4x8xf32>
    "tpu.trace_start"() <{level = 10 : i32, message = "qhd,khd->hqk"}> : () -> ()
    %cst_105 = arith.constant dense<0.000000e+00> : vector<4x8x8xf32>
    %266 = tpu.matmul %263, %264, %cst_105 {dimension_numbers = #tpu.dot_dimension_numbers<[2], [2], [0], [0], [0, 1, 0, 0, 1, 0], [1], [1]>} : vector<8x4x8xf32>, vector<8x4x8xf32>, vector<4x8x8xf32> -> vector<4x8x8xf32>
    "tpu.trace_stop"() : () -> ()
    %cst_106 = arith.constant 0.353553385 : f32
    %267 = vector.broadcast %cst_106 : f32 to vector<4x8x8xf32>
    %268 = arith.mulf %266, %267 : vector<4x8x8xf32>
    %269 = vector.shape_cast %3 : vector<8x8xf32> to vector<1x8x8xf32>
    %270 = vector.broadcast %269 : vector<1x8x8xf32> to vector<4x8x8xf32>
    %271 = arith.addf %268, %270 : vector<4x8x8xf32>
    %cst_107 = arith.constant dense<0xFF800000> : vector<4x8xf32>
    %272 = vector.multi_reduction <maximumf>, %271, %cst_107 [2] : vector<4x8x8xf32> to vector<4x8xf32>
    %273 = vector.shape_cast %272 : vector<4x8xf32> to vector<4x8x1xf32>
    %274 = vector.broadcast %273 : vector<4x8x1xf32> to vector<4x8x8xf32>
    %275 = arith.subf %271, %274 : vector<4x8x8xf32>
    %276 = math.exp %275 : vector<4x8x8xf32>
    %cst_108 = arith.constant dense<0.000000e+00> : vector<4x8xf32>
    %277 = vector.multi_reduction <add>, %276, %cst_108 [2] : vector<4x8x8xf32> to vector<4x8xf32>
    %278 = vector.shape_cast %277 : vector<4x8xf32> to vector<4x8x1xf32>
    %279 = tpu.reciprocal %278 {approx = true} : vector<4x8x1xf32> -> vector<4x8x1xf32>
    %280 = vector.broadcast %279 : vector<4x8x1xf32> to vector<4x8x8xf32>
    %281 = arith.mulf %276, %280 : vector<4x8x8xf32>
    "tpu.trace_start"() <{level = 10 : i32, message = "hqk,khd->qhd"}> : () -> ()
    %cst_109 = arith.constant dense<0.000000e+00> : vector<4x8x8xf32>
    %282 = tpu.matmul %265, %281, %cst_109 {dimension_numbers = #tpu.dot_dimension_numbers<[0], [2], [2], [1], [0, 1, 0, 2, 1, 1], [1], [0]>} : vector<8x4x8xf32>, vector<4x8x8xf32>, vector<4x8x8xf32> -> vector<4x8x8xf32>
    %283 = tpu.transpose %282, [2, 0, 1] : vector<4x8x8xf32> -> vector<8x4x8xf32>
    "tpu.trace_stop"() : () -> ()
    %284 = vector.shape_cast %283 : vector<8x4x8xf32> to vector<8x32xf32>
    %cst_110 = arith.constant dense<0.000000e+00> : vector<8x32xf32>
    %285 = tpu.matmul %284, %242, %cst_110 {dimension_numbers = #tpu.dot_dimension_numbers<[1], [0], [0], [1], [0, 0, 1, 1], [], []>} : vector<8x32xf32>, vector<32x32xf32>, vector<8x32xf32> -> vector<8x32xf32>
    %286 = vector.extract_strided_slice %244 {offsets = [3, 0], sizes = [1, 32], strides = [1, 1]} : vector<4x32xf32> to vector<1x32xf32>
    %287 = vector.broadcast %286 : vector<1x32xf32> to vector<8x32xf32>
    %288 = arith.addf %285, %287 : vector<8x32xf32>
    %289 = arith.addf %238, %288 : vector<8x32xf32>
    %c1_111 = arith.constant 1 : index
    %c0_112 = arith.constant 0 : index
    %c0_113 = arith.constant 0 : index
    %290 = vector.load %arg9[%c1_111, %c0_112, %c0_113] : memref<2x2x32xf32, #tpu.memory_space<vmem>>, vector<1x2x32xf32>
    %291 = vector.shape_cast %290 : vector<1x2x32xf32> to vector<2x32xf32>
    %292 = vector.extract_strided_slice %291 {offsets = [0, 0], sizes = [1, 32], strides = [1, 1]} : vector<2x32xf32> to vector<1x32xf32>
    %293 = vector.extract_strided_slice %291 {offsets = [1, 0], sizes = [1, 32], strides = [1, 1]} : vector<2x32xf32> to vector<1x32xf32>
    %cst_114 = arith.constant dense<0.000000e+00> : vector<8xf32>
    %294 = vector.multi_reduction <add>, %289, %cst_114 [1] : vector<8x32xf32> to vector<8xf32>
    %295 = vector.shape_cast %294 : vector<8xf32> to vector<8x1xf32>
    %cst_115 = arith.constant 3.200000e+01 : f32
    %296 = vector.broadcast %cst_115 : f32 to vector<8x1xf32>
    %297 = arith.divf %295, %296 : vector<8x1xf32>
    %298 = vector.broadcast %297 : vector<8x1xf32> to vector<8x32xf32>
    %299 = arith.subf %289, %298 : vector<8x32xf32>
    %300 = arith.mulf %299, %299 : vector<8x32xf32>
    %cst_116 = arith.constant dense<0.000000e+00> : vector<8xf32>
    %301 = vector.multi_reduction <add>, %300, %cst_116 [1] : vector<8x32xf32> to vector<8xf32>
    %302 = vector.shape_cast %301 : vector<8xf32> to vector<8x1xf32>
    %cst_117 = arith.constant 3.200000e+01 : f32
    %303 = vector.broadcast %cst_117 : f32 to vector<8x1xf32>
    %304 = arith.divf %302, %303 : vector<8x1xf32>
    %305 = vector.broadcast %297 : vector<8x1xf32> to vector<8x32xf32>
    %306 = arith.subf %289, %305 : vector<8x32xf32>
    %cst_118 = arith.constant 9.99999996E-13 : f32
    %307 = vector.broadcast %cst_118 : f32 to vector<8x1xf32>
    %308 = arith.addf %304, %307 : vector<8x1xf32>
    %309 = math.rsqrt %308 : vector<8x1xf32>
    %310 = vector.broadcast %309 : vector<8x1xf32> to vector<8x32xf32>
    %311 = arith.mulf %306, %310 : vector<8x32xf32>
    %312 = vector.broadcast %292 : vector<1x32xf32> to vector<8x32xf32>
    %313 = arith.mulf %311, %312 : vector<8x32xf32>
    %314 = vector.broadcast %293 : vector<1x32xf32> to vector<8x32xf32>
    %315 = arith.addf %313, %314 : vector<8x32xf32>
    %316 = arith.mulf %315, %2 : vector<8x32xf32>
    %c1_119 = arith.constant 1 : index
    %c0_120 = arith.constant 0 : index
    %c0_121 = arith.constant 0 : index
    %c0_122 = arith.constant 0 : index
    %317 = vector.load %arg10[%c1_119, %c0_120, %c0_121, %c0_122] : memref<2x3x32x32xf32, #tpu.memory_space<vmem>>, vector<1x3x32x32xf32>
    %318 = vector.shape_cast %317 : vector<1x3x32x32xf32> to vector<3x32x32xf32>
    %c1_123 = arith.constant 1 : index
    %c0_124 = arith.constant 0 : index
    %c0_125 = arith.constant 0 : index
    %319 = vector.load %arg11[%c1_123, %c0_124, %c0_125] : memref<2x32x32xf32, #tpu.memory_space<vmem>>, vector<1x32x32xf32>
    %320 = vector.shape_cast %319 : vector<1x32x32xf32> to vector<32x32xf32>
    %c1_126 = arith.constant 1 : index
    %c0_127 = arith.constant 0 : index
    %c0_128 = arith.constant 0 : index
    %321 = vector.load %arg12[%c1_126, %c0_127, %c0_128] : memref<2x4x32xf32, #tpu.memory_space<vmem>>, vector<1x4x32xf32>
    %322 = vector.shape_cast %321 : vector<1x4x32xf32> to vector<4x32xf32>
    %323 = vector.extract_strided_slice %318 {offsets = [0, 0, 0], sizes = [1, 32, 32], strides = [1, 1, 1]} : vector<3x32x32xf32> to vector<1x32x32xf32>
    %324 = vector.shape_cast %323 : vector<1x32x32xf32> to vector<32x32xf32>
    %cst_129 = arith.constant dense<0.000000e+00> : vector<8x32xf32>
    %325 = tpu.matmul %316, %324, %cst_129 {dimension_numbers = #tpu.dot_dimension_numbers<[1], [0], [0], [1], [0, 0, 1, 1], [], []>} : vector<8x32xf32>, vector<32x32xf32>, vector<8x32xf32> -> vector<8x32xf32>
    %326 = vector.extract_strided_slice %322 {offsets = [0, 0], sizes = [1, 32], strides = [1, 1]} : vector<4x32xf32> to vector<1x32xf32>
    %327 = vector.broadcast %326 : vector<1x32xf32> to vector<8x32xf32>
    %328 = arith.addf %325, %327 : vector<8x32xf32>
    %329 = vector.extract_strided_slice %318 {offsets = [1, 0, 0], sizes = [1, 32, 32], strides = [1, 1, 1]} : vector<3x32x32xf32> to vector<1x32x32xf32>
    %330 = vector.shape_cast %329 : vector<1x32x32xf32> to vector<32x32xf32>
    %cst_130 = arith.constant dense<0.000000e+00> : vector<8x32xf32>
    %331 = tpu.matmul %4, %330, %cst_130 {dimension_numbers = #tpu.dot_dimension_numbers<[1], [0], [0], [1], [0, 0, 1, 1], [], []>} : vector<8x32xf32>, vector<32x32xf32>, vector<8x32xf32> -> vector<8x32xf32>
    %332 = vector.extract_strided_slice %322 {offsets = [1, 0], sizes = [1, 32], strides = [1, 1]} : vector<4x32xf32> to vector<1x32xf32>
    %333 = vector.broadcast %332 : vector<1x32xf32> to vector<8x32xf32>
    %334 = arith.addf %331, %333 : vector<8x32xf32>
    %335 = vector.extract_strided_slice %318 {offsets = [2, 0, 0], sizes = [1, 32, 32], strides = [1, 1, 1]} : vector<3x32x32xf32> to vector<1x32x32xf32>
    %336 = vector.shape_cast %335 : vector<1x32x32xf32> to vector<32x32xf32>
    %cst_131 = arith.constant dense<0.000000e+00> : vector<8x32xf32>
    %337 = tpu.matmul %4, %336, %cst_131 {dimension_numbers = #tpu.dot_dimension_numbers<[1], [0], [0], [1], [0, 0, 1, 1], [], []>} : vector<8x32xf32>, vector<32x32xf32>, vector<8x32xf32> -> vector<8x32xf32>
    %338 = vector.extract_strided_slice %322 {offsets = [2, 0], sizes = [1, 32], strides = [1, 1]} : vector<4x32xf32> to vector<1x32xf32>
    %339 = vector.broadcast %338 : vector<1x32xf32> to vector<8x32xf32>
    %340 = arith.addf %337, %339 : vector<8x32xf32>
    %341 = vector.shape_cast %328 : vector<8x32xf32> to vector<8x4x8xf32>
    %342 = vector.shape_cast %334 : vector<8x32xf32> to vector<8x4x8xf32>
    %343 = vector.shape_cast %340 : vector<8x32xf32> to vector<8x4x8xf32>
    "tpu.trace_start"() <{level = 10 : i32, message = "qhd,khd->hqk"}> : () -> ()
    %cst_132 = arith.constant dense<0.000000e+00> : vector<4x8x8xf32>
    %344 = tpu.matmul %341, %342, %cst_132 {dimension_numbers = #tpu.dot_dimension_numbers<[2], [2], [0], [0], [0, 1, 0, 0, 1, 0], [1], [1]>} : vector<8x4x8xf32>, vector<8x4x8xf32>, vector<4x8x8xf32> -> vector<4x8x8xf32>
    "tpu.trace_stop"() : () -> ()
    %cst_133 = arith.constant 0.353553385 : f32
    %345 = vector.broadcast %cst_133 : f32 to vector<4x8x8xf32>
    %346 = arith.mulf %344, %345 : vector<4x8x8xf32>
    %cst_134 = arith.constant dense<0xFF800000> : vector<4x8xf32>
    %347 = vector.multi_reduction <maximumf>, %346, %cst_134 [2] : vector<4x8x8xf32> to vector<4x8xf32>
    %348 = vector.shape_cast %347 : vector<4x8xf32> to vector<4x8x1xf32>
    %349 = vector.broadcast %348 : vector<4x8x1xf32> to vector<4x8x8xf32>
    %350 = arith.subf %346, %349 : vector<4x8x8xf32>
    %351 = math.exp %350 : vector<4x8x8xf32>
    %cst_135 = arith.constant dense<0.000000e+00> : vector<4x8xf32>
    %352 = vector.multi_reduction <add>, %351, %cst_135 [2] : vector<4x8x8xf32> to vector<4x8xf32>
    %353 = vector.shape_cast %352 : vector<4x8xf32> to vector<4x8x1xf32>
    %354 = tpu.reciprocal %353 {approx = true} : vector<4x8x1xf32> -> vector<4x8x1xf32>
    %355 = vector.broadcast %354 : vector<4x8x1xf32> to vector<4x8x8xf32>
    %356 = arith.mulf %351, %355 : vector<4x8x8xf32>
    "tpu.trace_start"() <{level = 10 : i32, message = "hqk,khd->qhd"}> : () -> ()
    %cst_136 = arith.constant dense<0.000000e+00> : vector<4x8x8xf32>
    %357 = tpu.matmul %343, %356, %cst_136 {dimension_numbers = #tpu.dot_dimension_numbers<[0], [2], [2], [1], [0, 1, 0, 2, 1, 1], [1], [0]>} : vector<8x4x8xf32>, vector<4x8x8xf32>, vector<4x8x8xf32> -> vector<4x8x8xf32>
    %358 = tpu.transpose %357, [2, 0, 1] : vector<4x8x8xf32> -> vector<8x4x8xf32>
    "tpu.trace_stop"() : () -> ()
    %359 = vector.shape_cast %358 : vector<8x4x8xf32> to vector<8x32xf32>
    %cst_137 = arith.constant dense<0.000000e+00> : vector<8x32xf32>
    %360 = tpu.matmul %359, %320, %cst_137 {dimension_numbers = #tpu.dot_dimension_numbers<[1], [0], [0], [1], [0, 0, 1, 1], [], []>} : vector<8x32xf32>, vector<32x32xf32>, vector<8x32xf32> -> vector<8x32xf32>
    %361 = vector.extract_strided_slice %322 {offsets = [3, 0], sizes = [1, 32], strides = [1, 1]} : vector<4x32xf32> to vector<1x32xf32>
    %362 = vector.broadcast %361 : vector<1x32xf32> to vector<8x32xf32>
    %363 = arith.addf %360, %362 : vector<8x32xf32>
    %364 = arith.addf %316, %363 : vector<8x32xf32>
    %c1_138 = arith.constant 1 : index
    %c0_139 = arith.constant 0 : index
    %c0_140 = arith.constant 0 : index
    %365 = vector.load %arg13[%c1_138, %c0_139, %c0_140] : memref<2x2x32xf32, #tpu.memory_space<vmem>>, vector<1x2x32xf32>
    %366 = vector.shape_cast %365 : vector<1x2x32xf32> to vector<2x32xf32>
    %367 = vector.extract_strided_slice %366 {offsets = [0, 0], sizes = [1, 32], strides = [1, 1]} : vector<2x32xf32> to vector<1x32xf32>
    %368 = vector.extract_strided_slice %366 {offsets = [1, 0], sizes = [1, 32], strides = [1, 1]} : vector<2x32xf32> to vector<1x32xf32>
    %cst_141 = arith.constant dense<0.000000e+00> : vector<8xf32>
    %369 = vector.multi_reduction <add>, %364, %cst_141 [1] : vector<8x32xf32> to vector<8xf32>
    %370 = vector.shape_cast %369 : vector<8xf32> to vector<8x1xf32>
    %cst_142 = arith.constant 3.200000e+01 : f32
    %371 = vector.broadcast %cst_142 : f32 to vector<8x1xf32>
    %372 = arith.divf %370, %371 : vector<8x1xf32>
    %373 = vector.broadcast %372 : vector<8x1xf32> to vector<8x32xf32>
    %374 = arith.subf %364, %373 : vector<8x32xf32>
    %375 = arith.mulf %374, %374 : vector<8x32xf32>
    %cst_143 = arith.constant dense<0.000000e+00> : vector<8xf32>
    %376 = vector.multi_reduction <add>, %375, %cst_143 [1] : vector<8x32xf32> to vector<8xf32>
    %377 = vector.shape_cast %376 : vector<8xf32> to vector<8x1xf32>
    %cst_144 = arith.constant 3.200000e+01 : f32
    %378 = vector.broadcast %cst_144 : f32 to vector<8x1xf32>
    %379 = arith.divf %377, %378 : vector<8x1xf32>
    %380 = vector.broadcast %372 : vector<8x1xf32> to vector<8x32xf32>
    %381 = arith.subf %364, %380 : vector<8x32xf32>
    %cst_145 = arith.constant 9.99999996E-13 : f32
    %382 = vector.broadcast %cst_145 : f32 to vector<8x1xf32>
    %383 = arith.addf %379, %382 : vector<8x1xf32>
    %384 = math.rsqrt %383 : vector<8x1xf32>
    %385 = vector.broadcast %384 : vector<8x1xf32> to vector<8x32xf32>
    %386 = arith.mulf %381, %385 : vector<8x32xf32>
    %387 = vector.broadcast %367 : vector<1x32xf32> to vector<8x32xf32>
    %388 = arith.mulf %386, %387 : vector<8x32xf32>
    %389 = vector.broadcast %368 : vector<1x32xf32> to vector<8x32xf32>
    %390 = arith.addf %388, %389 : vector<8x32xf32>
    %391 = arith.mulf %390, %2 : vector<8x32xf32>
    %c1_146 = arith.constant 1 : index
    %c0_147 = arith.constant 0 : index
    %c0_148 = arith.constant 0 : index
    %392 = vector.load %arg14[%c1_146, %c0_147, %c0_148] : memref<2x32x64xf32, #tpu.memory_space<vmem>>, vector<1x32x64xf32>
    %393 = vector.shape_cast %392 : vector<1x32x64xf32> to vector<32x64xf32>
    %cst_149 = arith.constant dense<0.000000e+00> : vector<8x64xf32>
    %394 = tpu.matmul %391, %393, %cst_149 {dimension_numbers = #tpu.dot_dimension_numbers<[1], [0], [0], [1], [0, 0, 1, 1], [], []>} : vector<8x32xf32>, vector<32x64xf32>, vector<8x64xf32> -> vector<8x64xf32>
    %c1_150 = arith.constant 1 : index
    %c0_151 = arith.constant 0 : index
    %c0_152 = arith.constant 0 : index
    %395 = vector.load %arg15[%c1_150, %c0_151, %c0_152] : memref<2x1x64xf32, #tpu.memory_space<vmem>>, vector<1x1x64xf32>
    %396 = vector.shape_cast %395 : vector<1x1x64xf32> to vector<1x64xf32>
    %397 = vector.broadcast %396 : vector<1x64xf32> to vector<8x64xf32>
    %398 = arith.addf %394, %397 : vector<8x64xf32>
    %399 = arith.mulf %398, %398 : vector<8x64xf32>
    %400 = arith.mulf %398, %399 : vector<8x64xf32>
    %cst_153 = arith.constant 4.471500e-02 : f32
    %401 = vector.broadcast %cst_153 : f32 to vector<8x64xf32>
    %402 = arith.mulf %401, %400 : vector<8x64xf32>
    %403 = arith.addf %398, %402 : vector<8x64xf32>
    %cst_154 = arith.constant 0.797884583 : f32
    %404 = vector.broadcast %cst_154 : f32 to vector<8x64xf32>
    %405 = arith.mulf %404, %403 : vector<8x64xf32>
    %406 = math.tanh %405 : vector<8x64xf32>
    %cst_155 = arith.constant 1.000000e+00 : f32
    %407 = vector.broadcast %cst_155 : f32 to vector<8x64xf32>
    %408 = arith.addf %407, %406 : vector<8x64xf32>
    %cst_156 = arith.constant 5.000000e-01 : f32
    %409 = vector.broadcast %cst_156 : f32 to vector<8x64xf32>
    %410 = arith.mulf %409, %408 : vector<8x64xf32>
    %411 = arith.mulf %398, %410 : vector<8x64xf32>
    %c1_157 = arith.constant 1 : index
    %c0_158 = arith.constant 0 : index
    %c0_159 = arith.constant 0 : index
    %412 = vector.load %arg16[%c1_157, %c0_158, %c0_159] : memref<2x64x32xf32, #tpu.memory_space<vmem>>, vector<1x64x32xf32>
    %413 = vector.shape_cast %412 : vector<1x64x32xf32> to vector<64x32xf32>
    %cst_160 = arith.constant dense<0.000000e+00> : vector<8x32xf32>
    %414 = tpu.matmul %411, %413, %cst_160 {dimension_numbers = #tpu.dot_dimension_numbers<[1], [0], [0], [1], [0, 0, 1, 1], [], []>} : vector<8x64xf32>, vector<64x32xf32>, vector<8x32xf32> -> vector<8x32xf32>
    %c1_161 = arith.constant 1 : index
    %c0_162 = arith.constant 0 : index
    %c0_163 = arith.constant 0 : index
    %415 = vector.load %arg17[%c1_161, %c0_162, %c0_163] : memref<2x1x32xf32, #tpu.memory_space<vmem>>, vector<1x1x32xf32>
    %416 = vector.shape_cast %415 : vector<1x1x32xf32> to vector<1x32xf32>
    %417 = vector.broadcast %416 : vector<1x32xf32> to vector<8x32xf32>
    %418 = arith.addf %414, %417 : vector<8x32xf32>
    %419 = arith.addf %391, %418 : vector<8x32xf32>
    %c1_164 = arith.constant 1 : index
    %c0_165 = arith.constant 0 : index
    %c0_166 = arith.constant 0 : index
    %420 = vector.load %arg18[%c1_164, %c0_165, %c0_166] : memref<2x2x32xf32, #tpu.memory_space<vmem>>, vector<1x2x32xf32>
    %421 = vector.shape_cast %420 : vector<1x2x32xf32> to vector<2x32xf32>
    %422 = vector.extract_strided_slice %421 {offsets = [0, 0], sizes = [1, 32], strides = [1, 1]} : vector<2x32xf32> to vector<1x32xf32>
    %423 = vector.extract_strided_slice %421 {offsets = [1, 0], sizes = [1, 32], strides = [1, 1]} : vector<2x32xf32> to vector<1x32xf32>
    %cst_167 = arith.constant dense<0.000000e+00> : vector<8xf32>
    %424 = vector.multi_reduction <add>, %419, %cst_167 [1] : vector<8x32xf32> to vector<8xf32>
    %425 = vector.shape_cast %424 : vector<8xf32> to vector<8x1xf32>
    %cst_168 = arith.constant 3.200000e+01 : f32
    %426 = vector.broadcast %cst_168 : f32 to vector<8x1xf32>
    %427 = arith.divf %425, %426 : vector<8x1xf32>
    %428 = vector.broadcast %427 : vector<8x1xf32> to vector<8x32xf32>
    %429 = arith.subf %419, %428 : vector<8x32xf32>
    %430 = arith.mulf %429, %429 : vector<8x32xf32>
    %cst_169 = arith.constant dense<0.000000e+00> : vector<8xf32>
    %431 = vector.multi_reduction <add>, %430, %cst_169 [1] : vector<8x32xf32> to vector<8xf32>
    %432 = vector.shape_cast %431 : vector<8xf32> to vector<8x1xf32>
    %cst_170 = arith.constant 3.200000e+01 : f32
    %433 = vector.broadcast %cst_170 : f32 to vector<8x1xf32>
    %434 = arith.divf %432, %433 : vector<8x1xf32>
    %435 = vector.broadcast %427 : vector<8x1xf32> to vector<8x32xf32>
    %436 = arith.subf %419, %435 : vector<8x32xf32>
    %cst_171 = arith.constant 9.99999996E-13 : f32
    %437 = vector.broadcast %cst_171 : f32 to vector<8x1xf32>
    %438 = arith.addf %434, %437 : vector<8x1xf32>
    %439 = math.rsqrt %438 : vector<8x1xf32>
    %440 = vector.broadcast %439 : vector<8x1xf32> to vector<8x32xf32>
    %441 = arith.mulf %436, %440 : vector<8x32xf32>
    %442 = vector.broadcast %422 : vector<1x32xf32> to vector<8x32xf32>
    %443 = arith.mulf %441, %442 : vector<8x32xf32>
    %444 = vector.broadcast %423 : vector<1x32xf32> to vector<8x32xf32>
    %445 = arith.addf %443, %444 : vector<8x32xf32>
    %446 = arith.mulf %445, %2 : vector<8x32xf32>
    %c0_172 = arith.constant 0 : index
    %c0_173 = arith.constant 0 : index
    %447 = vector.load %arg19[%c0_172, %c0_173] : memref<8x32xf32, #tpu.memory_space<vmem>>, vector<8x32xf32>
    tpu.vector_store %arg19[%c0_172, %c0_173], %446 {strides = array<i32>} : memref<8x32xf32, #tpu.memory_space<vmem>>, vector<8x32xf32>,
    return
  }
  func.func @transform_0(%arg0: i32) -> (i32, i32) {
    %c0_i32 = arith.constant 0 : i32
    %c0_i32_0 = arith.constant 0 : i32
    return %arg0, %c0_i32 : i32, i32
  }
  func.func @transform_1(%arg0: i32) -> (i32, i32) {
    %c0_i32 = arith.constant 0 : i32
    %c0_i32_0 = arith.constant 0 : i32
    return %arg0, %c0_i32 : i32, i32
  }
  func.func @transform_2(%arg0: i32) -> (i32, i32) {
    %c0_i32 = arith.constant 0 : i32
    %c0_i32_0 = arith.constant 0 : i32
    return %arg0, %c0_i32 : i32, i32
  }
  func.func @transform_3(%arg0: i32) -> (i32, i32) {
    %c0_i32 = arith.constant 0 : i32
    %c0_i32_0 = arith.constant 0 : i32
    return %arg0, %c0_i32 : i32, i32
  }
  func.func @transform_4(%arg0: i32) -> (i32, i32) {
    %c0_i32 = arith.constant 0 : i32
    %c0_i32_0 = arith.constant 0 : i32
    %c0_i32_1 = arith.constant 0 : i32
    return %c0_i32, %c0_i32_0 : i32, i32
  }
  func.func @transform_5(%arg0: i32) -> (i32, i32, i32, i32) {
    %c0_i32 = arith.constant 0 : i32
    %c0_i32_0 = arith.constant 0 : i32
    %c0_i32_1 = arith.constant 0 : i32
    %c0_i32_2 = arith.constant 0 : i32
    %c0_i32_3 = arith.constant 0 : i32
    return %c0_i32, %c0_i32_0, %c0_i32_1, %c0_i32_2 : i32, i32, i32, i32
  }
  func.func @transform_6(%arg0: i32) -> (i32, i32, i32) {
    %c0_i32 = arith.constant 0 : i32
    %c0_i32_0 = arith.constant 0 : i32
    %c0_i32_1 = arith.constant 0 : i32
    %c0_i32_2 = arith.constant 0 : i32
    return %c0_i32, %c0_i32_0, %c0_i32_1 : i32, i32, i32
  }
  func.func @transform_7(%arg0: i32) -> (i32, i32, i32) {
    %c0_i32 = arith.constant 0 : i32
    %c0_i32_0 = arith.constant 0 : i32
    %c0_i32_1 = arith.constant 0 : i32
    %c0_i32_2 = arith.constant 0 : i32
    return %c0_i32, %c0_i32_0, %c0_i32_1 : i32, i32, i32
  }
  func.func @transform_8(%arg0: i32) -> (i32, i32, i32) {
    %c0_i32 = arith.constant 0 : i32
    %c0_i32_0 = arith.constant 0 : i32
    %c0_i32_1 = arith.constant 0 : i32
    %c0_i32_2 = arith.constant 0 : i32
    return %c0_i32, %c0_i32_0, %c0_i32_1 : i32, i32, i32
  }
  func.func @transform_9(%arg0: i32) -> (i32, i32, i32, i32) {
    %c0_i32 = arith.constant 0 : i32
    %c0_i32_0 = arith.constant 0 : i32
    %c0_i32_1 = arith.constant 0 : i32
    %c0_i32_2 = arith.constant 0 : i32
    %c0_i32_3 = arith.constant 0 : i32
    return %c0_i32, %c0_i32_0, %c0_i32_1, %c0_i32_2 : i32, i32, i32, i32
  }
  func.func @transform_10(%arg0: i32) -> (i32, i32, i32) {
    %c0_i32 = arith.constant 0 : i32
    %c0_i32_0 = arith.constant 0 : i32
    %c0_i32_1 = arith.constant 0 : i32
    %c0_i32_2 = arith.constant 0 : i32
    return %c0_i32, %c0_i32_0, %c0_i32_1 : i32, i32, i32
  }
  func.func @transform_11(%arg0: i32) -> (i32, i32, i32) {
    %c0_i32 = arith.constant 0 : i32
    %c0_i32_0 = arith.constant 0 : i32
    %c0_i32_1 = arith.constant 0 : i32
    %c0_i32_2 = arith.constant 0 : i32
    return %c0_i32, %c0_i32_0, %c0_i32_1 : i32, i32, i32
  }
  func.func @transform_12(%arg0: i32) -> (i32, i32, i32) {
    %c0_i32 = arith.constant 0 : i32
    %c0_i32_0 = arith.constant 0 : i32
    %c0_i32_1 = arith.constant 0 : i32
    %c0_i32_2 = arith.constant 0 : i32
    return %c0_i32, %c0_i32_0, %c0_i32_1 : i32, i32, i32
  }
  func.func @transform_13(%arg0: i32) -> (i32, i32, i32) {
    %c0_i32 = arith.constant 0 : i32
    %c0_i32_0 = arith.constant 0 : i32
    %c0_i32_1 = arith.constant 0 : i32
    %c0_i32_2 = arith.constant 0 : i32
    return %c0_i32, %c0_i32_0, %c0_i32_1 : i32, i32, i32
  }
  func.func @transform_14(%arg0: i32) -> (i32, i32, i32) {
    %c0_i32 = arith.constant 0 : i32
    %c0_i32_0 = arith.constant 0 : i32
    %c0_i32_1 = arith.constant 0 : i32
    %c0_i32_2 = arith.constant 0 : i32
    return %c0_i32, %c0_i32_0, %c0_i32_1 : i32, i32, i32
  }
  func.func @transform_15(%arg0: i32) -> (i32, i32, i32) {
    %c0_i32 = arith.constant 0 : i32
    %c0_i32_0 = arith.constant 0 : i32
    %c0_i32_1 = arith.constant 0 : i32
    %c0_i32_2 = arith.constant 0 : i32
    return %c0_i32, %c0_i32_0, %c0_i32_1 : i32, i32, i32
  }
  func.func @transform_16(%arg0: i32) -> (i32, i32, i32) {
    %c0_i32 = arith.constant 0 : i32
    %c0_i32_0 = arith.constant 0 : i32
    %c0_i32_1 = arith.constant 0 : i32
    %c0_i32_2 = arith.constant 0 : i32
    return %c0_i32, %c0_i32_0, %c0_i32_1 : i32, i32, i32
  }
  func.func @transform_17(%arg0: i32) -> (i32, i32, i32) {
    %c0_i32 = arith.constant 0 : i32
    %c0_i32_0 = arith.constant 0 : i32
    %c0_i32_1 = arith.constant 0 : i32
    %c0_i32_2 = arith.constant 0 : i32
    return %c0_i32, %c0_i32_0, %c0_i32_1 : i32, i32, i32
  }
  func.func @transform_18(%arg0: i32) -> (i32, i32) {
    %c0_i32 = arith.constant 0 : i32
    %c0_i32_0 = arith.constant 0 : i32
    return %arg0, %c0_i32 : i32, i32
  }
}

</mosaic_0001>

<bundles_post_ra>
// kernel: bert_decoder_disentangled_forward.1
= control target key start
LH: loop header
LB: loop body
LE: loop exit
PB: predicated region body
PF: predicated region fallthrough
CT: control target
= control target key end

     0   :  { %s6106_s0 = inlined_call_operand.vmem [shape: f32[16,32], index: 0, kind: input, shape index: {}]   ;;  %s6107_s1 = inlined_call_operand.vmem [shape: f32[16,32], index: 1, kind: input, shape index: {}]   ;;  %s6108_s2 = inlined_call_operand.vmem [shape: f32[16,8], index: 2, kind: input, shape index: {}]   ;;  %s6109_s3 = inlined_call_operand.vmem [shape: f32[16,1], index: 3, kind: input, shape index: {}]   ;;  %s6110_s4 = inlined_call_operand.vmem [shape: f32[2,32], index: 4, kind: input, shape index: {}]   ;;  %s6111_s5 = inlined_call_operand.vmem [shape: f32[2,3,32,32], index: 5, kind: input, shape index: {}]   ;;  %s6112_s6 = inlined_call_operand.vmem [shape: f32[2,32,32], index: 6, kind: input, shape index: {}]   ;;  %s6113_s7 = inlined_call_operand.vmem [shape: f32[2,4,32], index: 7, kind: input, shape index: {}]   ;;  %s6114_s8 = inlined_call_operand.vmem [shape: f32[2,2,32], index: 8, kind: input, shape index: {}]   ;;  %s6115_s9 = inlined_call_operand.vmem [shape: f32[2,3,32,32], index: 9, kind: input, shape index: {}]   ;;  %s6116_s10 = inlined_call_operand.hbm [shape: f32[2,32,32], index: 10, kind: input, shape index: {}]   ;;  %s6117_s11 = inlined_call_operand.vmem [shape: f32[2,4,32], index: 11, kind: input, shape index: {}]   ;;  %s6118_s12 = inlined_call_operand.vmem [shape: f32[2,2,32], index: 12, kind: input, shape index: {}]   ;;  %s6119_s13 = inlined_call_operand.hbm [shape: f32[2,32,64], index: 13, kind: input, shape index: {}]   ;;  %s6120_s14 = inlined_call_operand.vmem [shape: f32[2,1,64], index: 14, kind: input, shape index: {}]   ;;  %s6121_s15 = inlined_call_operand.vmem [shape: f32[2,64,32], index: 15, kind: input, shape index: {}]   ;;  %s6122_s16 = inlined_call_operand.vmem [shape: f32[2,1,32], index: 16, kind: input, shape index: {}]   ;;  %s6123_s17 = inlined_call_operand.vmem [shape: f32[2,2,32], index: 17, kind: input, shape index: {}]   ;;  %s6124_s18 = inlined_call_operand.hbm [shape: f32[16,32], index: 18, kind: output, shape index: {}]  }
   0x1   :  { %6146 = sst [smem:[#allocation18_spill]] %s6106_s0 }
   0x2   :  { %6147 = sst [smem:[#allocation19_spill]] %s6107_s1 }
   0x3   :  { %6148 = sst [smem:[#allocation20_spill]] %s6108_s2 }
   0x4   :  { %6149 = sst [smem:[#allocation21_spill]] %s6109_s3 }
   0x5   :  { %6150 = sst [smem:[#allocation22_spill]] %s6110_s4 }
   0x6   :  { %6151 = sst [smem:[#allocation23_spill]] %s6116_s10 }
   0x7   :  { %6152 = sst [smem:[#allocation24_spill]] %s6119_s13 }
   0x8   :  { %6153 = sst [smem:[#allocation25_spill]] %s6124_s18 }
   0x9   :  { %23 = vsyncpa [#allocation3], 0 }
   0xa   :  { %24 = vsyncpa [#allocation6], 0 }
   0xb   :  { %25 = vsyncpa [#allocation4], 0 }
   0xc   :  { %27 = vsyncpa [#allocation4 + $0x1], 0  ;;  %s5295_s27 = smov 0   ;;  %s5297_s28 = smov 0  }
   0xd   :  { %s5299_s29 = smov 0   ;;  %s5301_s30 = smov 0  }
   0xe LB: > { %6154 = sst [smem:[#allocation11_spill]] %s5172_s27  ;;  %s5316_s0 = sadd.s32 4294967295, %s5184_s30   ;;  %s5184_s30 = sphi %s5301_s30, %s6182_s30   ;;  %s5180_s29 = sphi %s5299_s29, %s6184_s29   ;;  %s5176_s28 = sphi %s5297_s28, %s6186_s28   ;;  %s5172_s27 = sphi %s5295_s27, %s6185_s27  }
   0xf   : > { %6155 = sst [smem:[#allocation12_spill]] %s5180_s29  ;;  %s4719_s19 = sadd.s32 4294967294, %s5184_s30  }
  0x10   : > { %6156 = sst [smem:[#allocation13_spill]] %s5184_s30  ;;  %s5320_s1 = sadd.s32 1, %s5184_s30  }
  0x11   : > { %6157 = sst [smem:[#allocation14_spill]] %s5320_s1  ;;  %s438_s20 = sadd.s32 1, %s5180_s29 }
  0x12   : > { %s435_s21 = ssub.s32 %s5184_s30, %s5320_s1  ;;  %p448_p0 = scmp.ne.s32.totalorder %s5180_s29, %s5176_s28 }
  0x13   : > { %p436_p1 = scmp.eq.s32.totalorder %s435_s21, 0  ;;  %p449_p2 = scmp.eq.s32.totalorder %s5316_s0, 1 }
  0x14   : > { %p454_p3 = scmp.ne.s32.totalorder %s5176_s28, %s5172_s27  ;;  %p455_p4 = scmp.eq.s32.totalorder %s4719_s19, 1 }
  0x15   : > { %s5331_s22 = scalar_select %p436_p1, %s5180_s29, %s438_s20  }
  0x16   : > { %p5333_p5 = por %p449_p2, %p448_p0  ;;  %p5337_p6 = por %p455_p4, %p454_p3 }
  0x17   : > { %6158 = sst [smem:[#allocation15_spill]] %s5331_s22  ;;  %p4720_p7 = scmp.ge.s32.totalorder %s5184_s30, 1 }
  0x18   : > { %s6159_s2 = scalar_select %p5333_p5, 1, 0 }
  0x19   : > { %s6161_s23 = scalar_select %p5337_p6, 1, 0 }
  0x1a   : > { %6160 = sst [smem:[#allocation16_spill]] %s6159_s2  ;;  %p462_p8 = scmp.lt.s32.totalorder %s5184_s30, 3 }
  0x1b   : > { %6162 = sst [smem:[#allocation17_spill]] %s6161_s23  ;;  %p4868_p9 = scmp.eq.s32.totalorder %s5316_s0, 0 }
  0x1c   : > { %p5344_p10 = pnand %p4720_p7, %p462_p8  ;;  %s6164_s10 = sld [smem:[#allocation23_spill]] }
  0x1d   : > { %s5186_s20 = smov [#allocation2]   ;;  %s6165_s13 = sld [smem:[#allocation24_spill]] }
  0x1e   : > { %p4857_p11 = pneg %p5344_p10  ;;  %s493_s21 = sshll.u32 %s5186_s20, 4  ;;  %s494_s21 = int_to_ptr.vmem [resolvable:$true] %s493_s21 }
  0x1f   : > { %s5187_s23 = smov 128   ;;  %s5188_s27 = smov 8  }
  0x20   : > { %p4858_p12 = pnand %p4868_p9, %p4857_p11  ;;  %s5189_s30 = smov [#allocation5]  }
  0x21   : > { %s513_s25 = sshll.u32 %s5189_s30, 4  ;;  %569 = sbr.rel (%p5344_p10) target bundleno = 8450 (0x2102), region = 92  ;;  %s514_s25 = int_to_ptr.vmem [resolvable:$true] %s513_s25 }
  0x22   : > { %s491_s19 = sshll.u32 %s6164_s10, 4  ;;  %s492_s19 = int_to_ptr.hbm [resolvable:$true] %s491_s19 }
  0x23   : > { %s511_s1 = sshll.u32 %s6165_s13, 4  ;;  %s512_s1 = int_to_ptr.hbm [resolvable:$true] %s511_s1 }
  0x24   : > { %4860 = dma.hbm_to_vmem [thread:$0]  (!%p4858_p12), %s492_s19, 1024, %s494_s21, [#allocation3], %s5187_s23, %s5187_s23, %s5188_s27  }
  0x25   : > { %4863 = dma.hbm_to_vmem [thread:$0]  (!%p4858_p12), %s512_s1, 1024, %s514_s25, [#allocation6], %s5187_s23, %s5187_s23, %s5188_s27  }
  0x26   : > { %5159 = dma.done.wait (%p4868_p9), [#allocation3], 1024  }
  0x27   : > { %5161 = vsyncadd (%p4868_p9), [#allocation3], 4294966272 }
  0x28   : > { %5163 = dma.done.wait (%p4868_p9), [#allocation6], 1024  }
  0x29   : > { %5165 = vsyncadd (%p4868_p9), [#allocation6], 4294966272  ;;  %p640_p13 = scmp.lt.s32.totalorder %s5316_s0, 1  ;;  %s6166_s22 = sld [smem:[#allocation18_spill]]  ;;  %vm666_vm0 = vcmask 261120   ;;  %v5190_v2 = vmov 32.0  }
  0x2a   : > { %4968 = vrcp.f32 %v5190_v2  ;;  %v703_v14 = vld [vmem:[%s6111_s5 + $0x18] sm:$0xff]  ;;  %v702_v17 = vld [vmem:[%s6111_s5 + $0x10] sm:$0xff]  ;;  %v701_v20 = vld [vmem:[%s6111_s5 + $0x8] sm:$0xff]  ;;  %s6167_s4 = sld [smem:[#allocation22_spill]]  ;;  %s6141_s30 = smov 120   ;;  %vm938_vm5 = vcmask 64512  }
  0x2b   : > { %s641_s29 = scalar_select %p640_p13, %s5316_s0, 1  ;;  %v707_v15 = vld [vmem:[%s6111_s5 + $0x38] sm:$0xff]  ;;  %733 = vmatpush.msra.mxu0 %v703_v14  ;;  %v706_v18 = vld [vmem:[%s6111_s5 + $0x30] sm:$0xff]  ;;  %v705_v21 = vld [vmem:[%s6111_s5 + $0x28] sm:$0xff]  ;;  %vm1440_vm6 = vcmask 1047556   ;;  %vm1563_vm7 = vcmask 130048  }
  0x2c   : > { %v711_v16 = vld [vmem:[%s6111_s5 + $0x58] sm:$0xff]  ;;  %754 = vmatpush.msra.mxu1 %v707_v15  ;;  %v710_v19 = vld [vmem:[%s6111_s5 + $0x50] sm:$0xff]  ;;  %v709_v22 = vld [vmem:[%s6111_s5 + $0x48] sm:$0xff]  ;;  %s6137_s1 = smov 112   ;;  %s6168_s24 = sld [smem:[#allocation20_spill]]  ;;  %vm1565_vm8 = vcmask 195584  }
  0x2d   : > { %s5370_s27 = sshll.u32 %s641_s29, 3  ;;  %775 = vmatpush.msra.mxu2 %v711_v16  ;;  %734 = vmatpush.msra.mxu0 %v702_v17  ;;  %v700_v23 = vld [vmem:[%s6111_s5] sm:$0xff]  ;;  %s6133_s29 = smov 104   ;;  %vm2587_vm15 = vcmask 523264  }
  0x2e   : > { %755 = vmatpush.msra.mxu1 %v706_v18  ;;  %v704_v24 = vld [vmem:[%s6111_s5 + $0x20] sm:$0xff]  ;;  %s6131_s19 = smov 24   ;;  %s6135_s20 = smov 16  }
  0x2f   : > { %s643_s23 = scalar_lea.vmem %s6166_s22, %s5370_s27  ;;  %776 = vmatpush.msra.mxu2 %v710_v19  ;;  %735 = vmatpush.msra.mxu0 %v701_v20  ;;  %v708_v25 = vld [vmem:[%s6111_s5 + $0x40] sm:$0xff]  ;;  %s6139_s21 = smov 8  }
  0x30   : > { %v664_v0 = vld [vmem:[%s643_s23] sm:$0xff]  ;;  %v4969_v3 = vpop.eup %4968  ;;  %756 = vmatpush.msra.mxu1 %v705_v21  ;;  %s6170_s3 = sld [smem:[#allocation21_spill]]  ;;  %s6171_s25 = smov 120  }
  0x31   : > { %v667_v1 = vsel %vm666_vm0, %v664_v0, 0.0  ;;  %v671_v4 = vmul.f32 32.0, %v4969_v3  ;;  %vm675_vm1 = vweird.f32 %v4969_v3  ;;  %777 = vmatpush.msra.mxu2 %v709_v22  ;;  %736 = vmatpush.msra.mxu0 %v700_v23  ;;  %v665_v34 = vld [vmem:[%s6167_s4] sm:$0x3]  ;;  %s6172_s22 = smov 112  }
  0x32   : > { %668 = vadd.xlane.f32.xlu0 %v667_v1  ;;  %757 = vmatpush.msra.mxu1 %v704_v24  ;;  %v696_v36 = vperm.slane %v665_v34, 0  ;;  %v698_v39 = vperm.slane %v665_v34, 1  ;;  %v5432_v42 = vld [vmem:[%s6113_s7] sm:$0xf]  ;;  %s5450_s26 = scalar_lea.vmem %s6168_s24, %s5370_s27 }
  0x33   : > { %v672_v5 = vsub.f32 1.0, %v671_v4  ;;  %778 = vmatpush.msra.mxu2 %v708_v25  ;;  %v717_v43 = vperm.slane %v5432_v42, 0  ;;  %v741_v44 = vperm.slane %v5432_v42, 1  ;;  %v662_v63 = vld [vmem:[%s5450_s26] sm:$0xff]  ;;  %v762_v17 = vperm.slane %v5432_v42, 2 }
  0x35   : > { %v673_v6 = vmul.f32 %v4969_v3, %v672_v5 }
  0x36   : > { %s655_s4 = scalar_lea.vmem %s6170_s3, %s5370_s27 }
  0x37   : > { %v674_v7 = vadd.f32 %v4969_v3, %v673_v6 }
  0x39   : > { %v5377_v8 = vsel %vm675_vm1, %v4969_v3, %v674_v7 }
  0xa5   : > { %v669_v9 = vpop.xlane.xlu0 %668 }
  0xa6   : > { %v677_v10 = vmul.f32 %v5377_v8, %v669_v9 }
  0xa8   : > { %v678_v11 = vsub.f32 %v664_v0, %v677_v10 }
  0xaa   : > { %v679_v12 = vmul.f32 %v678_v11, %v678_v11 }
  0xac   : > { %v680_v13 = vsel %vm666_vm0, %v679_v12, 0.0 }
  0xad   : > { %681 = vadd.xlane.f32.xlu0 %v680_v13 }
 0x120   : > { %v682_v26 = vpop.xlane.xlu0 %681 }
 0x121   : > { %v683_v27 = vmul.f32 %v682_v26, %v5377_v8 }
 0x123   : > { %v684_v28 = vadd.f32 1e-12, %v683_v27 }
 0x125   : > { %4970 = vrsqrt.f32 %v684_v28  ;;  %vm691_vm3 = vweird.f32 %v684_v28 }
 0x12b   : > { %v4971_v29 = vpop.eup %4970 }
 0x12c   : > { %v686_v30 = vmul.f32 %v4971_v29, %v684_v28  ;;  %vm692_vm2 = vweird.f32 %v4971_v29 }
 0x12d   : > { %vm693_vm4 = vmor %vm691_vm3, %vm692_vm2 }
 0x12e   : > { %v687_v31 = vmul.f32 %v4971_v29, %v686_v30 }
 0x130   : > { %v688_v32 = vmul.f32 0.5, %v687_v31 }
 0x132   : > { %v689_v33 = vsub.f32 1.5, %v688_v32 }
 0x134   : > { %v690_v35 = vmul.f32 %v4971_v29, %v689_v33 }
 0x136   : > { %v694_v37 = vsel %vm693_vm4, %v4971_v29, %v690_v35 }
 0x137   : > { %v695_v38 = vmul.f32 %v694_v37, %v678_v11 }
 0x139   : > { %v697_v40 = vmul.f32 %v696_v36, %v695_v38 }
 0x13b   : > { %v5421_v41 = vadd.f32 %v698_v39, %v697_v40 }
 0x13d   : > { %4732 = vmatmul.msk.f32.vlgmr.msra.gmra.mxu0 %vm666_vm0, %v5421_v41  ;;  %4733 = vmatmul.msk.f32.vlgmr.msra.gmra.mxu1 %vm666_vm0, %v5421_v41 }
 0x13e   : > { %4734 = vmatmul.msk.f32.vlgmr.msra.gmra.mxu2 %vm666_vm0, %v5421_v41 }
 0x1ba   : > { %v738_v45 = vpop.f32.mrf.mxu0  ;;  %v759_v46 = vpop.f32.mrf.mxu1 }
 0x1bb   : > { %v739_v47 = vadd.f32 %v738_v45, %v717_v43  ;;  %v760_v48 = vadd.f32 %v759_v46, %v741_v44 }
 0x1bd   : > { %797 = vrot.lane.b32.xlu2 %v760_v48, %s6133_s29  ;;  %791 = vrot.lane.b32.xlu1 %v760_v48, %s6141_s30 }
 0x1be   : > { %786 = vrot.lane.b32.xlu0 %v739_v47, %s6137_s1 }
 0x1c1   : > { %v780_v18 = vpop.f32.mrf.mxu2 }
 0x1c2   : > { %v781_v19 = vadd.f32 %v780_v18, %v762_v17 }
 0x1c5   : > { %794 = vrot.lane.b32.xlu1 %v760_v48, %s6137_s1  ;;  %784 = vrot.lane.b32.xlu2 %v739_v47, %s6141_s30 }
 0x1cd   : > { %788 = vrot.lane.b32.xlu1 %v739_v47, %s6133_s29 }
 0x217   : > { %v798_v51 = vpop.permute.xlu2 %797 }
 0x21f   : > { %v785_v54 = vpop.permute.xlu2 %784 }
 0x22f   : > { %v792_v49 = vpop.permute.xlu1 %791 }
 0x230   : > { %v4920_v50 = vpack.i.bf16 %v792_v49, %v760_v48  ;;  %v787_v62 = vpop.permute.xlu0 %786 }
 0x232   : > { %4921 = vxpose.xlu2.b32.start.end [1/1] (short) (narrow) %v4920_v50, 8 }
 0x237   : > { %v795_v52 = vpop.permute.xlu1 %794 }
 0x238   : > { %v4927_v53 = vpack.i.bf16 %v798_v51, %v795_v52 }
 0x23a   : > { %4928 = vxpose.xlu1.b32.start.end [1/1] (short) (narrow) %v4927_v53, 8 }
 0x23f   : > { %v789_v58 = vpop.permute.xlu1 %788 }
 0x2cb   : > { %v4922_v55 = vpop.trf.xlu2 }
 0x2cc   : > { %v4923_v56 = vunpack.i.l.bf16 %v4922_v55  ;;  %v4926_v57 = vunpack.i.h.bf16 %v4922_v55 }
 0x2ce   : > { %956 = vmatpush.msrb.mxu0 %v4923_v56  ;;  %978 = vmatpush.msra.mxu3 %v4926_v57 }
 0x2cf   : > { %4735 = vmatmul.msk.f32.vlgmr.msrb.gmra.mxu0 %vm938_vm5, %v739_v47  ;;  %4736 = vmatmul.msk.f32.vlgmr.msra.gmra.mxu3 %vm938_vm5, %v785_v54 }
 0x2de   : > { %v4929_v59 = vpop.trf.xlu1 }
 0x2df   : > { %v4930_v60 = vunpack.i.l.bf16 %v4929_v59  ;;  %v4933_v61 = vunpack.i.h.bf16 %v4929_v59 }
 0x2e1   : > { %1000 = vmatpush.msra.mxu0 %v4930_v60  ;;  %1022 = vmatpush.msrb.mxu1 %v4933_v61 }
 0x2e2   : > { %4737 = vmatmul.msk.f32.vlgmr.msra.gmra.mxu0 %vm938_vm5, %v787_v62  ;;  %4738 = vmatmul.msk.f32.vlgmr.msrb.gmra.mxu1 %vm938_vm5, %v789_v58 }
 0x34c   : > { %v958_v0 = vpop.f32.mrf.mxu0 }
 0x34d   : > { %v1027_v1 = vmul.f32 0.35355338, %v958_v0 }
 0x34f   : > { %v1031_v2 = vadd.f32 %v1027_v1, %v662_v63 }
 0x351   : > { %v1035_v3 = vsel %vm938_vm5, %v1031_v2, -inf }
 0x352   : > { %v980_v4 = vpop.f32.mrf.mxu3  ;;  %1036 = vmax.xlane.f32.xlu0 %v1035_v3 }
 0x353   : > { %v1028_v5 = vmul.f32 0.35355338, %v980_v4  ;;  %v5194_v4 = vmov 1983009808  }
 0x355   : > { %v1032_v6 = vadd.f32 %v1028_v5, %v662_v63  ;;  %v1445_v5 = vunpack.c.l.s4 %v5194_v4 }
 0x357   : > { %v1038_v7 = vsel %vm938_vm5, %v1032_v6, -inf }
 0x358   : > { %1039 = vmax.xlane.f32.xlu2 %v1038_v7 }
 0x35f   : > { %v1002_v9 = vpop.f32.mrf.mxu0  ;;  %v1024_v10 = vpop.f32.mrf.mxu1 }
 0x360   : > { %v1029_v11 = vmul.f32 0.35355338, %v1002_v9  ;;  %v1030_v12 = vmul.f32 0.35355338, %v1024_v10  ;;  %v5474_v10 = vunpack.c.0.s8 %v1445_v5 }
 0x362   : > { %v1033_v13 = vadd.f32 %v1029_v11, %v662_v63  ;;  %v1034_v14 = vadd.f32 %v1030_v12, %v662_v63 }
 0x364   : > { %v1041_v15 = vsel %vm938_vm5, %v1033_v13, -inf  ;;  %v1044_v16 = vsel %vm938_vm5, %v1034_v14, -inf }
 0x365   : > { %1042 = vmax.xlane.f32.xlu1 %v1041_v15  ;;  %1045 = vmax.xlane.f32.xlu0 %v1044_v16 }
 0x379   : > { %801 = vrot.lane.b32.xlu0 %v781_v19, %s6141_s30 }
 0x381   : > { %804 = vrot.lane.b32.xlu0 %v781_v19, %s6137_s1 }
 0x389   : > { %807 = vrot.lane.b32.xlu0 %v781_v19, %s6133_s29  ;;  %s6174_s29 = smov 24  }
 0x3c5   : > { %v1037_v20 = vpop.xlane.xlu0 %1036 }
 0x3c6   : > { %v1047_v21 = vsub.f32 %v1031_v2, %v1037_v20 }
 0x3c8   : > { %v1051_v22 = vmul.f32 1.442695, %v1047_v21 }
 0x3ca   : > { %4972 = vpow2.f32 %v1051_v22 }
 0x3cb   : > { %v1040_v27 = vpop.xlane.xlu2 %1039 }
 0x3cc   : > { %v1048_v32 = vsub.f32 %v1032_v6, %v1040_v27 }
 0x3ce   : > { %v1053_v33 = vmul.f32 1.442695, %v1048_v32 }
 0x3d0   : > { %v4973_v23 = vpop.eup %4972 }
 0x3d1   : > { %v1059_v24 = vsel %vm938_vm5, %v4973_v23, 0.0 }
 0x3d2   : > { %1060 = vadd.xlane.f32.xlu0 %v1059_v24 }
 0x3d8   : > { %v1043_v25 = vpop.xlane.xlu1 %1042  ;;  %v1046_v26 = vpop.xlane.xlu0 %1045 }
 0x3d9   : > { %v1049_v28 = vsub.f32 %v1033_v13, %v1043_v25  ;;  %v1050_v29 = vsub.f32 %v1034_v14, %v1046_v26  ;;  %v5195_v13 = vmov 1934713408  }
 0x3da   : > { %v1469_v14 = vunpack.c.l.s4 %v5195_v13 }
 0x3db   : > { %v1055_v30 = vmul.f32 1.442695, %v1049_v28  ;;  %v1057_v31 = vmul.f32 1.442695, %v1050_v29 }
 0x3dc   : > { %v5479_v18 = vunpack.c.0.s8 %v1469_v14  ;;  %v715_v14 = vld [vmem:[%s6112_s6 + $0x18] sm:$0xff] }
 0x3dd   : > { %4974 = vpow2.f32 %v1055_v30 }
 0x3de   : > { %4976 = vpow2.f32 %v1057_v31 }
 0x3df   : > { %4978 = vpow2.f32 %v1053_v33 }
 0x3e3   : > { %v4975_v34 = vpop.eup %4974 }
 0x3e4   : > { %v4977_v35 = vpop.eup %4976  ;;  %v1065_v36 = vsel %vm938_vm5, %v4975_v34, 0.0 }
 0x3e5   : > { %1066 = vadd.xlane.f32.xlu1 %v1065_v36  ;;  %v1068_v37 = vsel %vm938_vm5, %v4977_v35, 0.0  ;;  %v4979_v38 = vpop.eup %4978 }
 0x3e6   : > { %1069 = vadd.xlane.f32.xlu2 %v1068_v37  ;;  %v1062_v39 = vsel %vm938_vm5, %v4979_v38, 0.0 }
 0x3eb   : > { %v802_v40 = vpop.permute.xlu0 %801 }
 0x3ee   : > { %1063 = vadd.xlane.f32.xlu2 %v1062_v39 }
 0x3f3   : > { %v805_v43 = vpop.permute.xlu0 %804 }
 0x3fb   : > { %1079 = vxpose.xlu0.b32.start.end [1/1] (short) (narrow) %v781_v19, 8  ;;  %v808_v44 = vpop.permute.xlu0 %807 }
 0x403   : > { %1175 = vxpose.xlu0.b32.start.end [1/1] (short) (narrow) %v808_v44, 8 }
 0x417   : > { %1143 = vxpose.xlu2.b32.start.end [1/1] (short) (narrow) %v805_v43, 8 }
 0x41f   : > { %1111 = vxpose.xlu1.b32.start.end [1/1] (short) (narrow) %v802_v40, 8 }
 0x445   : > { %v1061_v45 = vpop.xlane.xlu0 %1060 }
 0x446   : > { %4980 = vrcp.f32 %v1061_v45 }
 0x44c   : > { %v4981_v46 = vpop.eup %4980 }
 0x44d   : > { %v1075_v47 = vmul.f32 %v4981_v46, %v4973_v23 }
 0x44f   : > { %4739 = vmatpush.xpose.msk.msrb.mxu2 %vm938_vm5, %v1075_v47 }
 0x453   : > { %1583 = vmatpush.msra.mxu2 %v715_v14 }
 0x458   : > { %v1067_v48 = vpop.xlane.xlu1 %1066 }
 0x459   : > { %4982 = vrcp.f32 %v1067_v48  ;;  %v1070_v49 = vpop.xlane.xlu2 %1069 }
 0x45a   : > { %4984 = vrcp.f32 %v1070_v49 }
 0x45f   : > { %v4983_v50 = vpop.eup %4982 }
 0x460   : > { %v4985_v51 = vpop.eup %4984  ;;  %v1077_v52 = vmul.f32 %v4983_v50, %v4975_v34 }
 0x461   : > { %v1078_v53 = vmul.f32 %v4985_v51, %v4977_v35  ;;  %v1064_v54 = vpop.xlane.xlu2 %1063 }
 0x462   : > { %4986 = vrcp.f32 %v1064_v54  ;;  %4743 = vmatpush.xpose.msk.msrb.mxu0 %vm938_vm5, %v1077_v52 }
 0x463   : > { %4745 = vmatpush.xpose.msk.msra.mxu1 %vm938_vm5, %v1078_v53 }
 0x468   : > { %v4987_v55 = vpop.eup %4986 }
 0x469   : > { %v1076_v56 = vmul.f32 %v4987_v55, %v4979_v38 }
 0x46b   : > { %4741 = vmatpush.xpose.msk.msrb.mxu3 %vm938_vm5, %v1076_v56 }
 0x49f   : > { %v1095_v57 = vpop.trf.xlu0 }
 0x4a0   : > { %4740 = vmatmul.msk.f32.vlgmr.msrb.gmra.mxu2 %vm938_vm5, %v1095_v57 }
 0x4a7   : > { %v1191_v58 = vpop.trf.xlu0 }
 0x4a8   : > { %4746 = vmatmul.msk.f32.vlgmr.msra.gmra.mxu1 %vm938_vm5, %v1191_v58 }
 0x4b0   : > { %v1159_v59 = vpop.trf.xlu2 }
 0x4b1   : > { %4744 = vmatmul.msk.f32.vlgmr.msrb.gmra.mxu0 %vm938_vm5, %v1159_v59 }
 0x4c3   : > { %v1127_v60 = vpop.trf.xlu1 }
 0x4c4   : > { %4742 = vmatmul.msk.f32.vlgmr.msrb.gmra.mxu3 %vm938_vm5, %v1127_v60 }
 0x523   : > { %v1230_v61 = vpop.f32.mrf.mxu2 }
 0x524   : > { %1311 = vxpose.xlu2.b32.start.end [1/1] (short) (narrow) %v1230_v61, 8 }
 0x525   : > { %v1308_v63 = vpop.f32.mrf.mxu1 }
 0x52e   : > { %v1282_v62 = vpop.f32.mrf.mxu0 }
 0x52f   : > { %1375 = vxpose.xlu0.b32.start.end [1/1] (short) (narrow) %v1282_v62, 8 }
 0x537   : > { %1407 = vxpose.xlu0.b32.start.end [1/1] (short) (narrow) %v1308_v63, 8 }
 0x547   : > { %v1256_v0 = vpop.f32.mrf.mxu3 }
 0x548   : > { %1343 = vxpose.xlu2.b32.start.end [1/1] (short) (narrow) %v1256_v0, 8 }
 0x5bd   : > { %v1327_v2 = vpop.trf.xlu2 }
 0x5be   : > { %v1442_v6 = vrot.slane %v1327_v2, 4 }
 0x5d3   : > { %v1391_v1 = vpop.trf.xlu0 }
 0x5d4   : > { %v1439_v3 = vrot.slane %v1391_v1, 4  ;;  %v1443_v11 = vsel %vm1440_vm6, %v1391_v1, %v1442_v6 }
 0x5d5   : > { %v1451_v16 = vperm.slane %v1443_v11, %v5474_v10 }
 0x5d6   : > { %v1441_v9 = vsel %vm1440_vm6, %v1439_v3, %v1327_v2 }
 0x5d7   : > { %v1447_v15 = vperm.slane %v1441_v9, %v5474_v10  ;;  %v1478_v24 = vrot.slane %v1451_v16, 4 }
 0x5d9   : > { %v1466_v21 = vrot.slane %v1447_v15, 4 }
 0x5db   : > { %v1423_v7 = vpop.trf.xlu0 }
 0x5dc   : > { %v1452_v12 = vrot.slane %v1423_v7, 4 }
 0x5e1   : > { %v1359_v17 = vpop.trf.xlu2 }
 0x5e2   : > { %v1453_v19 = vsel %vm1440_vm6, %v1452_v12, %v1359_v17  ;;  %v1454_v20 = vrot.slane %v1359_v17, 4  ;;  %v712_v17 = vld [vmem:[%s6112_s6] sm:$0xff] }
 0x5e3   : > { %v1459_v22 = vperm.slane %v1453_v19, %v5474_v10 }
 0x5e4   : > { %v1455_v23 = vsel %vm1440_vm6, %v1423_v7, %v1454_v20 }
 0x5e5   : > { %v1463_v25 = vperm.slane %v1455_v23, %v5474_v10  ;;  %v1464_v26 = vrot.slane %v1459_v22, 4  ;;  %v1467_v27 = vsel %vm1440_vm6, %v1459_v22, %v1466_v21 }
 0x5e6   : > { %v1475_v28 = vperm.slane %v1467_v27, %v5479_v18  ;;  %v1625_v27 = vld [vmem:[%s6115_s9 + $0x28] sm:$0xff] }
 0x5e7   : > { %v1465_v29 = vsel %vm1440_vm6, %v1464_v26, %v1447_v15  ;;  %v1476_v30 = vrot.slane %v1463_v25, 4  ;;  %v1479_v31 = vsel %vm1440_vm6, %v1463_v25, %v1478_v24  ;;  %v714_v15 = vld [vmem:[%s6112_s6 + $0x10] sm:$0xff]  ;;  %v1627_v25 = vld [vmem:[%s6115_s9 + $0x38] sm:$0xff] }
 0x5e8   : > { %v1471_v32 = vperm.slane %v1465_v29, %v5479_v18  ;;  %v1487_v33 = vperm.slane %v1479_v31, %v5479_v18  ;;  %v1490_v34 = vrot.slane %v1475_v28, 4  ;;  %1584 = vmatpush.msra.mxu2 %v714_v15  ;;  %v1626_v26 = vld [vmem:[%s6115_s9 + $0x30] sm:$0xff]  ;;  %1677 = vmatpush.msra.mxu0 %v1627_v25  ;;  %v1624_v28 = vld [vmem:[%s6115_s9 + $0x20] sm:$0xff] }
 0x5e9   : > { %v1477_v35 = vsel %vm1440_vm6, %v1476_v30, %v1451_v16  ;;  %v713_v16 = vld [vmem:[%s6112_s6 + $0x8] sm:$0xff]  ;;  %v1567_v30 = vperm.slane %v5432_v42, 3  ;;  %v5570_v42 = vld [vmem:[%s6117_s11] sm:$0xf] }
 0x5ea   : > { %v1483_v36 = vperm.slane %v1477_v35, %v5479_v18  ;;  %v1488_v37 = vrot.slane %v1471_v32, 4  ;;  %v1491_v38 = vsel %vm1440_vm6, 0.0, %v1490_v34  ;;  %v1494_v39 = vrot.slane %v1487_v33, 4  ;;  %1585 = vmatpush.msra.mxu2 %v713_v16  ;;  %1678 = vmatpush.msra.mxu0 %v1626_v26  ;;  %v656_v35 = vld [vmem:[%s655_s4] sm:$0xff]  ;;  %s6177_s4 = sld [smem:[#allocation25_spill]] }
 0x5eb   : > { %v1496_v40 = vsel %vm1440_vm6, %v1490_v34, %v1471_v32  ;;  %v1501_v43 = vrot.slane %v1491_v38, 4 }
 0x5ec   : > { %v1489_v44 = vsel %vm1440_vm6, 0.0, %v1488_v37  ;;  %v1492_v45 = vrot.slane %v1483_v36, 4  ;;  %v1495_v46 = vsel %vm1440_vm6, 0.0, %v1494_v39  ;;  %v1500_v47 = vperm.slane %v1496_v40, %v5474_v10  ;;  %1586 = vmatpush.msra.mxu2 %v712_v17  ;;  %1679 = vmatpush.msra.mxu0 %v1625_v27  ;;  %v1631_v17 = vld [vmem:[%s6115_s9 + $0x58] sm:$0xff] }
 0x5ed   : > { %v1512_v48 = vrot.slane %v1495_v46, 4  ;;  %v1502_v49 = vsel %vm1440_vm6, %v1501_v43, %v1489_v44  ;;  %v1507_v50 = vsel %vm1440_vm6, %v1494_v39, %v1483_v36  ;;  %v5199_v36 = vmov 0   ;;  %1698 = vmatpush.msrb.mxu1 %v1631_v17 }
 0x5ee   : > { %v1493_v51 = vsel %vm1440_vm6, 0.0, %v1492_v45  ;;  %v1506_v52 = vperm.slane %v1502_v49, %v5474_v10  ;;  %v1511_v53 = vperm.slane %v1507_v50, %v5474_v10  ;;  %v1520_v54 = vrot.slane %v1500_v47, 4  ;;  %1680 = vmatpush.msra.mxu0 %v1624_v28  ;;  %4934 = vset.pattern.permute.xlu2 %v5199_v36  ;;  %v1623_v49 = vld [vmem:[%s6115_s9 + $0x18] sm:$0xff]  ;;  %v1622_v50 = vld [vmem:[%s6115_s9 + $0x10] sm:$0xff] }
 0x5ef   : > { %v1513_v55 = vsel %vm1440_vm6, %v1512_v48, %v1493_v51  ;;  %v1661_v37 = vperm.slane %v5570_v42, 1  ;;  %1653 = vmatpush.msra.mxu3 %v1623_v49  ;;  %v1621_v51 = vld [vmem:[%s6115_s9 + $0x8] sm:$0xff] }
 0x5f0   : > { %v1517_v56 = vperm.slane %v1513_v55, %v5474_v10  ;;  %v1521_v57 = vsel %vm1440_vm6, %v1506_v52, %v1520_v54  ;;  %v1532_v58 = vrot.slane %v1511_v53, 4  ;;  %v1518_v59 = vrot.slane %v1506_v52, 4  ;;  %v1620_v52 = vld [vmem:[%s6115_s9] sm:$0xff] }
 0x5f1   : > { %v1529_v60 = vperm.slane %v1521_v57, %v5479_v18  ;;  %1654 = vmatpush.msra.mxu3 %v1622_v50 }
 0x5f2   : > { %v1533_v61 = vsel %vm1440_vm6, %v1517_v56, %v1532_v58  ;;  %v1519_v62 = vsel %vm1440_vm6, %v1518_v59, %v1500_v47  ;;  %v1530_v63 = vrot.slane %v1517_v56, 4 }
 0x5f3   : > { %v1541_v0 = vperm.slane %v1533_v61, %v5479_v18  ;;  %v1548_v1 = vrot.slane %v1529_v60, 4  ;;  %v1525_v2 = vperm.slane %v1519_v62, %v5479_v18  ;;  %1655 = vmatpush.msra.mxu3 %v1621_v51 }
 0x5f4   : > { %v1531_v3 = vsel %vm1440_vm6, %v1530_v63, %v1511_v53 }
 0x5f5   : > { %v1549_v4 = vsel %vm1440_vm6, %v1541_v0, %v1548_v1  ;;  %v1546_v5 = vrot.slane %v1541_v0, 4  ;;  %v1537_v6 = vperm.slane %v1531_v3, %v5479_v18  ;;  %v1544_v7 = vrot.slane %v1525_v2, 4  ;;  %1656 = vmatpush.msra.mxu3 %v1620_v52 }
 0x5f6   : > { %1559 = vrot.lane.b32.xlu2 %v1549_v4, %s6131_s19  ;;  %s6176_s19 = smov 8  }
 0x5f7   : > { %v1547_v9 = vsel %vm1440_vm6, %v1546_v5, %v1529_v60  ;;  %v1542_v11 = vrot.slane %v1537_v6, 4  ;;  %v1545_v12 = vsel %vm1440_vm6, %v1537_v6, %v1544_v7  ;;  %v1592_v60 = vld [vmem:[%s6114_s8] sm:$0x3] }
 0x5f8   : > { %1555 = vrot.lane.b32.xlu1 %v1547_v9, %s6135_s20  ;;  %1551 = vrot.lane.b32.xlu0 %v1545_v12, %s6139_s21  ;;  %s6169_s21 = sld [smem:[#allocation19_spill]]  ;;  %v1615_v63 = vperm.slane %v1592_v60, 0  ;;  %v1617_v1 = vperm.slane %v1592_v60, 1  ;;  %s4844_s20 = sshll.u32 %s5316_s0, 3 }
 0x5f9   : > { %v1543_v13 = vsel %vm1440_vm6, %v1542_v11, %v1525_v2  ;;  %v1637_v11 = vperm.slane %v5570_v42, 0  ;;  %s4597_s3 = scalar_lea.hbm %s6177_s4, %s4844_s20 }
 0x5fa   : > { %s4601_s13 = sshll.u32 %s4597_s3, 4  ;;  %s4602_s13 = int_to_ptr.hbm [resolvable:$true] %s4601_s13 }
 0x5fe   : > { %s5549_s30 = scalar_lea.vmem %s6169_s21, %s5370_s27  ;;  %659 = vperm.xlu2 %4934, %v656_v35   ;;  %s6173_s27 = smov 104  }
 0x5ff   : > { %v5555_v29 = vld [vmem:[%s5549_s30] sm:$0xff]  ;;  %s6175_s21 = smov 16  }
 0x600   : > { %4749 = vmatmul.msk.f32.vlgmr.msra.gmra.mxu0 %vm666_vm0, %v5555_v29 }
 0x650   : > { %v1560_v22 = vpop.permute.xlu2 %1559 }
 0x658   : > { %v5578_v46 = vpop.permute.xlu2 %659 }
 0x66a   : > { %v1556_v19 = vpop.permute.xlu1 %1555  ;;  %v1552_v20 = vpop.permute.xlu0 %1551 }
 0x66b   : > { %v1562_v21 = vsel %vm938_vm5, %v1543_v13, %v1552_v20  ;;  %v1629_v20 = vld [vmem:[%s6115_s9 + $0x48] sm:$0xff] }
 0x66c   : > { %v1564_v23 = vsel %vm1563_vm7, %v1562_v21, %v1556_v19  ;;  %v1630_v19 = vld [vmem:[%s6115_s9 + $0x50] sm:$0xff]  ;;  %v1628_v21 = vld [vmem:[%s6115_s9 + $0x40] sm:$0xff] }
 0x66d   : > { %v1566_v24 = vsel %vm1565_vm8, %v1564_v23, %v1560_v22  ;;  %1699 = vmatpush.msrb.mxu1 %v1630_v19 }
 0x66e   : > { %4747 = vmatmul.msk.f32.vlgmr.msra.gmra.mxu2 %vm666_vm0, %v1566_v24 }
 0x66f   : > { %1700 = vmatpush.msrb.mxu1 %v1629_v20 }
 0x671   : > { %1701 = vmatpush.msrb.mxu1 %v1628_v21 }
 0x672   : > { %4750 = vmatmul.msk.f32.vlgmr.msrb.gmra.mxu1 %vm666_vm0, %v5555_v29 }
 0x6ef   : > { %v1703_v35 = vpop.f32.mrf.mxu1 }
 0x6f1   : > { %v1588_v31 = vpop.f32.mrf.mxu2 }
 0x6f2   : > { %v1589_v32 = vadd.f32 %v1588_v31, %v1567_v30 }
 0x6f4   : > { %v1591_v33 = vadd.f32 %v1589_v32, %v5421_v41  ;;  %v1682_v41 = vpop.f32.mrf.mxu0 }
 0x6f5   : > { %v1683_v38 = vadd.f32 %v1682_v41, %v1661_v37 }
 0x6f6   : > { %v1593_v34 = vsel %vm666_vm0, %v1591_v33, 0.0 }
 0x6f7   : > { %1594 = vadd.xlane.f32.xlu1 %v1593_v34  ;;  %1714 = vrot.lane.b32.xlu2 %v1683_v38, %s6171_s25  ;;  %v1685_v34 = vperm.slane %v5570_v42, 2 }
 0x6f9   : > { %v1704_v37 = vadd.f32 %v1703_v35, %v1685_v34 }
 0x6ff   : > { %1717 = vrot.lane.b32.xlu2 %v1683_v38, %s6172_s22 }
 0x707   : > { %1720 = vrot.lane.b32.xlu2 %v1683_v38, %s6173_s27 }
 0x751   : > { %v1715_v47 = vpop.permute.xlu2 %1714 }
 0x752   : > { %v4935_v48 = vpack.i.bf16 %v1715_v47, %v1683_v38 }
 0x759   : > { %v1718_v14 = vpop.permute.xlu2 %1717 }
 0x761   : > { %v1721_v15 = vpop.permute.xlu2 %1720 }
 0x762   : > { %v4942_v16 = vpack.i.bf16 %v1721_v15, %v1718_v14 }
 0x76a   : > { %v1595_v39 = vpop.xlane.xlu1 %1594 }
 0x76b   : > { %v1596_v40 = vmul.f32 %v1595_v39, %v5377_v8 }
 0x76d   : > { %v1597_v43 = vsub.f32 %v1591_v33, %v1596_v40 }
 0x76f   : > { %v1598_v44 = vmul.f32 %v1597_v43, %v1597_v43 }
 0x771   : > { %v1599_v45 = vsel %vm666_vm0, %v1598_v44, 0.0 }
 0x772   : > { %1600 = vadd.xlane.f32.xlu0 %v1599_v45 }
 0x79b   : > { %4936 = vxpose.xlu0.b32.start.end [1/1] (short) (narrow) %v4935_v48, 8 }
 0x7e5   : > { %v1601_v53 = vpop.xlane.xlu0 %1600 }
 0x7e6   : > { %v1602_v54 = vmul.f32 %v1601_v53, %v5377_v8 }
 0x7e8   : > { %v1603_v55 = vadd.f32 1e-12, %v1602_v54 }
 0x7ea   : > { %4988 = vrsqrt.f32 %v1603_v55  ;;  %vm1610_vm10 = vweird.f32 %v1603_v55 }
 0x7f0   : > { %v4989_v56 = vpop.eup %4988 }
 0x7f1   : > { %v1605_v57 = vmul.f32 %v4989_v56, %v1603_v55  ;;  %vm1611_vm9 = vweird.f32 %v4989_v56 }
 0x7f2   : > { %vm1612_vm11 = vmor %vm1610_vm10, %vm1611_vm9 }
 0x7f3   : > { %v1606_v58 = vmul.f32 %v4989_v56, %v1605_v57 }
 0x7f5   : > { %v1607_v59 = vmul.f32 0.5, %v1606_v58 }
 0x7f7   : > { %v1608_v61 = vsub.f32 1.5, %v1607_v59 }
 0x7f9   : > { %v1609_v62 = vmul.f32 %v4989_v56, %v1608_v61 }
 0x7fb   : > { %v1613_v0 = vsel %vm1612_vm11, %v4989_v56, %v1609_v62 }
 0x7fc   : > { %v1614_v2 = vmul.f32 %v1613_v0, %v1597_v43 }
 0x7fe   : > { %v1616_v3 = vmul.f32 %v1615_v63, %v1614_v2 }
 0x800   : > { %v1618_v4 = vadd.f32 %v1617_v1, %v1616_v3 }
 0x802   : > { %v5597_v5 = vmul.f32 %v1618_v4, %v5578_v46 }
 0x804   : > { %4748 = vmatmul.msk.f32.vlgmr.msra.gmra.mxu3 %vm666_vm0, %v5597_v5 }
 0x83f   : > { %v4937_v6 = vpop.trf.xlu0 }
 0x840   : > { %v4941_v7 = vunpack.i.h.bf16 %v4937_v6  ;;  %v4938_v9 = vunpack.i.l.bf16 %v4937_v6 }
 0x842   : > { %1878 = vmatpush.msrb.mxu2 %v4938_v9  ;;  %1900 = vmatpush.msrb.mxu3 %v4941_v7 }
 0x887   : > { %v1658_v12 = vpop.f32.mrf.mxu3 }
 0x888   : > { %v1659_v13 = vadd.f32 %v1658_v12, %v1637_v11 }
 0x88a   : > { %1709 = vrot.lane.b32.xlu2 %v1659_v13, %s6172_s22  ;;  %1707 = vrot.lane.b32.xlu1 %v1659_v13, %s6171_s25 }
 0x88b   : > { %4751 = vmatmul.msk.f32.vlgmr.msrb.gmra.mxu2 %vm938_vm5, %v1659_v13 }
 0x892   : > { %1711 = vrot.lane.b32.xlu2 %v1659_v13, %s6173_s27 }
 0x8b8   : > { %4943 = vxpose.xlu2.b32.start.end [1/1] (short) (narrow) %v4942_v16, 8 }
 0x8e4   : > { %v1710_v26 = vpop.permute.xlu2 %1709 }
 0x8ec   : > { %v1712_v27 = vpop.permute.xlu2 %1711 }
 0x8fc   : > { %v1708_v22 = vpop.permute.xlu1 %1707 }
 0x8fd   : > { %4752 = vmatmul.msk.f32.vlgmr.msrb.gmra.mxu3 %vm938_vm5, %v1708_v22 }
 0x90e   : > { %v1880_v23 = vpop.f32.mrf.mxu2 }
 0x90f   : > { %v1949_v24 = vmul.f32 0.35355338, %v1880_v23 }
 0x911   : > { %v1953_v25 = vsel %vm938_vm5, %v1949_v24, -inf }
 0x912   : > { %1954 = vmax.xlane.f32.xlu1 %v1953_v25 }
 0x951   : > { %v4944_v28 = vpop.trf.xlu2 }
 0x952   : > { %v4948_v30 = vunpack.i.h.bf16 %v4944_v28  ;;  %v4945_v31 = vunpack.i.l.bf16 %v4944_v28 }
 0x954   : > { %1922 = vmatpush.msrb.mxu0 %v4945_v31  ;;  %1944 = vmatpush.msra.mxu1 %v4948_v30 }
 0x955   : > { %4753 = vmatmul.msk.f32.vlgmr.msrb.gmra.mxu0 %vm938_vm5, %v1710_v26  ;;  %4754 = vmatmul.msk.f32.vlgmr.msra.gmra.mxu1 %vm938_vm5, %v1712_v27 }
 0x980   : > { %v1902_v29 = vpop.f32.mrf.mxu3 }
 0x981   : > { %v1950_v32 = vmul.f32 0.35355338, %v1902_v29 }
 0x983   : > { %v1956_v33 = vsel %vm938_vm5, %v1950_v32, -inf }
 0x984   : > { %1957 = vmax.xlane.f32.xlu0 %v1956_v33 }
 0x985   : > { %v1955_v48 = vpop.xlane.xlu1 %1954 }
 0x986   : > { %v1965_v49 = vsub.f32 %v1949_v24, %v1955_v48 }
 0x988   : > { %v1969_v50 = vmul.f32 1.442695, %v1965_v49 }
 0x98a   : > { %4990 = vpow2.f32 %v1969_v50 }
 0x990   : > { %v4991_v53 = vpop.eup %4990 }
 0x991   : > { %v1977_v54 = vsel %vm938_vm5, %v4991_v53, 0.0 }
 0x998   : > { %1730 = vrot.lane.b32.xlu0 %v1704_v37, %s6173_s27 }
 0x9ba   : > { %1997 = vxpose.xlu0.b32.start.end [1/1] (short) (narrow) %v1704_v37, 8 }
 0x9d2   : > { %v1924_v41 = vpop.f32.mrf.mxu0  ;;  %v1946_v38 = vpop.f32.mrf.mxu1 }
 0x9d3   : > { %v1951_v39 = vmul.f32 0.35355338, %v1924_v41  ;;  %v1952_v40 = vmul.f32 0.35355338, %v1946_v38 }
 0x9d5   : > { %v1962_v43 = vsel %vm938_vm5, %v1952_v40, -inf  ;;  %v1959_v44 = vsel %vm938_vm5, %v1951_v39, -inf }
 0x9d6   : > { %1963 = vmax.xlane.f32.xlu1 %v1962_v43  ;;  %1960 = vmax.xlane.f32.xlu2 %v1959_v44 }
 0x9ef   : > { %1724 = vrot.lane.b32.xlu1 %v1704_v37, %s6171_s25 }
 0x9f7   : > { %1727 = vrot.lane.b32.xlu1 %v1704_v37, %s6172_s22  ;;  %v1958_v45 = vpop.xlane.xlu0 %1957 }
 0x9f8   : > { %v1966_v51 = vsub.f32 %v1950_v32, %v1958_v45 }
 0x9fa   : > { %v1971_v52 = vmul.f32 1.442695, %v1966_v51 }
 0x9fc   : > { %4992 = vpow2.f32 %v1971_v52 }
 0xa02   : > { %v4993_v55 = vpop.eup %4992 }
 0xa03   : > { %v1980_v56 = vsel %vm938_vm5, %v4993_v55, 0.0 }
 0xa0a   : > { %v1731_v47 = vpop.permute.xlu0 %1730 }
 0xa0b   : > { %2093 = vxpose.xlu0.b32.start.end [1/1] (short) (narrow) %v1731_v47, 8 }
 0xa21   : > { %1978 = vadd.xlane.f32.xlu1 %v1977_v54 }
 0xa29   : > { %1981 = vadd.xlane.f32.xlu1 %v1980_v56 }
 0xa49   : > { %v1961_v57 = vpop.xlane.xlu2 %1960  ;;  %v1964_v58 = vpop.xlane.xlu1 %1963 }
 0xa4a   : > { %v1967_v59 = vsub.f32 %v1951_v39, %v1961_v57  ;;  %v1968_v61 = vsub.f32 %v1952_v40, %v1964_v58 }
 0xa4c   : > { %v1973_v60 = vmul.f32 1.442695, %v1967_v59  ;;  %v1975_v62 = vmul.f32 1.442695, %v1968_v61 }
 0xa4e   : > { %4994 = vpow2.f32 %v1973_v60 }
 0xa4f   : > { %4996 = vpow2.f32 %v1975_v62 }
 0xa54   : > { %v4995_v63 = vpop.eup %4994 }
 0xa55   : > { %v1983_v0 = vsel %vm938_vm5, %v4995_v63, 0.0  ;;  %v4997_v1 = vpop.eup %4996 }
 0xa56   : > { %1984 = vadd.xlane.f32.xlu2 %v1983_v0  ;;  %v1986_v2 = vsel %vm938_vm5, %v4997_v1, 0.0 }
 0xa5e   : > { %1987 = vadd.xlane.f32.xlu2 %v1986_v2  ;;  %v2013_v14 = vpop.trf.xlu0 }
 0xa61   : > { %v1725_v3 = vpop.permute.xlu1 %1724 }
 0xa69   : > { %v1728_v4 = vpop.permute.xlu1 %1727 }
 0xa6a   : > { %2061 = vxpose.xlu1.b32.start.end [1/1] (short) (narrow) %v1728_v4, 8 }
 0xa87   : > { %2029 = vxpose.xlu2.b32.start.end [1/1] (short) (narrow) %v1725_v3, 8 }
 0xa94   : > { %v1979_v6 = vpop.xlane.xlu1 %1978 }
 0xa95   : > { %4998 = vrcp.f32 %v1979_v6 }
 0xa9b   : > { %v4999_v7 = vpop.eup %4998 }
 0xa9c   : > { %v1993_v9 = vmul.f32 %v4999_v7, %v4991_v53  ;;  %v1982_v11 = vpop.xlane.xlu1 %1981 }
 0xa9d   : > { %5000 = vrcp.f32 %v1982_v11 }
 0xa9e   : > { %4755 = vmatpush.xpose.msk.msra.mxu2 %vm938_vm5, %v1993_v9 }
 0xaa1   : > { %4756 = vmatmul.msk.f32.vlgmr.msra.gmra.mxu2 %vm938_vm5, %v2013_v14 }
 0xaa3   : > { %v5001_v12 = vpop.eup %5000 }
 0xaa4   : > { %v1994_v13 = vmul.f32 %v5001_v12, %v4993_v55 }
 0xaa6   : > { %4757 = vmatpush.xpose.msk.msra.mxu3 %vm938_vm5, %v1994_v13 }
 0xaaf   : > { %v2109_v22 = vpop.trf.xlu0 }
 0xac9   : > { %v1985_v15 = vpop.xlane.xlu2 %1984 }
 0xaca   : > { %5002 = vrcp.f32 %v1985_v15 }
 0xad0   : > { %v5003_v16 = vpop.eup %5002 }
 0xad1   : > { %v1995_v17 = vmul.f32 %v5003_v16, %v4995_v63  ;;  %v1988_v19 = vpop.xlane.xlu2 %1987 }
 0xad2   : > { %5004 = vrcp.f32 %v1988_v19 }
 0xad3   : > { %4759 = vmatpush.xpose.msk.msra.mxu0 %vm938_vm5, %v1995_v17 }
 0xad8   : > { %v5005_v20 = vpop.eup %5004 }
 0xad9   : > { %v1996_v21 = vmul.f32 %v5005_v20, %v4997_v1 }
 0xadb   : > { %4761 = vmatpush.xpose.msk.msrb.mxu1 %vm938_vm5, %v1996_v21 }
 0xade   : > { %4762 = vmatmul.msk.f32.vlgmr.msrb.gmra.mxu1 %vm938_vm5, %v2109_v22 }
 0xb0e   : > { %v2077_v23 = vpop.trf.xlu1 }
 0xb0f   : > { %4760 = vmatmul.msk.f32.vlgmr.msra.gmra.mxu0 %vm938_vm5, %v2077_v23 }
 0xb20   : > { %v2045_v24 = vpop.trf.xlu2 }
 0xb21   : > { %4758 = vmatmul.msk.f32.vlgmr.msra.gmra.mxu3 %vm938_vm5, %v2045_v24 }
 0xb24   : > { %v2148_v25 = vpop.f32.mrf.mxu2 }
 0xb25   : > { %2229 = vxpose.xlu0.b32.start.end [1/1] (short) (narrow) %v2148_v25, 8 }
 0xb5b   : > { %v2226_v27 = vpop.f32.mrf.mxu1 }
 0xb8c   : > { %v2200_v26 = vpop.f32.mrf.mxu0 }
 0xb8d   : > { %2293 = vxpose.xlu2.b32.start.end [1/1] (short) (narrow) %v2200_v26, 8 }
 0xb95   : > { %2325 = vxpose.xlu2.b32.start.end [1/1] (short) (narrow) %v2226_v27, 8 }
 0xba4   : > { %v2174_v28 = vpop.f32.mrf.mxu3 }
 0xba5   : > { %2261 = vxpose.xlu0.b32.start.end [1/1] (short) (narrow) %v2174_v28, 8 }
 0xbc9   : > { %v2245_v31 = vpop.trf.xlu0 }
 0xbca   : > { %v2359_v32 = vrot.slane %v2245_v31, 4 }
 0xc26   : > { %v2309_v30 = vpop.trf.xlu2 }
 0xc27   : > { %v2357_v29 = vrot.slane %v2309_v30, 4  ;;  %v2360_v35 = vsel %vm1440_vm6, %v2309_v30, %v2359_v32 }
 0xc28   : > { %v2368_v38 = vperm.slane %v2360_v35, %v5474_v10 }
 0xc29   : > { %v2358_v34 = vsel %vm1440_vm6, %v2357_v29, %v2245_v31 }
 0xc2a   : > { %v2364_v41 = vperm.slane %v2358_v34, %v5474_v10  ;;  %v2395_v48 = vrot.slane %v2368_v38, 4 }
 0xc2c   : > { %v2383_v44 = vrot.slane %v2364_v41, 4 }
 0xc2e   : > { %v2341_v33 = vpop.trf.xlu2 }
 0xc2f   : > { %v2369_v37 = vrot.slane %v2341_v33, 4 }
 0xc49   : > { %v2277_v39 = vpop.trf.xlu0 }
 0xc4a   : > { %v2370_v40 = vsel %vm1440_vm6, %v2369_v37, %v2277_v39  ;;  %v2371_v43 = vrot.slane %v2277_v39, 4  ;;  %v1634_v39 = vld [vmem:[#allocation2 + $0x10] sm:$0xff] }
 0xc4b   : > { %v2376_v45 = vperm.slane %v2370_v40, %v5474_v10  ;;  %v1633_v40 = vld [vmem:[#allocation2 + $0x8] sm:$0xff] }
 0xc4c   : > { %v2372_v47 = vsel %vm1440_vm6, %v2341_v33, %v2371_v43  ;;  %v1632_v43 = vld [vmem:[#allocation2] sm:$0xff] }
 0xc4d   : > { %v2380_v49 = vperm.slane %v2372_v47, %v5474_v10  ;;  %v2381_v50 = vrot.slane %v2376_v45, 4  ;;  %v2384_v51 = vsel %vm1440_vm6, %v2376_v45, %v2383_v44 }
 0xc4e   : > { %v2392_v52 = vperm.slane %v2384_v51, %v5479_v18  ;;  %v2482_v51 = vperm.slane %v5570_v42, 3  ;;  %v2536_v42 = vld [vmem:[#allocation5 + $0x8] sm:$0xff] }
 0xc4f   : > { %v2382_v53 = vsel %vm1440_vm6, %v2381_v50, %v2364_v41  ;;  %v2393_v54 = vrot.slane %v2380_v49, 4  ;;  %v2396_v55 = vsel %vm1440_vm6, %v2380_v49, %v2395_v48 }
 0xc50   : > { %v2388_v56 = vperm.slane %v2382_v53, %v5479_v18  ;;  %v2404_v57 = vperm.slane %v2396_v55, %v5479_v18  ;;  %v2407_v58 = vrot.slane %v2392_v52, 4 }
 0xc51   : > { %v2394_v59 = vsel %vm1440_vm6, %v2393_v54, %v2368_v38  ;;  %v1635_v38 = vld [vmem:[#allocation2 + $0x18] sm:$0xff] }
 0xc52   : > { %v2400_v60 = vperm.slane %v2394_v59, %v5479_v18  ;;  %v2405_v61 = vrot.slane %v2388_v56, 4  ;;  %v2408_v62 = vsel %vm1440_vm6, 0.0, %v2407_v58  ;;  %v2411_v63 = vrot.slane %v2404_v57, 4  ;;  %2498 = vmatpush.msrb.mxu2 %v1635_v38 }
 0xc53   : > { %v2413_v0 = vsel %vm1440_vm6, %v2407_v58, %v2388_v56  ;;  %v2418_v1 = vrot.slane %v2408_v62, 4  ;;  %v2537_v62 = vld [vmem:[#allocation5 + $0x10] sm:$0xff] }
 0xc54   : > { %v2406_v2 = vsel %vm1440_vm6, 0.0, %v2405_v61  ;;  %v2409_v3 = vrot.slane %v2400_v60, 4  ;;  %v2412_v4 = vsel %vm1440_vm6, 0.0, %v2411_v63  ;;  %v2417_v6 = vperm.slane %v2413_v0, %v5474_v10  ;;  %2499 = vmatpush.msrb.mxu2 %v1634_v39  ;;  %v2538_v61 = vld [vmem:[#allocation5 + $0x18] sm:$0xff] }
 0xc55   : > { %v2429_v7 = vrot.slane %v2412_v4, 4  ;;  %v2419_v9 = vsel %vm1440_vm6, %v2418_v1, %v2406_v2  ;;  %v2424_v11 = vsel %vm1440_vm6, %v2411_v63, %v2400_v60  ;;  %2558 = vmatpush.msrb.mxu3 %v2538_v61  ;;  %v2535_v63 = vld [vmem:[#allocation5] sm:$0xff]  ;;  %v4775_v61 = vld [vmem:[%s6111_s5 + $0xa8] sm:$0xff] }
 0xc56   : > { %v2410_v12 = vsel %vm1440_vm6, 0.0, %v2409_v3  ;;  %v2423_v13 = vperm.slane %v2419_v9, %v5474_v10  ;;  %v2428_v14 = vperm.slane %v2424_v11, %v5474_v10  ;;  %v2437_v15 = vrot.slane %v2417_v6, 4  ;;  %2500 = vmatpush.msrb.mxu2 %v1633_v40  ;;  %v4965_v40 = vld [vmem:[%s6122_s16] ss:$0 sm:$0xff] }
 0xc57   : > { %v2430_v16 = vsel %vm1440_vm6, %v2429_v7, %v2410_v12  ;;  %2559 = vmatpush.msrb.mxu3 %v2537_v62  ;;  %v2507_v7 = vld [vmem:[%s6118_s12] sm:$0x3] }
 0xc58   : > { %v2434_v17 = vperm.slane %v2430_v16, %v5474_v10  ;;  %v2438_v19 = vsel %vm1440_vm6, %v2423_v13, %v2437_v15  ;;  %v2449_v20 = vrot.slane %v2428_v14, 4  ;;  %v2435_v21 = vrot.slane %v2423_v13, 4  ;;  %2501 = vmatpush.msrb.mxu2 %v1632_v43  ;;  %v4766_v62 = vld [vmem:[%s6111_s5 + $0x60] sm:$0xff] }
 0xc59   : > { %v2446_v22 = vperm.slane %v2438_v19, %v5479_v18  ;;  %2560 = vmatpush.msrb.mxu3 %v2536_v42  ;;  %v2530_v12 = vperm.slane %v2507_v7, 0  ;;  %v4770_v42 = vld [vmem:[%s6111_s5 + $0x80] sm:$0xff] }
 0xc5a   : > { %v2450_v23 = vsel %vm1440_vm6, %v2434_v17, %v2449_v20  ;;  %v2436_v24 = vsel %vm1440_vm6, %v2435_v21, %v2417_v6  ;;  %v2447_v25 = vrot.slane %v2434_v17, 4  ;;  %v2582_v20 = vld [vmem:[%s6121_s15 + $0x38] sm:$0xff]  ;;  %v2581_v21 = vld [vmem:[%s6121_s15 + $0x30] sm:$0xff] }
 0xc5b   : > { %v2458_v26 = vperm.slane %v2450_v23, %v5479_v18  ;;  %v2465_v27 = vrot.slane %v2446_v22, 4  ;;  %v2442_v28 = vperm.slane %v2436_v24, %v5479_v18  ;;  %2561 = vmatpush.msrb.mxu3 %v2535_v63  ;;  %2599 = vmatpush.msrb.mxu0 %v2582_v20  ;;  %v2579_v23 = vld [vmem:[%s6121_s15 + $0x20] sm:$0xff]  ;;  %v2578_v24 = vld [vmem:[%s6121_s15 + $0x18] sm:$0xff] }
 0xc5c   : > { %v2448_v30 = vsel %vm1440_vm6, %v2447_v25, %v2428_v14  ;;  %v2532_v14 = vperm.slane %v2507_v7, 1  ;;  %v2577_v25 = vld [vmem:[%s6121_s15 + $0x10] sm:$0xff]  ;;  %v4774_v63 = vld [vmem:[%s6111_s5 + $0xa0] sm:$0xff] }
 0xc5d   : > { %v2466_v31 = vsel %vm1440_vm6, %v2458_v26, %v2465_v27  ;;  %v2463_v29 = vrot.slane %v2458_v26, 4  ;;  %v2454_v32 = vperm.slane %v2448_v30, %v5479_v18  ;;  %v2461_v33 = vrot.slane %v2442_v28, 4  ;;  %2600 = vmatpush.msrb.mxu0 %v2581_v21  ;;  %v2576_v26 = vld [vmem:[%s6121_s15 + $0x8] sm:$0xff]  ;;  %v2575_v27 = vld [vmem:[%s6121_s15] sm:$0xff] }
 0xc5e   : > { %2476 = vrot.lane.b32.xlu1 %v2466_v31, %s6174_s29  ;;  %v2612_v7 = vld [vmem:[%s6123_s17] sm:$0x3]  ;;  %v5787_v20 = vld [vmem:[%s6113_s7 + $0x4] sm:$0xf] }
 0xc5f   : > { %v2464_v34 = vsel %vm1440_vm6, %v2463_v29, %v2446_v22  ;;  %v2459_v35 = vrot.slane %v2454_v32, 4  ;;  %v2462_v37 = vsel %vm1440_vm6, %v2454_v32, %v2461_v33  ;;  %v2580_v22 = vld [vmem:[%s6121_s15 + $0x28] sm:$0xff]  ;;  %v2660_v21 = vperm.slane %v5787_v20, 0 }
 0xc60   : > { %2472 = vrot.lane.b32.xlu0 %v2464_v34, %s6175_s21  ;;  %2468 = vrot.lane.b32.xlu2 %v2462_v37, %s6176_s19 }
 0xc61   : > { %v2460_v41 = vsel %vm1440_vm6, %v2459_v35, %v2442_v28  ;;  %2601 = vmatpush.msrb.mxu0 %v2580_v22  ;;  %v4964_v28 = vld [vmem:[%s6120_s14] ss:$0 sm:$0xff] }
 0xc63   : > { %2602 = vmatpush.msrb.mxu0 %v2579_v23 }
 0xc65   : > { %2603 = vmatpush.msrb.mxu0 %v2578_v24  ;;  %v2684_v24 = vperm.slane %v5787_v20, 1 }
 0xc67   : > { %2604 = vmatpush.msrb.mxu0 %v2577_v25 }
 0xc69   : > { %2605 = vmatpush.msrb.mxu0 %v2576_v26 }
 0xc6b   : > { %2606 = vmatpush.msrb.mxu0 %v2575_v27 }
 0xcba   : > { %v2469_v44 = vpop.permute.xlu2 %2468 }
 0xcbb   : > { %v2479_v45 = vsel %vm938_vm5, %v2460_v41, %v2469_v44 }
 0xcd0   : > { %v2477_v48 = vpop.permute.xlu1 %2476 }
 0xcd2   : > { %v2473_v47 = vpop.permute.xlu0 %2472 }
 0xcd3   : > { %v2480_v49 = vsel %vm1563_vm7, %v2479_v45, %v2473_v47 }
 0xcd4   : > { %v2481_v50 = vsel %vm1565_vm8, %v2480_v49, %v2477_v48 }
 0xcd5   : > { %4763 = vmatmul.msk.f32.vlgmr.msrb.gmra.mxu2 %vm666_vm0, %v2481_v50 }
 0xd58   : > { %v2503_v52 = vpop.f32.mrf.mxu2 }
 0xd59   : > { %v2504_v53 = vadd.f32 %v2503_v52, %v2482_v51 }
 0xd5b   : > { %v2506_v54 = vadd.f32 %v2504_v53, %v5597_v5  ;;  %v4769_v53 = vld [vmem:[%s6111_s5 + $0x78] sm:$0xff] }
 0xd5c   : > { %2676 = vmatpush.msra.mxu1 %v4769_v53 }
 0xd5d   : > { %v2508_v55 = vsel %vm666_vm0, %v2506_v54, 0.0 }
 0xd5e   : > { %2509 = vadd.xlane.f32.xlu2 %v2508_v55  ;;  %v4777_v55 = vld [vmem:[%s6111_s5 + $0xb8] sm:$0xff] }
 0xd5f   : > { %2718 = vmatpush.msra.mxu3 %v4777_v55 }
 0xdd1   : > { %v2510_v56 = vpop.xlane.xlu2 %2509 }
 0xdd2   : > { %v2511_v57 = vmul.f32 %v2510_v56, %v5377_v8  ;;  %v4768_v56 = vld [vmem:[%s6111_s5 + $0x70] sm:$0xff] }
 0xdd3   : > { %2677 = vmatpush.msra.mxu1 %v4768_v56 }
 0xdd4   : > { %v2512_v58 = vsub.f32 %v2506_v54, %v2511_v57  ;;  %v4773_v54 = vld [vmem:[%s6111_s5 + $0x98] sm:$0xff]  ;;  %v4772_v57 = vld [vmem:[%s6111_s5 + $0x90] sm:$0xff] }
 0xdd5   : > { %2697 = vmatpush.msra.mxu2 %v4773_v54 }
 0xdd6   : > { %v2513_v59 = vmul.f32 %v2512_v58, %v2512_v58 }
 0xdd7   : > { %2698 = vmatpush.msra.mxu2 %v4772_v57 }
 0xdd8   : > { %v2514_v60 = vsel %vm666_vm0, %v2513_v59, 0.0  ;;  %v4767_v59 = vld [vmem:[%s6111_s5 + $0x68] sm:$0xff] }
 0xdd9   : > { %2515 = vadd.xlane.f32.xlu0 %v2514_v60  ;;  %v4771_v60 = vld [vmem:[%s6111_s5 + $0x88] sm:$0xff]  ;;  %2678 = vmatpush.msra.mxu1 %v4767_v59 }
 0xdda   : > { %2699 = vmatpush.msra.mxu2 %v4771_v60 }
 0xddb   : > { %2679 = vmatpush.msra.mxu1 %v4766_v62 }
 0xddc   : > { %2700 = vmatpush.msra.mxu2 %v4770_v42 }
 0xe4c   : > { %v2516_v5 = vpop.xlane.xlu0 %2515 }
 0xe4d   : > { %v2517_v0 = vmul.f32 %v2516_v5, %v5377_v8 }
 0xe4f   : > { %v2518_v1 = vadd.f32 1e-12, %v2517_v0 }
 0xe51   : > { %5006 = vrsqrt.f32 %v2518_v1  ;;  %vm2525_vm13 = vweird.f32 %v2518_v1 }
 0xe57   : > { %v5007_v2 = vpop.eup %5006 }
 0xe58   : > { %v2520_v3 = vmul.f32 %v5007_v2, %v2518_v1  ;;  %vm2526_vm12 = vweird.f32 %v5007_v2 }
 0xe59   : > { %vm2527_vm14 = vmor %vm2525_vm13, %vm2526_vm12 }
 0xe5a   : > { %v2521_v4 = vmul.f32 %v5007_v2, %v2520_v3 }
 0xe5c   : > { %v2522_v6 = vmul.f32 0.5, %v2521_v4 }
 0xe5e   : > { %v2523_v9 = vsub.f32 1.5, %v2522_v6 }
 0xe60   : > { %v2524_v11 = vmul.f32 %v5007_v2, %v2523_v9 }
 0xe62   : > { %v2528_v13 = vsel %vm2527_vm14, %v5007_v2, %v2524_v11 }
 0xe63   : > { %v2529_v15 = vmul.f32 %v2528_v13, %v2512_v58  ;;  %v4776_v58 = vld [vmem:[%s6111_s5 + $0xb0] sm:$0xff] }
 0xe64   : > { %2719 = vmatpush.msra.mxu3 %v4776_v58 }
 0xe65   : > { %v2531_v16 = vmul.f32 %v2530_v12, %v2529_v15  ;;  %v2635_v12 = vperm.slane %v2612_v7, 0 }
 0xe66   : > { %2720 = vmatpush.msra.mxu3 %v4775_v61 }
 0xe67   : > { %v2533_v17 = vadd.f32 %v2532_v14, %v2531_v16  ;;  %v2637_v14 = vperm.slane %v2612_v7, 1 }
 0xe68   : > { %2721 = vmatpush.msra.mxu3 %v4774_v63 }
 0xe69   : > { %v2534_v19 = vmul.f32 %v2533_v17, %v5578_v46 }
 0xe6b   : > { %4764 = vmatmul.msk.f32.vlgmr.msrb.gmra.mxu3 %vm666_vm0, %v2534_v19 }
 0xeee   : > { %v2563_v30 = vpop.f32.mrf.mxu3 }
 0xeef   : > { %v2564_v31 = vadd.f32 %v4964_v28, %v2563_v30 }
 0xef1   : > { %v2566_v29 = vmul.f32 %v2564_v31, %v2564_v31 }
 0xef3   : > { %v2567_v32 = vmul.f32 %v2566_v29, %v2564_v31 }
 0xef5   : > { %v2568_v33 = vmul.f32 0.044715, %v2567_v32 }
 0xef7   : > { %v2569_v34 = vadd.f32 %v2568_v33, %v2564_v31 }
 0xef9   : > { %v2570_v35 = vmul.f32 0.7978846, %v2569_v34 }
 0xefb   : > { %5008 = vtanh.f32 %v2570_v35 }
 0xf01   : > { %v5009_v37 = vpop.eup %5008 }
 0xf02   : > { %v2572_v41 = vadd.f32 1.0, %v5009_v37 }
 0xf04   : > { %v2573_v38 = vmul.f32 0.5, %v2572_v41 }
 0xf06   : > { %v2574_v39 = vmul.f32 %v2573_v38, %v2564_v31 }
 0xf08   : > { %4765 = vmatmul.msk.f32.vlgmr.msrb.gmra.mxu0 %vm2587_vm15, %v2574_v39 }
 0xf85   : > { %v2608_v43 = vpop.f32.mrf.mxu0 }
 0xf86   : > { %v2609_v44 = vadd.f32 %v4965_v40, %v2608_v43 }
 0xf88   : > { %v2611_v45 = vadd.f32 %v2609_v44, %v2534_v19 }
 0xf8a   : > { %v2613_v47 = vsel %vm666_vm0, %v2611_v45, 0.0 }
 0xf8b   : > { %2614 = vadd.xlane.f32.xlu1 %v2613_v47 }
 0xffe   : > { %v2615_v48 = vpop.xlane.xlu1 %2614 }
 0xfff   : > { %v2616_v49 = vmul.f32 %v2615_v48, %v5377_v8 }
0x1001   : > { %v2617_v50 = vsub.f32 %v2611_v45, %v2616_v49  ;;  %v5052_v45 = vld [vmem:[%s5450_s26] sm:$0xff]  ;;  %s5128_s26 = sshra.s32 %s4602_s13, 4  ;;  %s5129_s26 = int_to_ptr.hbm [resolvable:$true] %s5128_s26 }
0x1002   : > { %p5135_p3 = scmp.lt.s32.totalorder %s5129_s26, %s6177_s4 }
0x1003   : > { %v2618_v51 = vmul.f32 %v2617_v50, %v2617_v50 }
0x1005   : > { %v2619_v52 = vsel %vm666_vm0, %v2618_v51, 0.0  ;;  %v2705_v51 = vperm.slane %v5787_v20, 2 }
0x1006   : > { %2620 = vadd.xlane.f32.xlu2 %v2619_v52 }
0x1079   : > { %v2621_v5 = vpop.xlane.xlu2 %2620 }
0x107a   : > { %v2622_v0 = vmul.f32 %v2621_v5, %v5377_v8 }
0x107c   : > { %v2623_v1 = vadd.f32 1e-12, %v2622_v0 }
0x107e   : > { %5010 = vrsqrt.f32 %v2623_v1  ;;  %vm2630_vm2 = vweird.f32 %v2623_v1 }
0x1084   : > { %v5011_v2 = vpop.eup %5010 }
0x1085   : > { %v2625_v3 = vmul.f32 %v5011_v2, %v2623_v1  ;;  %vm2631_vm1 = vweird.f32 %v5011_v2 }
0x1086   : > { %vm2632_vm3 = vmor %vm2630_vm2, %vm2631_vm1 }
0x1087   : > { %v2626_v4 = vmul.f32 %v5011_v2, %v2625_v3 }
0x1089   : > { %v2627_v6 = vmul.f32 0.5, %v2626_v4 }
0x108b   : > { %v2628_v9 = vsub.f32 1.5, %v2627_v6 }
0x108d   : > { %v2629_v11 = vmul.f32 %v5011_v2, %v2628_v9 }
0x108f   : > { %v2633_v13 = vsel %vm2632_vm3, %v5011_v2, %v2629_v11 }
0x1090   : > { %v2634_v15 = vmul.f32 %v2633_v13, %v2617_v50 }
0x1092   : > { %v2636_v16 = vmul.f32 %v2635_v12, %v2634_v15 }
0x1094   : > { %v2638_v17 = vadd.f32 %v2637_v14, %v2636_v16 }
0x1096   : > { %v5776_v19 = vmul.f32 %v2638_v17, %v5578_v46 }
0x1098   : > { %4783 = vmatmul.msk.f32.vlgmr.msra.gmra.mxu1 %vm666_vm0, %v5776_v19  ;;  %4784 = vmatmul.msk.f32.vlgmr.msra.gmra.mxu2 %vm666_vm0, %v5776_v19 }
0x1099   : > { %4785 = vmatmul.msk.f32.vlgmr.msra.gmra.mxu3 %vm666_vm0, %v5776_v19 }
0x1115   : > { %v2681_v22 = vpop.f32.mrf.mxu1 }
0x1116   : > { %v2682_v23 = vadd.f32 %v2681_v22, %v2660_v21 }
0x1118   : > { %2727 = vrot.lane.b32.xlu1 %v2682_v23, %s6171_s25  ;;  %2729 = vrot.lane.b32.xlu0 %v2682_v23, %s6172_s22 }
0x111b   : > { %v2702_v25 = vpop.f32.mrf.mxu2 }
0x111c   : > { %v2703_v26 = vadd.f32 %v2702_v25, %v2684_v24  ;;  %v2723_v52 = vpop.f32.mrf.mxu3 }
0x111d   : > { %v2724_v53 = vadd.f32 %v2723_v52, %v2705_v51 }
0x111e   : > { %2740 = vrot.lane.b32.xlu2 %v2703_v26, %s6173_s27 }
0x1120   : > { %2734 = vrot.lane.b32.xlu1 %v2703_v26, %s6171_s25  ;;  %2737 = vrot.lane.b32.xlu0 %v2703_v26, %s6172_s22 }
0x1126   : > { %2731 = vrot.lane.b32.xlu2 %v2682_v23, %s6173_s27 }
0x1178   : > { %v2741_v27 = vpop.permute.xlu2 %2740 }
0x1179   : > { %v4949_v28 = vpack.i.bf16 %v2741_v27, %v2703_v26 }
0x117b   : > { %4950 = vxpose.xlu2.b32.start.end [1/1] (short) (narrow) %v4949_v28, 8 }
0x1180   : > { %v2732_v33 = vpop.permute.xlu2 %2731 }
0x118a   : > { %v2728_v30 = vpop.permute.xlu1 %2727  ;;  %v2730_v31 = vpop.permute.xlu0 %2729 }
0x1192   : > { %v2735_v29 = vpop.permute.xlu1 %2734  ;;  %v2738_v32 = vpop.permute.xlu0 %2737 }
0x1193   : > { %2785 = vxpose.xlu1.b32.start.end [1/1] (short) (narrow) %v2735_v29, 8  ;;  %2817 = vxpose.xlu0.b32.start.end [1/1] (short) (narrow) %v2738_v32, 8 }
0x1214   : > { %v4951_v34 = vpop.trf.xlu2 }
0x1215   : > { %v4955_v35 = vunpack.i.h.bf16 %v4951_v34  ;;  %v4952_v37 = vunpack.i.l.bf16 %v4951_v34 }
0x1217   : > { %2898 = vmatpush.msrb.mxu1 %v4952_v37  ;;  %2964 = vmatpush.msra.mxu0 %v4955_v35 }
0x1218   : > { %4786 = vmatmul.msk.f32.vlgmr.msrb.gmra.mxu1 %vm938_vm5, %v2682_v23  ;;  %4789 = vmatmul.msk.f32.vlgmr.msra.gmra.mxu0 %vm938_vm5, %v2732_v33 }
0x1237   : > { %v2801_v41 = vpop.trf.xlu1  ;;  %v2833_v38 = vpop.trf.xlu0 }
0x1238   : > { %2920 = vmatpush.msrb.mxu2 %v2801_v41  ;;  %2942 = vmatpush.msrb.mxu3 %v2833_v38 }
0x1239   : > { %4787 = vmatmul.msk.f32.vlgmr.msrb.gmra.mxu2 %vm938_vm5, %v2728_v30  ;;  %4788 = vmatmul.msk.f32.vlgmr.msrb.gmra.mxu3 %vm938_vm5, %v2730_v31 }
0x1295   : > { %v2900_v39 = vpop.f32.mrf.mxu1  ;;  %v2966_v40 = vpop.f32.mrf.mxu0 }
0x1296   : > { %v2969_v43 = vmul.f32 0.35355338, %v2900_v39  ;;  %v2972_v44 = vmul.f32 0.35355338, %v2966_v40 }
0x1298   : > { %v2973_v47 = vadd.f32 %v5052_v45, %v2969_v43  ;;  %v2976_v48 = vadd.f32 %v5052_v45, %v2972_v44 }
0x129a   : > { %v2977_v49 = vsel %vm938_vm5, %v2973_v47, -inf  ;;  %v2986_v50 = vsel %vm938_vm5, %v2976_v48, -inf }
0x129b   : > { %2978 = vmax.xlane.f32.xlu1 %v2977_v49  ;;  %2987 = vmax.xlane.f32.xlu0 %v2986_v50 }
0x12b4   : > { %2747 = vrot.lane.b32.xlu1 %v2724_v53, %s6172_s22 }
0x12bc   : > { %v2922_v54 = vpop.f32.mrf.mxu2  ;;  %v2944_v55 = vpop.f32.mrf.mxu3 }
0x12bd   : > { %v2970_v56 = vmul.f32 0.35355338, %v2922_v54  ;;  %v2971_v57 = vmul.f32 0.35355338, %v2944_v55 }
0x12bf   : > { %v2974_v58 = vadd.f32 %v5052_v45, %v2970_v56  ;;  %v2975_v59 = vadd.f32 %v5052_v45, %v2971_v57 }
0x12c1   : > { %v2980_v60 = vsel %vm938_vm5, %v2974_v58, -inf  ;;  %v2983_v61 = vsel %vm938_vm5, %v2975_v59, -inf }
0x12c2   : > { %2981 = vmax.xlane.f32.xlu2 %v2980_v60  ;;  %2984 = vmax.xlane.f32.xlu0 %v2983_v61 }
0x12da   : > { %2744 = vrot.lane.b32.xlu2 %v2724_v53, %s6171_s25 }
0x130e   : > { %v2979_v62 = vpop.xlane.xlu1 %2978  ;;  %v2988_v42 = vpop.xlane.xlu0 %2987 }
0x130f   : > { %v2989_v63 = vsub.f32 %v2973_v47, %v2979_v62  ;;  %v2992_v5 = vsub.f32 %v2976_v48, %v2988_v42 }
0x1311   : > { %v2993_v0 = vmul.f32 1.442695, %v2989_v63  ;;  %v2999_v1 = vmul.f32 1.442695, %v2992_v5 }
0x1313   : > { %5012 = vpow2.f32 %v2993_v0 }
0x1314   : > { %5014 = vpow2.f32 %v2999_v1 }
0x1319   : > { %v5013_v2 = vpop.eup %5012 }
0x131a   : > { %v5015_v3 = vpop.eup %5014  ;;  %v3001_v4 = vsel %vm938_vm5, %v5013_v2, 0.0 }
0x131b   : > { %3002 = vadd.xlane.f32.xlu1 %v3001_v4  ;;  %v3010_v6 = vsel %vm938_vm5, %v5015_v3, 0.0 }
0x131c   : > { %3011 = vadd.xlane.f32.xlu2 %v3010_v6 }
0x1326   : > { %v2748_v7 = vpop.permute.xlu1 %2747 }
0x1327   : > { %3085 = vxpose.xlu0.b32.start.end [1/1] (short) (narrow) %v2748_v7, 8 }
0x1335   : > { %v2982_v9 = vpop.xlane.xlu2 %2981  ;;  %v2985_v21 = vpop.xlane.xlu0 %2984 }
0x1336   : > { %v2991_v22 = vsub.f32 %v2975_v59, %v2985_v21  ;;  %v2990_v24 = vsub.f32 %v2974_v58, %v2982_v9 }
0x1338   : > { %v2997_v23 = vmul.f32 1.442695, %v2991_v22  ;;  %v2995_v25 = vmul.f32 1.442695, %v2990_v24 }
0x133d   : > { %v2745_v11 = vpop.permute.xlu2 %2744 }
0x1345   : > { %3021 = vxpose.xlu2.b32.start.end [1/1] (short) (narrow) %v2724_v53, 8 }
0x1355   : > { %3053 = vxpose.xlu1.b32.start.end [1/1] (short) (narrow) %v2745_v11, 8 }
0x138e   : > { %v3003_v12 = vpop.xlane.xlu1 %3002 }
0x138f   : > { %5016 = vrcp.f32 %v3003_v12  ;;  %v3012_v13 = vpop.xlane.xlu2 %3011 }
0x1390   : > { %5018 = vrcp.f32 %v3012_v13 }
0x1391   : > { %5020 = vpow2.f32 %v2997_v23 }
0x1392   : > { %5022 = vpow2.f32 %v2995_v25 }
0x1395   : > { %v5017_v14 = vpop.eup %5016  ;;  %2750 = vrot.lane.b32.xlu0 %v2724_v53, %s6173_s27 }
0x1396   : > { %v5019_v15 = vpop.eup %5018  ;;  %v3017_v16 = vmul.f32 %v5017_v14, %v5013_v2 }
0x1397   : > { %v3020_v17 = vmul.f32 %v5019_v15, %v5015_v3  ;;  %v5021_v26 = vpop.eup %5020 }
0x1398   : > { %4790 = vmatpush.xpose.msk.msra.mxu1 %vm938_vm5, %v3017_v16  ;;  %v3007_v27 = vsel %vm938_vm5, %v5021_v26, 0.0  ;;  %v5023_v28 = vpop.eup %5022 }
0x1399   : > { %4796 = vmatpush.xpose.msk.msrb.mxu0 %vm938_vm5, %v3020_v17  ;;  %v3004_v30 = vsel %vm938_vm5, %v5023_v28, 0.0 }
0x13bf   : > { %3008 = vadd.xlane.f32.xlu0 %v3007_v27 }
0x13c7   : > { %3005 = vadd.xlane.f32.xlu0 %v3004_v30 }
0x13cb   : > { %v3101_v31 = vpop.trf.xlu0 }
0x13de   : > { %v3037_v32 = vpop.trf.xlu2 }
0x13df   : > { %4791 = vmatmul.msk.f32.vlgmr.msra.gmra.mxu1 %vm938_vm5, %v3037_v32 }
0x13f9   : > { %v3069_v39 = vpop.trf.xlu1 }
0x1407   : > { %v2751_v29 = vpop.permute.xlu0 %2750 }
0x1408   : > { %3117 = vxpose.xlu0.b32.start.end [1/1] (short) (narrow) %v2751_v29, 8 }
0x1432   : > { %v3009_v33 = vpop.xlane.xlu0 %3008 }
0x1433   : > { %5024 = vrcp.f32 %v3009_v33 }
0x1439   : > { %v5025_v34 = vpop.eup %5024 }
0x143a   : > { %v3019_v35 = vmul.f32 %v5025_v34, %v5021_v26  ;;  %v3006_v37 = vpop.xlane.xlu0 %3005 }
0x143b   : > { %5026 = vrcp.f32 %v3006_v37 }
0x143c   : > { %4794 = vmatpush.xpose.msk.msra.mxu3 %vm938_vm5, %v3019_v35 }
0x143f   : > { %4795 = vmatmul.msk.f32.vlgmr.msra.gmra.mxu3 %vm938_vm5, %v3101_v31 }
0x1441   : > { %v5027_v41 = vpop.eup %5026 }
0x1442   : > { %v3018_v38 = vmul.f32 %v5027_v41, %v5023_v28 }
0x1444   : > { %4792 = vmatpush.xpose.msk.msra.mxu2 %vm938_vm5, %v3018_v38 }
0x1447   : > { %4793 = vmatmul.msk.f32.vlgmr.msra.gmra.mxu2 %vm938_vm5, %v3069_v39 }
0x145c   : > { %v3172_v40 = vpop.f32.mrf.mxu1 }
0x145d   : > { %3253 = vxpose.xlu0.b32.start.end [1/1] (short) (narrow) %v3172_v40, 8 }
0x14ac   : > { %v3133_v43 = vpop.trf.xlu0 }
0x14ad   : > { %4797 = vmatmul.msk.f32.vlgmr.msrb.gmra.mxu0 %vm938_vm5, %v3133_v43 }
0x14c2   : > { %v3224_v45 = vpop.f32.mrf.mxu3 }
0x14ca   : > { %v3198_v47 = vpop.f32.mrf.mxu2 }
0x1501   : > { %v3269_v48 = vpop.trf.xlu0 }
0x1502   : > { %v3383_v52 = vrot.slane %v3269_v48, 4 }
0x152a   : > { %v3250_v44 = vpop.f32.mrf.mxu0 }
0x152b   : > { %3349 = vxpose.xlu0.b32.start.end [1/1] (short) (narrow) %v3250_v44, 8 }
0x1533   : > { %3317 = vxpose.xlu0.b32.start.end [1/1] (short) (narrow) %v3224_v45, 8 }
0x153b   : > { %3285 = vxpose.xlu0.b32.start.end [1/1] (short) (narrow) %v3198_v47, 8 }
0x15cf   : > { %v3365_v49 = vpop.trf.xlu0 }
0x15d0   : > { %v3393_v56 = vrot.slane %v3365_v49, 4 }
0x15d7   : > { %v3333_v50 = vpop.trf.xlu0 }
0x15d8   : > { %v3381_v51 = vrot.slane %v3333_v50, 4  ;;  %v3384_v54 = vsel %vm1440_vm6, %v3333_v50, %v3383_v52 }
0x15d9   : > { %v3392_v57 = vperm.slane %v3384_v54, %v5474_v10 }
0x15da   : > { %v3382_v53 = vsel %vm1440_vm6, %v3381_v51, %v3269_v48 }
0x15db   : > { %v3388_v55 = vperm.slane %v3382_v53, %v5474_v10  ;;  %v3419_v63 = vrot.slane %v3392_v57, 4 }
0x15dd   : > { %v3407_v61 = vrot.slane %v3388_v55, 4 }
0x15df   : > { %v3301_v58 = vpop.trf.xlu0 }
0x15e0   : > { %v3394_v59 = vsel %vm1440_vm6, %v3393_v56, %v3301_v58  ;;  %v3395_v60 = vrot.slane %v3301_v58, 4  ;;  %v4780_v58 = vld [vmem:[%s6112_s6 + $0x30] sm:$0xff] }
0x15e1   : > { %v3400_v62 = vperm.slane %v3394_v59, %v5474_v10  ;;  %v4779_v59 = vld [vmem:[%s6112_s6 + $0x28] sm:$0xff] }
0x15e2   : > { %v3396_v42 = vsel %vm1440_vm6, %v3365_v49, %v3395_v60  ;;  %v4778_v60 = vld [vmem:[%s6112_s6 + $0x20] sm:$0xff] }
0x15e3   : > { %v3404_v5 = vperm.slane %v3396_v42, %v5474_v10  ;;  %v3405_v0 = vrot.slane %v3400_v62, 4  ;;  %v3408_v1 = vsel %vm1440_vm6, %v3400_v62, %v3407_v61 }
0x15e4   : > { %v3416_v2 = vperm.slane %v3408_v1, %v5479_v18  ;;  %v4807_v1 = vld [vmem:[%s6115_s9 + $0x98] sm:$0xff] }
0x15e5   : > { %v3406_v3 = vsel %vm1440_vm6, %v3405_v0, %v3388_v55  ;;  %v3417_v4 = vrot.slane %v3404_v5, 4  ;;  %v3420_v6 = vsel %vm1440_vm6, %v3404_v5, %v3419_v63  ;;  %3617 = vmatpush.msrb.mxu3 %v4807_v1 }
0x15e6   : > { %v3412_v7 = vperm.slane %v3406_v3, %v5479_v18  ;;  %v3428_v9 = vperm.slane %v3420_v6, %v5479_v18  ;;  %v3431_v11 = vrot.slane %v3416_v2, 4  ;;  %v4806_v2 = vld [vmem:[%s6115_s9 + $0x90] sm:$0xff]  ;;  %v4805_v3 = vld [vmem:[%s6115_s9 + $0x88] sm:$0xff]  ;;  %v5894_v6 = vld [vmem:[%s5549_s30] sm:$0xff] }
0x15e7   : > { %v3418_v12 = vsel %vm1440_vm6, %v3417_v4, %v3392_v57  ;;  %v4781_v57 = vld [vmem:[%s6112_s6 + $0x38] sm:$0xff]  ;;  %3618 = vmatpush.msrb.mxu3 %v4806_v2  ;;  %v4804_v4 = vld [vmem:[%s6115_s9 + $0x80] sm:$0xff] }
0x15e8   : > { %v3424_v13 = vperm.slane %v3418_v12, %v5479_v18  ;;  %v3429_v14 = vrot.slane %v3412_v7, 4  ;;  %v3432_v15 = vsel %vm1440_vm6, 0.0, %v3431_v11  ;;  %v3435_v16 = vrot.slane %v3428_v9, 4  ;;  %3522 = vmatpush.msrb.mxu1 %v4781_v57  ;;  %v4810_v57 = vld [vmem:[%s6115_s9 + $0xb0] sm:$0xff] }
0x15e9   : > { %v3437_v17 = vsel %vm1440_vm6, %v3431_v11, %v3412_v7  ;;  %v3442_v21 = vrot.slane %v3432_v15, 4  ;;  %3619 = vmatpush.msrb.mxu3 %v4805_v3  ;;  %v3506_v7 = vperm.slane %v5787_v20, 3 }
0x15ea   : > { %v3430_v22 = vsel %vm1440_vm6, 0.0, %v3429_v14  ;;  %v3433_v23 = vrot.slane %v3424_v13, 4  ;;  %v3436_v24 = vsel %vm1440_vm6, 0.0, %v3435_v16  ;;  %v3441_v25 = vperm.slane %v3437_v17, %v5474_v10  ;;  %3523 = vmatpush.msrb.mxu1 %v4780_v58  ;;  %v5904_v14 = vld [vmem:[%s6117_s11 + $0x4] sm:$0xf]  ;;  %v4809_v58 = vld [vmem:[%s6115_s9 + $0xa8] sm:$0xff] }
0x15eb   : > { %v3453_v26 = vrot.slane %v3436_v24, 4  ;;  %v3443_v27 = vsel %vm1440_vm6, %v3442_v21, %v3430_v22  ;;  %v3448_v28 = vsel %vm1440_vm6, %v3435_v16, %v3424_v13  ;;  %3620 = vmatpush.msrb.mxu3 %v4804_v4  ;;  %v3604_v15 = vperm.slane %v5904_v14, 1  ;;  %v4803_v24 = vld [vmem:[%s6115_s9 + $0x78] sm:$0xff] }
0x15ec   : > { %v3434_v30 = vsel %vm1440_vm6, 0.0, %v3433_v23  ;;  %v3447_v31 = vperm.slane %v3443_v27, %v5474_v10  ;;  %v3452_v29 = vperm.slane %v3448_v28, %v5474_v10  ;;  %v3461_v32 = vrot.slane %v3441_v25, 4  ;;  %3524 = vmatpush.msrb.mxu1 %v4779_v59  ;;  %4814 = vmatmul.msk.f32.vlgmr.msrb.gmra.mxu3 %vm666_vm0, %v5894_v6  ;;  %v4800_v27 = vld [vmem:[%s6115_s9 + $0x60] sm:$0xff] }
0x15ed   : > { %v3454_v33 = vsel %vm1440_vm6, %v3453_v26, %v3434_v30  ;;  %3596 = vmatpush.msrb.mxu2 %v4803_v24  ;;  %v4801_v26 = vld [vmem:[%s6115_s9 + $0x68] sm:$0xff]  ;;  %v4808_v59 = vld [vmem:[%s6115_s9 + $0xa0] sm:$0xff]  ;;  %v3625_v1 = vperm.slane %v5904_v14, 2 }
0x15ee   : > { %v3458_v34 = vperm.slane %v3454_v33, %v5474_v10  ;;  %v3462_v35 = vsel %vm1440_vm6, %v3447_v31, %v3461_v32  ;;  %v3473_v37 = vrot.slane %v3452_v29, 4  ;;  %v3459_v41 = vrot.slane %v3447_v31, 4  ;;  %3525 = vmatpush.msrb.mxu1 %v4778_v60 }
0x15ef   : > { %v3470_v38 = vperm.slane %v3462_v35, %v5479_v18 }
0x15f0   : > { %v3474_v39 = vsel %vm1440_vm6, %v3458_v34, %v3473_v37  ;;  %v3460_v40 = vsel %vm1440_vm6, %v3459_v41, %v3441_v25  ;;  %v3471_v43 = vrot.slane %v3458_v34, 4  ;;  %v4802_v25 = vld [vmem:[%s6115_s9 + $0x70] sm:$0xff]  ;;  %v4799_v37 = vld [vmem:[%s6114_s8 + $0x2] sm:$0x3] }
0x15f1   : > { %v3482_v44 = vperm.slane %v3474_v39, %v5479_v18  ;;  %v3489_v45 = vrot.slane %v3470_v38, 4  ;;  %v3466_v47 = vperm.slane %v3460_v40, %v5479_v18  ;;  %3597 = vmatpush.msrb.mxu2 %v4802_v25  ;;  %v3555_v39 = vperm.slane %v4799_v37, 0 }
0x15f2   : > { %v3472_v48 = vsel %vm1440_vm6, %v3471_v43, %v3452_v29  ;;  %v3557_v43 = vperm.slane %v4799_v37, 1 }
0x15f3   : > { %v3490_v49 = vsel %vm1440_vm6, %v3482_v44, %v3489_v45  ;;  %v3487_v50 = vrot.slane %v3482_v44, 4  ;;  %v3478_v51 = vperm.slane %v3472_v48, %v5479_v18  ;;  %v3485_v52 = vrot.slane %v3466_v47, 4  ;;  %3598 = vmatpush.msrb.mxu2 %v4801_v26 }
0x15f4   : > { %3500 = vrot.lane.b32.xlu1 %v3490_v49, %s6174_s29  ;;  %v3580_v49 = vperm.slane %v5904_v14, 0 }
0x15f5   : > { %v3488_v53 = vsel %vm1440_vm6, %v3487_v50, %v3470_v38  ;;  %v3483_v54 = vrot.slane %v3478_v51, 4  ;;  %v3486_v55 = vsel %vm1440_vm6, %v3478_v51, %v3485_v52  ;;  %3599 = vmatpush.msrb.mxu2 %v4800_v27 }
0x15f6   : > { %3496 = vrot.lane.b32.xlu0 %v3488_v53, %s6175_s21  ;;  %3492 = vrot.lane.b32.xlu2 %v3486_v55, %s6176_s19 }
0x15f7   : > { %v3484_v56 = vsel %vm1440_vm6, %v3483_v54, %v3466_v47 }
0x1650   : > { %v3493_v61 = vpop.permute.xlu2 %3492 }
0x1651   : > { %v3503_v62 = vsel %vm938_vm5, %v3484_v56, %v3493_v61  ;;  %v4811_v56 = vld [vmem:[%s6115_s9 + $0xb8] sm:$0xff] }
0x1652   : > { %3638 = vmatpush.msra.mxu0 %v4811_v56 }
0x1654   : > { %3639 = vmatpush.msra.mxu0 %v4810_v57 }
0x1656   : > { %3640 = vmatpush.msra.mxu0 %v4809_v58 }
0x1658   : > { %3641 = vmatpush.msra.mxu0 %v4808_v59 }
0x1659   : > { %4815 = vmatmul.msk.f32.vlgmr.msra.gmra.mxu0 %vm666_vm0, %v5894_v6 }
0x1666   : > { %v3501_v63 = vpop.permute.xlu1 %3500 }
0x1668   : > { %v3497_v42 = vpop.permute.xlu0 %3496 }
0x1669   : > { %v3504_v5 = vsel %vm1563_vm7, %v3503_v62, %v3497_v42 }
0x166a   : > { %v3505_v0 = vsel %vm1565_vm8, %v3504_v5, %v3501_v63 }
0x166b   : > { %4798 = vmatmul.msk.f32.vlgmr.msrb.gmra.mxu1 %vm666_vm0, %v3505_v0 }
0x166f   : > { %v3622_v16 = vpop.f32.mrf.mxu3 }
0x1670   : > { %v3623_v17 = vadd.f32 %v3622_v16, %v3604_v15 }
0x1672   : > { %3657 = vrot.lane.b32.xlu0 %v3623_v17, %s6172_s22 }
0x167a   : > { %3654 = vrot.lane.b32.xlu0 %v3623_v17, %s6171_s25 }
0x1682   : > { %3660 = vrot.lane.b32.xlu0 %v3623_v17, %s6173_s27 }
0x16d6   : > { %v3643_v2 = vpop.f32.mrf.mxu0 }
0x16d7   : > { %v3644_v3 = vadd.f32 %v3643_v2, %v3625_v1 }
0x16e4   : > { %v3658_v28 = vpop.permute.xlu0 %3657 }
0x16e8   : > { %v3527_v9 = vpop.f32.mrf.mxu1 }
0x16e9   : > { %v3528_v11 = vadd.f32 %v3527_v9, %v3506_v7 }
0x16eb   : > { %v3530_v12 = vadd.f32 %v3528_v11, %v5776_v19 }
0x16ec   : > { %v3655_v52 = vpop.permute.xlu0 %3654 }
0x16ed   : > { %v3533_v13 = vsel %vm666_vm0, %v3530_v12, 0.0 }
0x16ee   : > { %3534 = vadd.xlane.f32.xlu2 %v3533_v13 }
0x16f4   : > { %v3661_v53 = vpop.permute.xlu0 %3660 }
0x16f5   : > { %v4956_v54 = vpack.i.bf16 %v3661_v53, %v3623_v17 }
0x1761   : > { %v3535_v21 = vpop.xlane.xlu2 %3534 }
0x1762   : > { %v3536_v20 = vmul.f32 %v3535_v21, %v5377_v8 }
0x1764   : > { %v3537_v22 = vsub.f32 %v3530_v12, %v3536_v20 }
0x1766   : > { %v3538_v19 = vmul.f32 %v3537_v22, %v3537_v22 }
0x1768   : > { %v3539_v23 = vsel %vm666_vm0, %v3538_v19, 0.0 }
0x1769   : > { %3540 = vadd.xlane.f32.xlu1 %v3539_v23 }
0x17a3   : > { %3737 = vxpose.xlu1.b32.start.end [1/1] (short) (narrow) %v3658_v28, 8 }
0x17dc   : > { %v3541_v30 = vpop.xlane.xlu1 %3540 }
0x17dd   : > { %v3542_v31 = vmul.f32 %v3541_v30, %v5377_v8 }
0x17df   : > { %v3543_v29 = vadd.f32 1e-12, %v3542_v31 }
0x17e1   : > { %5028 = vrsqrt.f32 %v3543_v29  ;;  %vm3550_vm9 = vweird.f32 %v3543_v29 }
0x17e7   : > { %v5029_v32 = vpop.eup %5028 }
0x17e8   : > { %v3545_v33 = vmul.f32 %v5029_v32, %v3543_v29  ;;  %vm3551_vm4 = vweird.f32 %v5029_v32 }
0x17e9   : > { %vm3552_vm10 = vmor %vm3550_vm9, %vm3551_vm4 }
0x17ea   : > { %v3546_v34 = vmul.f32 %v5029_v32, %v3545_v33 }
0x17ec   : > { %v3547_v35 = vmul.f32 0.5, %v3546_v34 }
0x17ee   : > { %v3548_v41 = vsub.f32 1.5, %v3547_v35 }
0x17f0   : > { %v3549_v38 = vmul.f32 %v5029_v32, %v3548_v41 }
0x17f2   : > { %v3553_v40 = vsel %vm3552_vm10, %v5029_v32, %v3549_v38 }
0x17f3   : > { %v3554_v44 = vmul.f32 %v3553_v40, %v3537_v22 }
0x17f5   : > { %v3556_v45 = vmul.f32 %v3555_v39, %v3554_v44 }
0x17f7   : > { %v3558_v47 = vadd.f32 %v3557_v43, %v3556_v45 }
0x17f9   : > { %v5929_v48 = vmul.f32 %v3558_v47, %v5578_v46 }
0x17fb   : > { %4813 = vmatmul.msk.f32.vlgmr.msrb.gmra.mxu2 %vm666_vm0, %v5929_v48 }
0x17fd   : > { %3667 = vrot.lane.b32.xlu1 %v3644_v3, %s6172_s22 }
0x1847   : > { %v3753_v55 = vpop.trf.xlu1 }
0x1848   : > { %3862 = vmatpush.msra.mxu3 %v3753_v55 }
0x186f   : > { %v3668_v22 = vpop.permute.xlu1 %3667 }
0x187e   : > { %v3601_v50 = vpop.f32.mrf.mxu2 }
0x187f   : > { %v3602_v51 = vadd.f32 %v3601_v50, %v3580_v49 }
0x1881   : > { %3651 = vrot.lane.b32.xlu2 %v3602_v51, %s6173_s27  ;;  %3649 = vrot.lane.b32.xlu0 %v3602_v51, %s6172_s22 }
0x1889   : > { %3647 = vrot.lane.b32.xlu0 %v3602_v51, %s6171_s25 }
0x18a7   : > { %4957 = vxpose.xlu2.b32.start.end [1/1] (short) (narrow) %v4956_v54, 8 }
0x18ab   : > { %3705 = vxpose.xlu0.b32.start.end [1/1] (short) (narrow) %v3655_v52, 8 }
0x18db   : > { %v3652_v61 = vpop.permute.xlu2 %3651 }
0x18f3   : > { %v3650_v60 = vpop.permute.xlu0 %3649 }
0x18f4   : > { %4818 = vmatmul.msk.f32.vlgmr.msra.gmra.mxu3 %vm938_vm5, %v3650_v60 }
0x18fb   : > { %v3648_v5 = vpop.permute.xlu0 %3647 }
0x1940   : > { %v4958_v62 = vpop.trf.xlu2 }
0x1941   : > { %v4962_v42 = vunpack.i.h.bf16 %v4958_v62  ;;  %v4959_v63 = vunpack.i.l.bf16 %v4958_v62 }
0x1943   : > { %3818 = vmatpush.msra.mxu1 %v4959_v63  ;;  %3884 = vmatpush.msrb.mxu0 %v4962_v42 }
0x1944   : > { %4816 = vmatmul.msk.f32.vlgmr.msra.gmra.mxu1 %vm938_vm5, %v3602_v51  ;;  %4819 = vmatmul.msk.f32.vlgmr.msrb.gmra.mxu0 %vm938_vm5, %v3652_v61 }
0x194f   : > { %v3721_v0 = vpop.trf.xlu0 }
0x1950   : > { %3840 = vmatpush.msra.mxu2 %v3721_v0 }
0x1951   : > { %4817 = vmatmul.msk.f32.vlgmr.msra.gmra.mxu2 %vm938_vm5, %v3648_v5 }
0x1977   : > { %v3864_v13 = vpop.f32.mrf.mxu3 }
0x1978   : > { %v3891_v15 = vmul.f32 0.35355338, %v3864_v13 }
0x197a   : > { %v3899_v16 = vsel %vm938_vm5, %v3891_v15, -inf }
0x19c1   : > { %v3820_v4 = vpop.f32.mrf.mxu1  ;;  %v3886_v6 = vpop.f32.mrf.mxu0 }
0x19c2   : > { %v3889_v7 = vmul.f32 0.35355338, %v3820_v4  ;;  %v3892_v9 = vmul.f32 0.35355338, %v3886_v6 }
0x19c4   : > { %v3893_v11 = vsel %vm938_vm5, %v3889_v7, -inf  ;;  %v3902_v12 = vsel %vm938_vm5, %v3892_v9, -inf }
0x19c5   : > { %3894 = vmax.xlane.f32.xlu2 %v3893_v11  ;;  %3903 = vmax.xlane.f32.xlu0 %v3902_v12 }
0x19cd   : > { %3900 = vmax.xlane.f32.xlu0 %v3899_v16 }
0x19d4   : > { %v3842_v17 = vpop.f32.mrf.mxu2 }
0x19d5   : > { %v3890_v21 = vmul.f32 0.35355338, %v3842_v17 }
0x19d7   : > { %v3896_v20 = vsel %vm938_vm5, %v3890_v21, -inf }
0x19d8   : > { %3897 = vmax.xlane.f32.xlu1 %v3896_v20 }
0x19e1   : > { %3664 = vrot.lane.b32.xlu0 %v3644_v3, %s6171_s25  ;;  %s5130_s25 = scalar_lea.hbm %s5129_s26, 8 }
0x19e2   : > { %p5131_p0 = scmp.ne.s32.totalorder %s5129_s26, %s5130_s25 }
0x19e4   : > { %p5132_p1 = pnand %p5131_p0, %p5333_p5 }
0x19e6   : > { %p5133_p2 = pneg %p5132_p1 }
0x19f1   : > { %3670 = vrot.lane.b32.xlu1 %v3644_v3, %s6173_s27 }
0x1a26   : > { %4001 = vxpose.xlu1.b32.start.end [1/1] (short) (narrow) %v3668_v22, 8 }
0x1a38   : > { %v3904_v19 = vpop.xlane.xlu0 %3903  ;;  %v3895_v33 = vpop.xlane.xlu2 %3894 }
0x1a39   : > { %v3908_v25 = vsub.f32 %v3892_v9, %v3904_v19  ;;  %v3905_v34 = vsub.f32 %v3889_v7, %v3895_v33 }
0x1a3b   : > { %v3915_v27 = vmul.f32 1.442695, %v3908_v25  ;;  %v3909_v35 = vmul.f32 1.442695, %v3905_v34 }
0x1a40   : > { %v3901_v23 = vpop.xlane.xlu0 %3900 }
0x1a41   : > { %v3907_v24 = vsub.f32 %v3891_v15, %v3901_v23 }
0x1a43   : > { %v3913_v26 = vmul.f32 1.442695, %v3907_v24 }
0x1a45   : > { %5030 = vpow2.f32 %v3913_v26 }
0x1a46   : > { %5032 = vpow2.f32 %v3915_v27 }
0x1a47   : > { %5034 = vpow2.f32 %v3909_v35 }
0x1a4b   : > { %v5031_v28 = vpop.eup %5030  ;;  %v3898_v37 = vpop.xlane.xlu1 %3897 }
0x1a4c   : > { %v3923_v30 = vsel %vm938_vm5, %v5031_v28, 0.0  ;;  %v5033_v31 = vpop.eup %5032  ;;  %v3906_v41 = vsub.f32 %v3890_v21, %v3898_v37 }
0x1a4d   : > { %3924 = vadd.xlane.f32.xlu0 %v3923_v30  ;;  %v3926_v32 = vsel %vm938_vm5, %v5033_v31, 0.0  ;;  %v5035_v40 = vpop.eup %5034 }
0x1a4e   : > { %v3911_v38 = vmul.f32 1.442695, %v3906_v41  ;;  %v3917_v43 = vsel %vm938_vm5, %v5035_v40, 0.0 }
0x1a53   : > { %v3665_v29 = vpop.permute.xlu0 %3664 }
0x1a54   : > { %3969 = vxpose.xlu2.b32.start.end [1/1] (short) (narrow) %v3665_v29, 8 }
0x1a55   : > { %3927 = vadd.xlane.f32.xlu0 %v3926_v32 }
0x1a63   : > { %v3671_v53 = vpop.permute.xlu1 %3670 }
0x1a7e   : > { %3937 = vxpose.xlu0.b32.start.end [1/1] (short) (narrow) %v3644_v3, 8 }
0x1ac0   : > { %v3925_v39 = vpop.xlane.xlu0 %3924 }
0x1ac1   : > { %5036 = vrcp.f32 %v3925_v39 }
0x1ac2   : > { %5038 = vpow2.f32 %v3911_v38 }
0x1ac5   : > { %3918 = vadd.xlane.f32.xlu2 %v3917_v43 }
0x1ac7   : > { %v5037_v44 = vpop.eup %5036 }
0x1ac8   : > { %v3935_v45 = vmul.f32 %v5037_v44, %v5031_v28  ;;  %v3928_v47 = vpop.xlane.xlu0 %3927  ;;  %v5039_v49 = vpop.eup %5038 }
0x1ac9   : > { %5040 = vrcp.f32 %v3928_v47  ;;  %v3920_v50 = vsel %vm938_vm5, %v5039_v49, 0.0 }
0x1aca   : > { %4824 = vmatpush.xpose.msk.msrb.mxu3 %vm938_vm5, %v3935_v45 }
0x1acd   : > { %3921 = vadd.xlane.f32.xlu2 %v3920_v50 }
0x1acf   : > { %v5041_v51 = vpop.eup %5040 }
0x1ad0   : > { %v3936_v52 = vmul.f32 %v5041_v51, %v5033_v31 }
0x1ad2   : > { %4826 = vmatpush.xpose.msk.msra.mxu0 %vm938_vm5, %v3936_v52 }
0x1ae5   : > { %4963 = vset.pattern.permute.xlu0 %v5199_v36  ;;  %v4017_v36 = vpop.trf.xlu1 }
0x1ae6   : > { %4825 = vmatmul.msk.f32.vlgmr.msrb.gmra.mxu3 %vm938_vm5, %v4017_v36 }
0x1aed   : > { %v3985_v54 = vpop.trf.xlu2 }
0x1af6   : > { %4033 = vxpose.xlu2.b32.start.end [1/1] (short) (narrow) %v3671_v53, 8 }
0x1b22   : > { %v3953_v59 = vpop.trf.xlu0 }
0x1b38   : > { %v3919_v55 = vpop.xlane.xlu2 %3918 }
0x1b39   : > { %5042 = vrcp.f32 %v3919_v55 }
0x1b3f   : > { %v5043_v56 = vpop.eup %5042 }
0x1b40   : > { %v3933_v57 = vmul.f32 %v5043_v56, %v5035_v40  ;;  %v3922_v58 = vpop.xlane.xlu2 %3921 }
0x1b41   : > { %5044 = vrcp.f32 %v3922_v58 }
0x1b42   : > { %4820 = vmatpush.xpose.msk.msrb.mxu1 %vm938_vm5, %v3933_v57 }
0x1b45   : > { %4821 = vmatmul.msk.f32.vlgmr.msrb.gmra.mxu1 %vm938_vm5, %v3953_v59 }
0x1b47   : > { %v5045_v60 = vpop.eup %5044 }
0x1b48   : > { %v3934_v61 = vmul.f32 %v5045_v60, %v5039_v49 }
0x1b4a   : > { %4822 = vmatpush.xpose.msk.msrb.mxu2 %vm938_vm5, %v3934_v61 }
0x1b4d   : > { %4823 = vmatmul.msk.f32.vlgmr.msrb.gmra.mxu2 %vm938_vm5, %v3985_v54 }
0x1b69   : > { %v4140_v0 = vpop.f32.mrf.mxu3 }
0x1b8f   : > { %v4049_v62 = vpop.trf.xlu2 }
0x1b90   : > { %4827 = vmatmul.msk.f32.vlgmr.msra.gmra.mxu0 %vm938_vm5, %v4049_v62 }
0x1bc2   : > { %v4088_v42 = vpop.f32.mrf.mxu1 }
0x1bc3   : > { %4169 = vxpose.xlu1.b32.start.end [1/1] (short) (narrow) %v4088_v42, 8 }
0x1bd0   : > { %v4114_v63 = vpop.f32.mrf.mxu2 }
0x1bd1   : > { %4201 = vxpose.xlu1.b32.start.end [1/1] (short) (narrow) %v4114_v63, 8 }
0x1c0d   : > { %v4166_v5 = vpop.f32.mrf.mxu0 }
0x1c0e   : > { %4265 = vxpose.xlu2.b32.start.end [1/1] (short) (narrow) %v4166_v5, 8 }
0x1c16   : > { %4233 = vxpose.xlu2.b32.start.end [1/1] (short) (narrow) %v4140_v0, 8 }
0x1c67   : > { %v4185_v1 = vpop.trf.xlu1 }
0x1c68   : > { %v4299_v12 = vrot.slane %v4185_v1, 4 }
0x1c75   : > { %v4217_v2 = vpop.trf.xlu1 }
0x1c76   : > { %v4311_v3 = vrot.slane %v4217_v2, 4 }
0x1ca7   : > { %v4281_v4 = vpop.trf.xlu2 }
0x1ca8   : > { %v4309_v6 = vrot.slane %v4281_v4, 4  ;;  %v4312_v7 = vsel %vm1440_vm6, %v4281_v4, %v4311_v3 }
0x1ca9   : > { %v4320_v11 = vperm.slane %v4312_v7, %v5474_v10 }
0x1caa   : > { %v4310_v9 = vsel %vm1440_vm6, %v4309_v6, %v4217_v2 }
0x1cab   : > { %v4316_v13 = vperm.slane %v4310_v9, %v5474_v10  ;;  %v4333_v21 = vrot.slane %v4320_v11, 4 }
0x1cad   : > { %v4321_v19 = vrot.slane %v4316_v13, 4 }
0x1caf   : > { %v4249_v15 = vpop.trf.xlu2 }
0x1cb0   : > { %v4297_v16 = vrot.slane %v4249_v15, 4  ;;  %v4300_v17 = vsel %vm1440_vm6, %v4249_v15, %v4299_v12  ;;  %v3576_v12 = vld [vmem:[#allocation2 + $0x30] sm:$0xff] }
0x1cb1   : > { %v4308_v20 = vperm.slane %v4300_v17, %v5474_v10 }
0x1cb2   : > { %v4298_v22 = vsel %vm1440_vm6, %v4297_v16, %v4185_v1 }
0x1cb3   : > { %v4304_v23 = vperm.slane %v4298_v22, %v5474_v10  ;;  %v4334_v24 = vsel %vm1440_vm6, %v4333_v21, %v4308_v20  ;;  %v4335_v25 = vrot.slane %v4308_v20, 4 }
0x1cb4   : > { %v4340_v26 = vperm.slane %v4334_v24, %v5479_v18 }
0x1cb5   : > { %v4322_v27 = vsel %vm1440_vm6, %v4321_v19, %v4304_v23  ;;  %v4323_v28 = vrot.slane %v4304_v23, 4  ;;  %v4336_v30 = vsel %vm1440_vm6, %v4320_v11, %v4335_v25  ;;  %v3577_v11 = vld [vmem:[#allocation2 + $0x38] sm:$0xff]  ;;  %v4422_v19 = vperm.slane %v5904_v14, 3  ;;  %v4478_v14 = vld [vmem:[#allocation5 + $0x28] sm:$0xff] }
0x1cb6   : > { %v4328_v31 = vperm.slane %v4322_v27, %v5479_v18  ;;  %v4344_v29 = vperm.slane %v4336_v30, %v5479_v18  ;;  %v4349_v34 = vrot.slane %v4340_v26, 4  ;;  %4438 = vmatpush.msra.mxu1 %v3577_v11 }
0x1cb7   : > { %v4324_v32 = vsel %vm1440_vm6, %v4316_v13, %v4323_v28  ;;  %v3575_v13 = vld [vmem:[#allocation2 + $0x28] sm:$0xff] }
0x1cb8   : > { %v4332_v33 = vperm.slane %v4324_v32, %v5479_v18  ;;  %v4351_v35 = vrot.slane %v4344_v29, 4  ;;  %v4345_v37 = vrot.slane %v4328_v31, 4  ;;  %v4350_v45 = vsel %vm1440_vm6, 0.0, %v4349_v34  ;;  %4439 = vmatpush.msra.mxu1 %v3576_v12  ;;  %v4480_v32 = vld [vmem:[#allocation5 + $0x38] sm:$0xff]  ;;  %v4477_v34 = vld [vmem:[#allocation5 + $0x20] sm:$0xff] }
0x1cb9   : > { %4501 = vmatpush.msra.mxu2 %v4480_v32 }
0x1cba   : > { %v4347_v41 = vrot.slane %v4332_v33, 4  ;;  %v4352_v38 = vsel %vm1440_vm6, 0.0, %v4351_v35  ;;  %v4364_v39 = vsel %vm1440_vm6, %v4351_v35, %v4340_v26  ;;  %v4346_v53 = vsel %vm1440_vm6, 0.0, %v4345_v37  ;;  %4440 = vmatpush.msra.mxu1 %v3575_v13  ;;  %v4479_v33 = vld [vmem:[#allocation5 + $0x30] sm:$0xff] }
0x1cbb   : > { %v4368_v40 = vperm.slane %v4364_v39, %v5474_v10  ;;  %v4369_v43 = vrot.slane %v4352_v38, 4  ;;  %4502 = vmatpush.msra.mxu2 %v4479_v33 }
0x1cbc   : > { %v4348_v44 = vsel %vm1440_vm6, 0.0, %v4347_v41  ;;  %v4353_v47 = vsel %vm1440_vm6, %v4347_v41, %v4328_v31 }
0x1cbd   : > { %v4370_v49 = vsel %vm1440_vm6, %v4369_v43, %v4350_v45  ;;  %v4357_v50 = vperm.slane %v4353_v47, %v5474_v10  ;;  %v4358_v51 = vrot.slane %v4348_v44, 4  ;;  %v4389_v52 = vrot.slane %v4368_v40, 4  ;;  %4503 = vmatpush.msra.mxu2 %v4478_v14  ;;  %v4829_v43 = vld [vmem:[%s6118_s12 + $0x2] sm:$0x3] }
0x1cbe   : > { %v4374_v54 = vperm.slane %v4370_v49, %v5474_v10  ;;  %v4471_v47 = vperm.slane %v4829_v43, 0 }
0x1cbf   : > { %v4359_v55 = vsel %vm1440_vm6, %v4358_v51, %v4346_v53  ;;  %v4377_v56 = vrot.slane %v4357_v50, 4  ;;  %4504 = vmatpush.msra.mxu2 %v4477_v34 }
0x1cc0   : > { %v4363_v57 = vperm.slane %v4359_v55, %v5474_v10  ;;  %v4390_v58 = vsel %vm1440_vm6, %v4374_v54, %v4389_v52  ;;  %v4387_v59 = vrot.slane %v4374_v54, 4  ;;  %v4839_v55 = vld [vmem:[%s6121_s15 + $0x78] sm:$0xff] }
0x1cc1   : > { %v4398_v60 = vperm.slane %v4390_v58, %v5479_v18  ;;  %4543 = vmatpush.msra.mxu3 %v4839_v55  ;;  %v4836_v58 = vld [vmem:[%s6121_s15 + $0x60] sm:$0xff] }
0x1cc2   : > { %v4378_v61 = vsel %vm1440_vm6, %v4363_v57, %v4377_v56  ;;  %v4375_v36 = vrot.slane %v4363_v57, 4  ;;  %v4388_v62 = vsel %vm1440_vm6, %v4387_v59, %v4368_v40  ;;  %v4838_v56 = vld [vmem:[%s6121_s15 + $0x70] sm:$0xff]  ;;  %v4837_v57 = vld [vmem:[%s6121_s15 + $0x68] sm:$0xff]  ;;  %v4835_v59 = vld [vmem:[%s6121_s15 + $0x58] sm:$0xff] }
0x1cc3   : > { %v4386_v42 = vperm.slane %v4378_v61, %v5479_v18  ;;  %v4403_v63 = vrot.slane %v4398_v60, 4  ;;  %v4394_v5 = vperm.slane %v4388_v62, %v5479_v18  ;;  %4544 = vmatpush.msra.mxu3 %v4838_v56  ;;  %v4833_v61 = vld [vmem:[%s6121_s15 + $0x48] sm:$0xff]  ;;  %v4966_v62 = vld [vmem:[%s6120_s14 + $0x1] ss:$0 sm:$0xff] }
0x1cc4   : > { %v4376_v0 = vsel %vm1440_vm6, %v4375_v36, %v4357_v50  ;;  %v4473_v50 = vperm.slane %v4829_v43, 1  ;;  %v4832_v36 = vld [vmem:[%s6121_s15 + $0x40] sm:$0xff] }
0x1cc5   : > { %v4404_v1 = vsel %vm1440_vm6, %v4403_v63, %v4386_v42  ;;  %v4405_v10 = vrot.slane %v4386_v42, 4  ;;  %v4382_v2 = vperm.slane %v4376_v0, %v5479_v18  ;;  %v4399_v3 = vrot.slane %v4394_v5, 4  ;;  %v3574_v18 = vld [vmem:[#allocation2 + $0x20] sm:$0xff]  ;;  %4545 = vmatpush.msra.mxu3 %v4837_v57 }
0x1cc6   : > { %4412 = vrot.lane.b32.xlu1 %v4404_v1, %s6175_s21  ;;  %4441 = vmatpush.msra.mxu1 %v3574_v18  ;;  %s637_s21 = sand.u32 1, %s5176_s28  }
0x1cc7   : > { %v4406_v4 = vsel %vm1440_vm6, %v4398_v60, %v4405_v10  ;;  %v4401_v6 = vrot.slane %v4382_v2, 4  ;;  %v4400_v7 = vsel %vm1440_vm6, %v4399_v3, %v4382_v2  ;;  %4546 = vmatpush.msra.mxu3 %v4836_v58  ;;  %v4834_v60 = vld [vmem:[%s6121_s15 + $0x50] sm:$0xff]  ;;  %s4727_s2 = sshll.u32 %s637_s21, 3  ;;  %s4587_s0 = scalar_lea.sflag [#allocation4], %s637_s21 }
0x1cc8   : > { %4416 = vrot.lane.b32.xlu0 %v4406_v4, %s6174_s29  ;;  %s639_s1 = scalar_lea.vmem [#allocation7], %s4727_s2  ;;  %s5134_s29 = scalar_lea.hbm %s6177_s4, 16 }
0x1cc9   : > { %v4402_v9 = vsel %vm1440_vm6, %v4394_v5, %v4401_v6  ;;  %4547 = vmatpush.msra.mxu3 %v4835_v59  ;;  %s4599_s10 = sshll.u32 %s639_s1, 4  ;;  %p5136_p4 = scmp.lt.s32.totalorder %s5134_s29, %s5130_s25  ;;  %s4600_s10 = int_to_ptr.vmem [resolvable:$true] %s4599_s10 }
0x1cca   : > { %4408 = vrot.lane.b32.xlu2 %v4402_v9, %s6176_s19  ;;  %v4967_v9 = vld [vmem:[%s6122_s16 + $0x1] ss:$0 sm:$0xff] }
0x1ccb   : > { %4548 = vmatpush.msra.mxu3 %v4834_v60  ;;  %p5137_p7 = por %p5136_p4, %p5135_p3 }
0x1ccd   : > { %4549 = vmatpush.msra.mxu3 %v4833_v61  ;;  %p5138_p8 = pnand %p5137_p7, %p5133_p2 }
0x1ccf   : > { %4550 = vmatpush.msra.mxu3 %v4832_v36 }
0x1d24   : > { %v4409_v15 = vpop.permute.xlu2 %4408 }
0x1d25   : > { %v4419_v16 = vsel %vm938_vm5, %v4400_v7, %v4409_v15 }
0x1d38   : > { %v4413_v17 = vpop.permute.xlu1 %4412 }
0x1d39   : > { %v4420_v21 = vsel %vm1563_vm7, %v4419_v16, %v4413_v17 }
0x1d3a   : > { %v4417_v20 = vpop.permute.xlu0 %4416 }
0x1d3b   : > { %v4421_v22 = vsel %vm1565_vm8, %v4420_v21, %v4417_v20 }
0x1d3c   : > { %4828 = vmatmul.msk.f32.vlgmr.msra.gmra.mxu1 %vm666_vm0, %v4421_v22 }
0x1db9   : > { %v4443_v23 = vpop.f32.mrf.mxu1 }
0x1dba   : > { %v4444_v24 = vadd.f32 %v4443_v23, %v4422_v19 }
0x1dbc   : > { %v4446_v25 = vadd.f32 %v4444_v24, %v5929_v48 }
0x1dbe   : > { %v4449_v26 = vsel %vm666_vm0, %v4446_v25, 0.0 }
0x1dbf   : > { %4450 = vadd.xlane.f32.xlu1 %v4449_v26 }
0x1e32   : > { %v4451_v27 = vpop.xlane.xlu1 %4450 }
0x1e33   : > { %v4452_v28 = vmul.f32 %v4451_v27, %v5377_v8 }
0x1e35   : > { %v4453_v30 = vsub.f32 %v4446_v25, %v4452_v28  ;;  %v4842_v28 = vld [vmem:[%s6123_s17 + $0x2] sm:$0x3] }
0x1e36   : > { %v4582_v32 = vperm.slane %v4842_v28, 1 }
0x1e37   : > { %v4454_v31 = vmul.f32 %v4453_v30, %v4453_v30 }
0x1e39   : > { %v4455_v29 = vsel %vm666_vm0, %v4454_v31, 0.0 }
0x1e3a   : > { %4456 = vadd.xlane.f32.xlu2 %v4455_v29  ;;  %v4580_v29 = vperm.slane %v4842_v28, 0 }
0x1ead   : > { %v4457_v48 = vpop.xlane.xlu2 %4456 }
0x1eae   : > { %v4458_v35 = vmul.f32 %v4457_v48, %v5377_v8 }
0x1eb0   : > { %v4459_v37 = vadd.f32 1e-12, %v4458_v35 }
0x1eb2   : > { %5046 = vrsqrt.f32 %v4459_v37  ;;  %vm4466_vm6 = vweird.f32 %v4459_v37 }
0x1eb8   : > { %v5047_v41 = vpop.eup %5046 }
0x1eb9   : > { %v4461_v38 = vmul.f32 %v5047_v41, %v4459_v37  ;;  %vm4467_vm5 = vweird.f32 %v5047_v41 }
0x1eba   : > { %vm4468_vm7 = vmor %vm4466_vm6, %vm4467_vm5 }
0x1ebb   : > { %v4462_v39 = vmul.f32 %v5047_v41, %v4461_v38 }
0x1ebd   : > { %v4463_v40 = vmul.f32 0.5, %v4462_v39 }
0x1ebf   : > { %v4464_v44 = vsub.f32 1.5, %v4463_v40 }
0x1ec1   : > { %v4465_v45 = vmul.f32 %v5047_v41, %v4464_v44 }
0x1ec3   : > { %v4469_v49 = vsel %vm4468_vm7, %v5047_v41, %v4465_v45 }
0x1ec4   : > { %v4470_v51 = vmul.f32 %v4469_v49, %v4453_v30 }
0x1ec6   : > { %v4472_v52 = vmul.f32 %v4471_v47, %v4470_v51 }
0x1ec8   : > { %v4474_v53 = vadd.f32 %v4473_v50, %v4472_v52 }
0x1eca   : > { %v4475_v54 = vmul.f32 %v4474_v53, %v5578_v46 }
0x1ecc   : > { %4831 = vmatmul.msk.f32.vlgmr.msra.gmra.mxu2 %vm666_vm0, %v4475_v54 }
0x1f4f   : > { %v4506_v42 = vpop.f32.mrf.mxu2 }
0x1f50   : > { %v4507_v63 = vadd.f32 %v4966_v62, %v4506_v42 }
0x1f52   : > { %v4509_v5 = vmul.f32 %v4507_v63, %v4507_v63 }
0x1f54   : > { %v4510_v0 = vmul.f32 %v4509_v5, %v4507_v63 }
0x1f56   : > { %v4511_v1 = vmul.f32 0.044715, %v4510_v0 }
0x1f58   : > { %v4512_v10 = vadd.f32 %v4511_v1, %v4507_v63 }
0x1f5a   : > { %v4513_v2 = vmul.f32 0.7978846, %v4512_v10 }
0x1f5c   : > { %5048 = vtanh.f32 %v4513_v2 }
0x1f62   : > { %v5049_v3 = vpop.eup %5048 }
0x1f63   : > { %v4515_v4 = vadd.f32 1.0, %v5049_v3 }
0x1f65   : > { %v4516_v6 = vmul.f32 0.5, %v4515_v4 }
0x1f67   : > { %v4517_v7 = vmul.f32 %v4516_v6, %v4507_v63 }
0x1f69   : > { %4841 = vmatmul.msk.f32.vlgmr.msra.gmra.mxu3 %vm2587_vm15, %v4517_v7 }
0x1fec   : > { %v4552_v11 = vpop.f32.mrf.mxu3 }
0x1fed   : > { %v4553_v12 = vadd.f32 %v4967_v9, %v4552_v11 }
0x1fef   : > { %v4555_v13 = vadd.f32 %v4553_v12, %v4475_v54 }
0x1ff1   : > { %v4558_v18 = vsel %vm666_vm0, %v4555_v13, 0.0 }
0x1ff2   : > { %4559 = vadd.xlane.f32.xlu0 %v4558_v18 }
0x2065   : > { %v4560_v15 = vpop.xlane.xlu0 %4559 }
0x2066   : > { %v4561_v16 = vmul.f32 %v4560_v15, %v5377_v8 }
0x2068   : > { %v4562_v17 = vsub.f32 %v4555_v13, %v4561_v16 }
0x206a   : > { %v4563_v21 = vmul.f32 %v4562_v17, %v4562_v17 }
0x206c   : > { %v4564_v20 = vsel %vm666_vm0, %v4563_v21, 0.0 }
0x206d   : > { %4565 = vadd.xlane.f32.xlu1 %v4564_v20 }
0x20e0   : > { %v4566_v22 = vpop.xlane.xlu1 %4565 }
0x20e1   : > { %v4567_v19 = vmul.f32 %v4566_v22, %v5377_v8 }
0x20e3   : > { %v4568_v23 = vadd.f32 1e-12, %v4567_v19 }
0x20e5   : > { %5050 = vrsqrt.f32 %v4568_v23  ;;  %vm4575_vm11 = vweird.f32 %v4568_v23 }
0x20eb   : > { %v5051_v24 = vpop.eup %5050 }
0x20ec   : > { %v4570_v25 = vmul.f32 %v5051_v24, %v4568_v23  ;;  %vm4576_vm8 = vweird.f32 %v5051_v24 }
0x20ed   : > { %vm4577_vm12 = vmor %vm4575_vm11, %vm4576_vm8 }
0x20ee   : > { %v4571_v26 = vmul.f32 %v5051_v24, %v4570_v25 }
0x20f0   : > { %v4572_v27 = vmul.f32 0.5, %v4571_v26 }
0x20f2   : > { %v4573_v30 = vsub.f32 1.5, %v4572_v27 }
0x20f4   : > { %v4574_v31 = vmul.f32 %v5051_v24, %v4573_v30 }
0x20f6   : > { %v4578_v8 = vsel %vm4577_vm12, %v5051_v24, %v4574_v31 }
0x20f7   : > { %v4579_v33 = vmul.f32 %v4578_v8, %v4562_v17 }
0x20f9   : > { %v4581_v14 = vmul.f32 %v4580_v29, %v4579_v33 }
0x20fb   : > { %v4583_v34 = vadd.f32 %v4582_v32, %v4581_v14 }
0x20fd   : > { %v4584_v48 = vmul.f32 %v4583_v34, %v5578_v46 }
0x20ff   : > { %4585 = vst.msk [vmem:[%s639_s1] sm:$0xff] %vm666_vm0, %v4584_v48 }
0x2100   : > { %5141 = shalt.err (!%p5138_p8)
}
0x2101   : > { %4855 = dma.vmem_to_hbm [thread:$0]  (%p5333_p5), %s4600_s10, 128, %s4602_s13, %s4587_s0  }
0x2102 PF: > { %s6179_s21 = sld [smem:[#allocation13_spill]] }
0x2103   : > { %s6180_s2 = sld [smem:[#allocation11_spill]] }
0x2108   : > { %p4872_p9 = scmp.ge.s32.totalorder %s6179_s21, 2 }
0x2109   : > { %s4613_s23 = sand.u32 1, %s6180_s2  }
0x210a   : > { %p4865_p10 = pnand %p4872_p9, %p5337_p6  ;;  %s4614_s24 = scalar_lea.sflag [#allocation4], %s4613_s23 }
0x210c   : > { %p4866_p11 = pneg %p4865_p10 }
0x210e   : > { %5167 = dma.done.wait (%p4866_p11), %s4614_s24, 128  }
0x210f   : > { %5169 = vsyncadd (%p4866_p11), %s4614_s24, 4294967168  ;;  %s6182_s30 = sld [smem:[#allocation14_spill]]  ;;  %s6185_s27 = smov %s5176_s28 }
0x2110   : > { %s6183_s3 = sld [smem:[#allocation12_spill]] }
0x2111   : > { %s6184_s29 = sld [smem:[#allocation15_spill]] }
0x2115   : > { %p30_p12 = scmp.ge.s32.totalorder %s6182_s30, 4  }
0x2116   : > { %s6186_s28 = smov %s6183_s3 }
0x2117   :  { %32 = sbr.rel (!%p30_p12) target bundleno = 14 (0xe), region = 158 }
0x211c   :  { %4620 = vsyncpa [#allocation3], 1 }
0x211d   :  { %4622 = vsyncpa [#allocation3 + $0x1], 1 }
0x211e   :  { %4623 = vsyncpa [#allocation6], 1 }
0x211f   :  { %4624 = vsyncpa [#allocation4], 1 }
0x2120   :  { %4626 = vsyncpa [#allocation4 + $0x1], 1 }

</bundles_post_ra>
